<compile_context>
chip_gen: v7x
topology: tpu7x:2x2x1
jax: 0.10.0
libtpu: 0.0.40
codegen_flags: <defaults>
</compile_context>

<pallas_src>
import math
import jax
import jax.numpy as jnp
from jax.experimental import pallas as pl
from jax.experimental.pallas import tpu as pltpu

BN_EPS = 1e-5


# ----------------------------- fused kernel -----------------------------

def make_fused_kernel(layers, k_list):
    """Kernel closes over the static layer structure (layers, per-layer k)."""

    def kernel(xin_ref, ea_ref, src1_ref, tgt1_ref, astk_ref, pool_ref,
               wex_ref, bex_ref, wn_ref, bn_ref,
               ope_ref, w1_ref, b1_ref, w2_ref, b2_ref,
               out_ref):
        f32, bf16 = jnp.float32, jnp.bfloat16

        # --- embeddings (bf16 MXU, f32 accumulate); stay resident all layers ---
        edge_attr = (jnp.dot(ea_ref[...], wex_ref[...],
                             preferred_element_type=f32) + bex_ref[...])
        h = (jnp.dot(xin_ref[...], wn_ref[...],
                     preferred_element_type=f32) + bn_ref[...])

        src1 = src1_ref[...]          # (E, N) bf16 one-hot of edge sources
        tgt1 = tgt1_ref[...]          # (N, E) bf16 one-hot of edge targets

        # bf16 layer-output history (every consumer feeds a bf16 MXU dot)
        XX = [h.astype(bf16)]
        for l in range(layers):
            k_l = k_list[l]
            ope = ope_ref[l]                       # (k_max+1, Hpad) == 1 + eps
            # (1 + eps[0]) * x_latest
            result = ope[0:1, :] * XX[0]
            # hop-1 neighbourhood with edge attributes
            msg = jnp.maximum(
                jnp.dot(src1, XX[0], preferred_element_type=f32) + edge_attr,
                0.0)
            result = result + ope[1:2, :] * jnp.dot(
                tgt1, msg.astype(bf16), preferred_element_type=f32)
            # hops 2..k (no edge attributes) on older layer outputs
            for i in range(1, k_l):
                result = result + ope[i + 1:i + 2, :] * jnp.dot(
                    astk_ref[i - 1], jnp.maximum(XX[i], 0.0),
                    preferred_element_type=f32)
            # GINEPLUS.nn (BNs folded) + ConvBlock.norm (folded) + ReLU
            t = jnp.maximum(
                jnp.dot(result.astype(bf16), w1_ref[l],
                        preferred_element_type=f32) + b1_ref[l], 0.0)
            t = jnp.maximum(
                jnp.dot(t.astype(bf16), w2_ref[l],
                        preferred_element_type=f32) + b2_ref[l], 0.0)
            XX = [t.astype(bf16)] + XX

        # JK='last' + global_add_pool, fused: (G, N) @ (N, Hpad)
        out_ref[...] = jnp.dot(pool_ref[...], XX[0],
                               preferred_element_type=f32)

    return kernel


def _full_spec(shape):
    nd = len(shape)
    return pl.BlockSpec(shape, lambda i, _nd=nd: (0,) * _nd)


def gine_forward(params, data):
    mats = data['mats']
    args = (data['x_in'], data['edge_attr'],
            mats['src1'], mats['tgt1'], mats['A_stack'], mats['pool'],
            params['Wex'], params['bex'], params['Wn'], params['bn'],
            params['ope_all'], params['W1_all'], params['b1_all'],
            params['W2_all'], params['b2_all'])
    g = mats['pool'].shape[0]
    out_pad = pl.pallas_call(
        make_fused_kernel(params['layers'], tuple(params['k_list'])),
        out_shape=jax.ShapeDtypeStruct((g, params['h_pad']), jnp.float32),
        grid=(1,),
        in_specs=[_full_spec(a.shape) for a in args],
        out_specs=_full_spec((g, params['h_pad'])),
        compiler_params=pltpu.CompilerParams(
            dimension_semantics=("arbitrary",)),
    )(*args)
    return out_pad[:, :params['hidden']]          # strip lane padding


# ----------------------------- parameter setup -----------------------------

def init_linear(key, fan_in, fan_out):
    kw, kb = jax.random.split(key)
    bound = 1.0 / math.sqrt(fan_in)
    W = jax.random.uniform(kw, (fan_in, fan_out), jnp.float32, -bound, bound)
    b = jax.random.uniform(kb, (fan_out,), jnp.float32, -bound, bound)
    return W, b


def pad2(a, rows, cols):
    return jnp.pad(a, ((0, rows - a.shape[0]), (0, cols - a.shape[1])))


def _round_up(v, m):
    return ((v + m - 1) // m) * m


def build_params(key, f_node, r_dim, edge_dim, hidden, layers, k_max,
                 h_pad=128):
    """Weights stored (in, out), bf16, BN-folded; hidden lane-padded to h_pad;
    MLP hidden width padded only to round_up(2*hidden, 128) (not 2*h_pad)."""
    in_dim = f_node + r_dim
    h2_pad = _round_up(2 * hidden, 128)
    bf16 = jnp.bfloat16
    keys = jax.random.split(key, 2 + 2 * layers)
    Wex, bex = init_linear(keys[0], edge_dim, hidden)
    Wn, bn = init_linear(keys[1], in_dim, hidden)

    # eval-mode BatchNorm1d with weight_reset state (gamma=1, beta=0,
    # running_mean=0, running_var=1) is a pure positive scale:
    s = 1.0 / math.sqrt(1.0 + BN_EPS)

    Wex_p = pad2(Wex, edge_dim, h_pad).astype(bf16)
    bex_p = pad2(bex.reshape(1, hidden), 1, h_pad)
    Wn_p = pad2(Wn, in_dim, h_pad).astype(bf16)
    bn_p = pad2(bn.reshape(1, hidden), 1, h_pad)

    k_list, W1s, b1s, W2s, b2s = [], [], [], [], []
    for l in range(layers):
        k_l = min(l + 1, k_max)
        k_list.append(k_l)
        W1, b1 = init_linear(keys[2 + 2 * l], hidden, 2 * hidden)
        W2, b2 = init_linear(keys[3 + 2 * l], 2 * hidden, hidden)
        # Fold BN(2H) into Linear1; fold BN(H) *and* ConvBlock.norm into
        # Linear2 (positive scales commute with the interleaved ReLUs, and the
        # conditional non-last-layer ReLU is idempotent on a ReLU output).
        W1f, b1f = W1 * s, b1 * s
        W2f, b2f = W2 * (s * s), b2 * (s * s)
        W1s.append(pad2(W1f, h_pad, h2_pad).astype(bf16))
        b1s.append(pad2(b1f.reshape(1, 2 * hidden), 1, h2_pad))
        W2s.append(pad2(W2f, h2_pad, h_pad).astype(bf16))
        b2s.append(pad2(b2f.reshape(1, hidden), 1, h_pad))
        # NOTE: ConvBlock.edge_emb (Linear(dim, dim, bias=False)) is never
        # used in the PyTorch forward, so it is not materialized here.

    # GINEPLUS.eps initialises to zeros; 1+eps is folded host-side so the
    # kernel does a single VPU multiply per hop term (no per-hop broadcast+add).
    ope_all = jnp.ones((layers, k_max + 1, h_pad), jnp.float32)
    # NOTE: self.alphas is unused for feature_fusion='average'.
    return dict(hidden=hidden, h_pad=h_pad, layers=layers, k_list=k_list,
                Wex=Wex_p, bex=bex_p, Wn=Wn_p, bn=bn_p,
                ope_all=ope_all,
                W1_all=jnp.stack(W1s), b1_all=jnp.stack(b1s),
                W2_all=jnp.stack(W2s), b2_all=jnp.stack(b2s))


# ------------------- pure-jnp reference (same dense math) -------------------

def reference_forward(params, data):
    f32, bf16 = jnp.float32, jnp.bfloat16
    mats = data['mats']
    edge_attr = jnp.dot(data['edge_attr'], params['Wex'],
                        preferred_element_type=f32) + params['bex']
    h = jnp.dot(data['x_in'], params['Wn'],
                preferred_element_type=f32) + params['bn']
    XX = [h.astype(bf16)]
    for l in range(params['layers']):
        k_l = params['k_list'][l]
        ope = params['ope_all'][l]
        result = ope[0:1, :] * XX[0]
        msg = jnp.maximum(
            jnp.dot(mats['src1'], XX[0], preferred_element_type=f32)
            + edge_attr, 0.0)
        result = result + ope[1:2, :] * jnp.dot(
            mats['tgt1'], msg.astype(bf16), preferred_element_type=f32)
        for i in range(1, k_l):
            result = result + ope[i + 1:i + 2, :] * jnp.dot(
                mats['A_stack'][i - 1], jnp.maximum(XX[i], 0.0),
                preferred_element_type=f32)
        t = jnp.maximum(jnp.dot(result.astype(bf16), params['W1_all'][l],
                                preferred_element_type=f32)
                        + params['b1_all'][l], 0.0)
        t = jnp.maximum(jnp.dot(t.astype(bf16), params['W2_all'][l],
                                preferred_element_type=f32)
                        + params['b2_all'][l], 0.0)
        XX = [t.astype(bf16)] + XX
    out = jnp.dot(mats['pool'], XX[0], preferred_element_type=f32)
    return out[:, :params['hidden']]


# ----------------------------- synthetic data -----------------------------

def gen_edges(key, n_per_graph, n_graphs, e_per_graph):
    ks, kt = jax.random.split(key)
    src = jax.random.randint(ks, (n_graphs, e_per_graph), 0, n_per_graph)
    tgt = jax.random.randint(kt, (n_graphs, e_per_graph), 0, n_per_graph)
    off = (jnp.arange(n_graphs) * n_per_graph)[:, None]
    return jnp.stack([(src + off).reshape(-1), (tgt + off).reshape(-1)], axis=0)


if __name__ == "__main__":
    key = jax.random.PRNGKey(0)
    G, NPG = 8, 16                # 8 graphs x 16 nodes (G multiple of 8;
    N = G * NPG                   # N = 128 fills MXU rows / sublanes)
    F_NODE, R_DIM = 6, 5          # num_features, rw_feature dim -> in_dim = 11
    EDGE_DIM, HIDDEN = 4, 32
    LAYERS, K = 3, 4
    H_PAD = 128                   # lane-dense feature padding

    ks = jax.random.split(key, 12)
    x = jax.random.normal(ks[0], (N, F_NODE), jnp.float32)
    rw = jax.random.normal(ks[1], (N, R_DIM), jnp.float32)
    c2s = jax.random.normal(ks[2], (N, R_DIM), jnp.float32)
    samehop = jax.random.normal(ks[3], (N, R_DIM), jnp.float32)

    hop1 = gen_edges(ks[4], NPG, G, 24)   # (2, 192) — same edge set as edge_attr
    hop2 = gen_edges(ks[5], NPG, G, 32)   # (2, 256)
    hop3 = gen_edges(ks[6], NPG, G, 40)   # (2, 320)
    # hop4 / hop5 exist in the data schema but are unused with layers=3 (k<=3),
    # so no dense adjacency is built for them (avoids wasted host work).
    E1 = hop1.shape[1]
    edge_attr_raw = jax.random.normal(ks[9], (E1, EDGE_DIM), jnp.float32)
    batch = jnp.repeat(jnp.arange(G), NPG)          # node -> graph id
    # TODO(synk): collate_edge_index with data.ptr is reproduced by generating
    # the already-collated (batch-offset) hop edge indices directly above.

    # feature_fusion == 'average' + the [x | avg] concat are precomputed so the
    # kernel does one node-embedding matmul over a single input stream.
    avg = (rw + c2s + samehop) / 3.0
    x_in = jnp.concatenate([x, avg], axis=1).astype(jnp.bfloat16)

    # dense structural operators (exact small integers -> lossless in bf16)
    src1 = jax.nn.one_hot(hop1[0], N, dtype=jnp.float32)        # (E, N)
    tgt1 = jax.nn.one_hot(hop1[1], N, dtype=jnp.float32).T      # (N, E)
    max_k = min(LAYERS, K)
    A_list = []
    for hop in (hop2, hop3)[:max_k - 1]:
        A_list.append(jax.nn.one_hot(hop[1], N, dtype=jnp.float32).T
                      @ jax.nn.one_hot(hop[0], N, dtype=jnp.float32))   # (N, N)
    A_stack = jnp.stack(A_list)                                  # (max_k-1, N, N)
    pool = jax.nn.one_hot(batch, G, dtype=jnp.float32).T         # (G, N)

    # bf16 structural matrices: lossless for one-hots / small counts, single-
    # pass bf16 MXU on every generation (v7x has no int MXU path).
    # TODO(synk): on v5e/v6e-only deployments int8 structural operands would
    # halve bytes again; kept bf16 here for v7x portability.
    mats = dict(src1=src1.astype(jnp.bfloat16),
                tgt1=tgt1.astype(jnp.bfloat16),
                A_stack=A_stack.astype(jnp.bfloat16),
                pool=pool.astype(jnp.bfloat16))

    data = dict(x_in=x_in, edge_attr=edge_attr_raw.astype(jnp.bfloat16),
                mats=mats)
    params = build_params(ks[10], F_NODE, R_DIM, EDGE_DIM, HIDDEN,
                          LAYERS, K, H_PAD)

    out = jax.block_until_ready(gine_forward(params, data))     # (G, HIDDEN)
    ref = jax.block_until_ready(reference_forward(params, data))

    assert out.shape == (G, HIDDEN)
    err = jnp.max(jnp.abs(out - ref))
    assert jnp.allclose(out, ref, rtol=1e-3, atol=1e-3), f"max diff {err}"
    print("KERNEL_OK")
</pallas_src>

<mosaic_0001>
module attributes {stable_mosaic.version = 11 : i64} {
  func.func @kernel(%arg0: i32, %arg1: memref<128x11xbf16, #tpu.memory_space<vmem>>, %arg2: memref<192x4xbf16, #tpu.memory_space<vmem>>, %arg3: memref<192x128xbf16, #tpu.memory_space<vmem>>, %arg4: memref<128x192xbf16, #tpu.memory_space<vmem>>, %arg5: memref<2x128x128xbf16, #tpu.memory_space<vmem>>, %arg6: memref<8x128xbf16, #tpu.memory_space<vmem>>, %arg7: memref<4x128xbf16, #tpu.memory_space<vmem>>, %arg8: memref<1x128xf32, #tpu.memory_space<vmem>>, %arg9: memref<11x128xbf16, #tpu.memory_space<vmem>>, %arg10: memref<1x128xf32, #tpu.memory_space<vmem>>, %arg11: memref<3x5x128xf32, #tpu.memory_space<vmem>>, %arg12: memref<3x128x128xbf16, #tpu.memory_space<vmem>>, %arg13: memref<3x1x128xf32, #tpu.memory_space<vmem>>, %arg14: memref<3x128x128xbf16, #tpu.memory_space<vmem>>, %arg15: memref<3x1x128xf32, #tpu.memory_space<vmem>>, %arg16: memref<8x128xf32, #tpu.memory_space<vmem>>) attributes {dimension_semantics = [#tpu.dimension_semantics<arbitrary>], iteration_bounds = array<i64: 1>, scalar_prefetch = 0 : i64, scratch_operands = 0 : i64, tpu.core_type = #tpu.core_type<tc>, window_params = [{pipeline_mode = #tpu.pipeline_mode<synchronous>, transform_indices = @transform_0, window_bounds = array<i64: 128, 11>}, {pipeline_mode = #tpu.pipeline_mode<synchronous>, transform_indices = @transform_1, window_bounds = array<i64: 192, 4>}, {pipeline_mode = #tpu.pipeline_mode<synchronous>, transform_indices = @transform_2, window_bounds = array<i64: 192, 128>}, {pipeline_mode = #tpu.pipeline_mode<synchronous>, transform_indices = @transform_3, window_bounds = array<i64: 128, 192>}, {pipeline_mode = #tpu.pipeline_mode<synchronous>, transform_indices = @transform_4, window_bounds = array<i64: 2, 128, 128>}, {pipeline_mode = #tpu.pipeline_mode<synchronous>, transform_indices = @transform_5, window_bounds = array<i64: 8, 128>}, {pipeline_mode = #tpu.pipeline_mode<synchronous>, transform_indices = @transform_6, window_bounds = array<i64: 4, 128>}, {pipeline_mode = #tpu.pipeline_mode<synchronous>, transform_indices = @transform_7, window_bounds = array<i64: 1, 128>}, {pipeline_mode = #tpu.pipeline_mode<synchronous>, transform_indices = @transform_8, window_bounds = array<i64: 11, 128>}, {pipeline_mode = #tpu.pipeline_mode<synchronous>, transform_indices = @transform_9, window_bounds = array<i64: 1, 128>}, {pipeline_mode = #tpu.pipeline_mode<synchronous>, transform_indices = @transform_10, window_bounds = array<i64: 3, 5, 128>}, {pipeline_mode = #tpu.pipeline_mode<synchronous>, transform_indices = @transform_11, window_bounds = array<i64: 3, 128, 128>}, {pipeline_mode = #tpu.pipeline_mode<synchronous>, transform_indices = @transform_12, window_bounds = array<i64: 3, 1, 128>}, {pipeline_mode = #tpu.pipeline_mode<synchronous>, transform_indices = @transform_13, window_bounds = array<i64: 3, 128, 128>}, {pipeline_mode = #tpu.pipeline_mode<synchronous>, transform_indices = @transform_14, window_bounds = array<i64: 3, 1, 128>}, {pipeline_mode = #tpu.pipeline_mode<synchronous>, transform_indices = @transform_15, window_bounds = array<i64: 8, 128>}]} {
    %c0 = arith.constant 0 : index
    %c0_0 = arith.constant 0 : index
    %0 = vector.load %arg2[%c0, %c0_0] : memref<192x4xbf16, #tpu.memory_space<vmem>>, vector<192x4xbf16>
    %c0_1 = arith.constant 0 : index
    %c0_2 = arith.constant 0 : index
    %1 = vector.load %arg7[%c0_1, %c0_2] : memref<4x128xbf16, #tpu.memory_space<vmem>>, vector<4x128xbf16>
    %cst = arith.constant dense<0.000000e+00> : vector<192x128xf32>
    %2 = tpu.matmul %0, %1, %cst {dimension_numbers = #tpu.dot_dimension_numbers<[1], [0], [0], [1], [0, 0, 1, 1], [], []>} : vector<192x4xbf16>, vector<4x128xbf16>, vector<192x128xf32> -> vector<192x128xf32>
    %c0_3 = arith.constant 0 : index
    %c0_4 = arith.constant 0 : index
    %3 = vector.load %arg8[%c0_3, %c0_4] : memref<1x128xf32, #tpu.memory_space<vmem>>, vector<1x128xf32>
    %4 = vector.broadcast %3 : vector<1x128xf32> to vector<192x128xf32>
    %5 = arith.addf %2, %4 : vector<192x128xf32>
    %c0_5 = arith.constant 0 : index
    %c0_6 = arith.constant 0 : index
    %6 = vector.load %arg1[%c0_5, %c0_6] : memref<128x11xbf16, #tpu.memory_space<vmem>>, vector<128x11xbf16>
    %c0_7 = arith.constant 0 : index
    %c0_8 = arith.constant 0 : index
    %7 = vector.load %arg9[%c0_7, %c0_8] : memref<11x128xbf16, #tpu.memory_space<vmem>>, vector<11x128xbf16>
    %cst_9 = arith.constant dense<0.000000e+00> : vector<128x128xf32>
    %8 = tpu.matmul %6, %7, %cst_9 {dimension_numbers = #tpu.dot_dimension_numbers<[1], [0], [0], [1], [0, 0, 1, 1], [], []>} : vector<128x11xbf16>, vector<11x128xbf16>, vector<128x128xf32> -> vector<128x128xf32>
    %c0_10 = arith.constant 0 : index
    %c0_11 = arith.constant 0 : index
    %9 = vector.load %arg10[%c0_10, %c0_11] : memref<1x128xf32, #tpu.memory_space<vmem>>, vector<1x128xf32>
    %10 = vector.broadcast %9 : vector<1x128xf32> to vector<128x128xf32>
    %11 = arith.addf %8, %10 : vector<128x128xf32>
    %c0_12 = arith.constant 0 : index
    %c0_13 = arith.constant 0 : index
    %12 = vector.load %arg3[%c0_12, %c0_13] : memref<192x128xbf16, #tpu.memory_space<vmem>>, vector<192x128xbf16>
    %c0_14 = arith.constant 0 : index
    %c0_15 = arith.constant 0 : index
    %13 = vector.load %arg4[%c0_14, %c0_15] : memref<128x192xbf16, #tpu.memory_space<vmem>>, vector<128x192xbf16>
    %14 = arith.truncf %11 : vector<128x128xf32> to vector<128x128xbf16>
    %c0_16 = arith.constant 0 : index
    %c0_17 = arith.constant 0 : index
    %c0_18 = arith.constant 0 : index
    %15 = vector.load %arg11[%c0_16, %c0_17, %c0_18] : memref<3x5x128xf32, #tpu.memory_space<vmem>>, vector<1x5x128xf32>
    %16 = vector.shape_cast %15 : vector<1x5x128xf32> to vector<5x128xf32>
    %17 = vector.extract_strided_slice %16 {offsets = [0, 0], sizes = [1, 128], strides = [1, 1]} : vector<5x128xf32> to vector<1x128xf32>
    %18 = arith.extf %14 : vector<128x128xbf16> to vector<128x128xf32>
    %19 = vector.broadcast %17 : vector<1x128xf32> to vector<128x128xf32>
    %20 = arith.mulf %19, %18 : vector<128x128xf32>
    %cst_19 = arith.constant dense<0.000000e+00> : vector<192x128xf32>
    %21 = tpu.matmul %12, %14, %cst_19 {dimension_numbers = #tpu.dot_dimension_numbers<[1], [0], [0], [1], [0, 0, 1, 1], [], []>} : vector<192x128xbf16>, vector<128x128xbf16>, vector<192x128xf32> -> vector<192x128xf32>
    %22 = arith.addf %21, %5 : vector<192x128xf32>
    %cst_20 = arith.constant 0.000000e+00 : f32
    %23 = vector.broadcast %cst_20 : f32 to vector<192x128xf32>
    %24 = arith.maximumf %22, %23 : vector<192x128xf32>
    %25 = vector.extract_strided_slice %16 {offsets = [1, 0], sizes = [1, 128], strides = [1, 1]} : vector<5x128xf32> to vector<1x128xf32>
    %26 = arith.truncf %24 : vector<192x128xf32> to vector<192x128xbf16>
    %cst_21 = arith.constant dense<0.000000e+00> : vector<128x128xf32>
    %27 = tpu.matmul %13, %26, %cst_21 {dimension_numbers = #tpu.dot_dimension_numbers<[1], [0], [0], [1], [0, 0, 1, 1], [], []>} : vector<128x192xbf16>, vector<192x128xbf16>, vector<128x128xf32> -> vector<128x128xf32>
    %28 = vector.broadcast %25 : vector<1x128xf32> to vector<128x128xf32>
    %29 = arith.mulf %28, %27 : vector<128x128xf32>
    %30 = arith.addf %20, %29 : vector<128x128xf32>
    %31 = arith.truncf %30 : vector<128x128xf32> to vector<128x128xbf16>
    %c0_22 = arith.constant 0 : index
    %c0_23 = arith.constant 0 : index
    %c0_24 = arith.constant 0 : index
    %32 = vector.load %arg12[%c0_22, %c0_23, %c0_24] : memref<3x128x128xbf16, #tpu.memory_space<vmem>>, vector<1x128x128xbf16>
    %33 = vector.shape_cast %32 : vector<1x128x128xbf16> to vector<128x128xbf16>
    %cst_25 = arith.constant dense<0.000000e+00> : vector<128x128xf32>
    %34 = tpu.matmul %31, %33, %cst_25 {dimension_numbers = #tpu.dot_dimension_numbers<[1], [0], [0], [1], [0, 0, 1, 1], [], []>} : vector<128x128xbf16>, vector<128x128xbf16>, vector<128x128xf32> -> vector<128x128xf32>
    %c0_26 = arith.constant 0 : index
    %c0_27 = arith.constant 0 : index
    %c0_28 = arith.constant 0 : index
    %35 = vector.load %arg13[%c0_26, %c0_27, %c0_28] : memref<3x1x128xf32, #tpu.memory_space<vmem>>, vector<1x1x128xf32>
    %36 = vector.shape_cast %35 : vector<1x1x128xf32> to vector<1x128xf32>
    %37 = vector.broadcast %36 : vector<1x128xf32> to vector<128x128xf32>
    %38 = arith.addf %34, %37 : vector<128x128xf32>
    %cst_29 = arith.constant 0.000000e+00 : f32
    %39 = vector.broadcast %cst_29 : f32 to vector<128x128xf32>
    %40 = arith.maximumf %38, %39 : vector<128x128xf32>
    %41 = arith.truncf %40 : vector<128x128xf32> to vector<128x128xbf16>
    %c0_30 = arith.constant 0 : index
    %c0_31 = arith.constant 0 : index
    %c0_32 = arith.constant 0 : index
    %42 = vector.load %arg14[%c0_30, %c0_31, %c0_32] : memref<3x128x128xbf16, #tpu.memory_space<vmem>>, vector<1x128x128xbf16>
    %43 = vector.shape_cast %42 : vector<1x128x128xbf16> to vector<128x128xbf16>
    %cst_33 = arith.constant dense<0.000000e+00> : vector<128x128xf32>
    %44 = tpu.matmul %41, %43, %cst_33 {dimension_numbers = #tpu.dot_dimension_numbers<[1], [0], [0], [1], [0, 0, 1, 1], [], []>} : vector<128x128xbf16>, vector<128x128xbf16>, vector<128x128xf32> -> vector<128x128xf32>
    %c0_34 = arith.constant 0 : index
    %c0_35 = arith.constant 0 : index
    %c0_36 = arith.constant 0 : index
    %45 = vector.load %arg15[%c0_34, %c0_35, %c0_36] : memref<3x1x128xf32, #tpu.memory_space<vmem>>, vector<1x1x128xf32>
    %46 = vector.shape_cast %45 : vector<1x1x128xf32> to vector<1x128xf32>
    %47 = vector.broadcast %46 : vector<1x128xf32> to vector<128x128xf32>
    %48 = arith.addf %44, %47 : vector<128x128xf32>
    %cst_37 = arith.constant 0.000000e+00 : f32
    %49 = vector.broadcast %cst_37 : f32 to vector<128x128xf32>
    %50 = arith.maximumf %48, %49 : vector<128x128xf32>
    %51 = arith.truncf %50 : vector<128x128xf32> to vector<128x128xbf16>
    %c1 = arith.constant 1 : index
    %c0_38 = arith.constant 0 : index
    %c0_39 = arith.constant 0 : index
    %52 = vector.load %arg11[%c1, %c0_38, %c0_39] : memref<3x5x128xf32, #tpu.memory_space<vmem>>, vector<1x5x128xf32>
    %53 = vector.shape_cast %52 : vector<1x5x128xf32> to vector<5x128xf32>
    %54 = vector.extract_strided_slice %53 {offsets = [0, 0], sizes = [1, 128], strides = [1, 1]} : vector<5x128xf32> to vector<1x128xf32>
    %55 = arith.extf %51 : vector<128x128xbf16> to vector<128x128xf32>
    %56 = vector.broadcast %54 : vector<1x128xf32> to vector<128x128xf32>
    %57 = arith.mulf %56, %55 : vector<128x128xf32>
    %cst_40 = arith.constant dense<0.000000e+00> : vector<192x128xf32>
    %58 = tpu.matmul %12, %51, %cst_40 {dimension_numbers = #tpu.dot_dimension_numbers<[1], [0], [0], [1], [0, 0, 1, 1], [], []>} : vector<192x128xbf16>, vector<128x128xbf16>, vector<192x128xf32> -> vector<192x128xf32>
    %59 = arith.addf %58, %5 : vector<192x128xf32>
    %cst_41 = arith.constant 0.000000e+00 : f32
    %60 = vector.broadcast %cst_41 : f32 to vector<192x128xf32>
    %61 = arith.maximumf %59, %60 : vector<192x128xf32>
    %62 = vector.extract_strided_slice %53 {offsets = [1, 0], sizes = [1, 128], strides = [1, 1]} : vector<5x128xf32> to vector<1x128xf32>
    %63 = arith.truncf %61 : vector<192x128xf32> to vector<192x128xbf16>
    %cst_42 = arith.constant dense<0.000000e+00> : vector<128x128xf32>
    %64 = tpu.matmul %13, %63, %cst_42 {dimension_numbers = #tpu.dot_dimension_numbers<[1], [0], [0], [1], [0, 0, 1, 1], [], []>} : vector<128x192xbf16>, vector<192x128xbf16>, vector<128x128xf32> -> vector<128x128xf32>
    %65 = vector.broadcast %62 : vector<1x128xf32> to vector<128x128xf32>
    %66 = arith.mulf %65, %64 : vector<128x128xf32>
    %67 = arith.addf %57, %66 : vector<128x128xf32>
    %68 = vector.extract_strided_slice %53 {offsets = [2, 0], sizes = [1, 128], strides = [1, 1]} : vector<5x128xf32> to vector<1x128xf32>
    %c0_43 = arith.constant 0 : index
    %c0_44 = arith.constant 0 : index
    %c0_45 = arith.constant 0 : index
    %69 = vector.load %arg5[%c0_43, %c0_44, %c0_45] : memref<2x128x128xbf16, #tpu.memory_space<vmem>>, vector<1x128x128xbf16>
    %70 = vector.shape_cast %69 : vector<1x128x128xbf16> to vector<128x128xbf16>
    %cst_46 = arith.constant 0.000000e+00 : bf16
    %71 = vector.broadcast %cst_46 : bf16 to vector<128x128xbf16>
    %72 = arith.maximumf %14, %71 : vector<128x128xbf16>
    %cst_47 = arith.constant dense<0.000000e+00> : vector<128x128xf32>
    %73 = tpu.matmul %70, %72, %cst_47 {dimension_numbers = #tpu.dot_dimension_numbers<[1], [0], [0], [1], [0, 0, 1, 1], [], []>} : vector<128x128xbf16>, vector<128x128xbf16>, vector<128x128xf32> -> vector<128x128xf32>
    %74 = vector.broadcast %68 : vector<1x128xf32> to vector<128x128xf32>
    %75 = arith.mulf %74, %73 : vector<128x128xf32>
    %76 = arith.addf %67, %75 : vector<128x128xf32>
    %77 = arith.truncf %76 : vector<128x128xf32> to vector<128x128xbf16>
    %c1_48 = arith.constant 1 : index
    %c0_49 = arith.constant 0 : index
    %c0_50 = arith.constant 0 : index
    %78 = vector.load %arg12[%c1_48, %c0_49, %c0_50] : memref<3x128x128xbf16, #tpu.memory_space<vmem>>, vector<1x128x128xbf16>
    %79 = vector.shape_cast %78 : vector<1x128x128xbf16> to vector<128x128xbf16>
    %cst_51 = arith.constant dense<0.000000e+00> : vector<128x128xf32>
    %80 = tpu.matmul %77, %79, %cst_51 {dimension_numbers = #tpu.dot_dimension_numbers<[1], [0], [0], [1], [0, 0, 1, 1], [], []>} : vector<128x128xbf16>, vector<128x128xbf16>, vector<128x128xf32> -> vector<128x128xf32>
    %c1_52 = arith.constant 1 : index
    %c0_53 = arith.constant 0 : index
    %c0_54 = arith.constant 0 : index
    %81 = vector.load %arg13[%c1_52, %c0_53, %c0_54] : memref<3x1x128xf32, #tpu.memory_space<vmem>>, vector<1x1x128xf32>
    %82 = vector.shape_cast %81 : vector<1x1x128xf32> to vector<1x128xf32>
    %83 = vector.broadcast %82 : vector<1x128xf32> to vector<128x128xf32>
    %84 = arith.addf %80, %83 : vector<128x128xf32>
    %cst_55 = arith.constant 0.000000e+00 : f32
    %85 = vector.broadcast %cst_55 : f32 to vector<128x128xf32>
    %86 = arith.maximumf %84, %85 : vector<128x128xf32>
    %87 = arith.truncf %86 : vector<128x128xf32> to vector<128x128xbf16>
    %c1_56 = arith.constant 1 : index
    %c0_57 = arith.constant 0 : index
    %c0_58 = arith.constant 0 : index
    %88 = vector.load %arg14[%c1_56, %c0_57, %c0_58] : memref<3x128x128xbf16, #tpu.memory_space<vmem>>, vector<1x128x128xbf16>
    %89 = vector.shape_cast %88 : vector<1x128x128xbf16> to vector<128x128xbf16>
    %cst_59 = arith.constant dense<0.000000e+00> : vector<128x128xf32>
    %90 = tpu.matmul %87, %89, %cst_59 {dimension_numbers = #tpu.dot_dimension_numbers<[1], [0], [0], [1], [0, 0, 1, 1], [], []>} : vector<128x128xbf16>, vector<128x128xbf16>, vector<128x128xf32> -> vector<128x128xf32>
    %c1_60 = arith.constant 1 : index
    %c0_61 = arith.constant 0 : index
    %c0_62 = arith.constant 0 : index
    %91 = vector.load %arg15[%c1_60, %c0_61, %c0_62] : memref<3x1x128xf32, #tpu.memory_space<vmem>>, vector<1x1x128xf32>
    %92 = vector.shape_cast %91 : vector<1x1x128xf32> to vector<1x128xf32>
    %93 = vector.broadcast %92 : vector<1x128xf32> to vector<128x128xf32>
    %94 = arith.addf %90, %93 : vector<128x128xf32>
    %cst_63 = arith.constant 0.000000e+00 : f32
    %95 = vector.broadcast %cst_63 : f32 to vector<128x128xf32>
    %96 = arith.maximumf %94, %95 : vector<128x128xf32>
    %97 = arith.truncf %96 : vector<128x128xf32> to vector<128x128xbf16>
    %c2 = arith.constant 2 : index
    %c0_64 = arith.constant 0 : index
    %c0_65 = arith.constant 0 : index
    %98 = vector.load %arg11[%c2, %c0_64, %c0_65] : memref<3x5x128xf32, #tpu.memory_space<vmem>>, vector<1x5x128xf32>
    %99 = vector.shape_cast %98 : vector<1x5x128xf32> to vector<5x128xf32>
    %100 = vector.extract_strided_slice %99 {offsets = [0, 0], sizes = [1, 128], strides = [1, 1]} : vector<5x128xf32> to vector<1x128xf32>
    %101 = arith.extf %97 : vector<128x128xbf16> to vector<128x128xf32>
    %102 = vector.broadcast %100 : vector<1x128xf32> to vector<128x128xf32>
    %103 = arith.mulf %102, %101 : vector<128x128xf32>
    %cst_66 = arith.constant dense<0.000000e+00> : vector<192x128xf32>
    %104 = tpu.matmul %12, %97, %cst_66 {dimension_numbers = #tpu.dot_dimension_numbers<[1], [0], [0], [1], [0, 0, 1, 1], [], []>} : vector<192x128xbf16>, vector<128x128xbf16>, vector<192x128xf32> -> vector<192x128xf32>
    %105 = arith.addf %104, %5 : vector<192x128xf32>
    %cst_67 = arith.constant 0.000000e+00 : f32
    %106 = vector.broadcast %cst_67 : f32 to vector<192x128xf32>
    %107 = arith.maximumf %105, %106 : vector<192x128xf32>
    %108 = vector.extract_strided_slice %99 {offsets = [1, 0], sizes = [1, 128], strides = [1, 1]} : vector<5x128xf32> to vector<1x128xf32>
    %109 = arith.truncf %107 : vector<192x128xf32> to vector<192x128xbf16>
    %cst_68 = arith.constant dense<0.000000e+00> : vector<128x128xf32>
    %110 = tpu.matmul %13, %109, %cst_68 {dimension_numbers = #tpu.dot_dimension_numbers<[1], [0], [0], [1], [0, 0, 1, 1], [], []>} : vector<128x192xbf16>, vector<192x128xbf16>, vector<128x128xf32> -> vector<128x128xf32>
    %111 = vector.broadcast %108 : vector<1x128xf32> to vector<128x128xf32>
    %112 = arith.mulf %111, %110 : vector<128x128xf32>
    %113 = arith.addf %103, %112 : vector<128x128xf32>
    %114 = vector.extract_strided_slice %99 {offsets = [2, 0], sizes = [1, 128], strides = [1, 1]} : vector<5x128xf32> to vector<1x128xf32>
    %c0_69 = arith.constant 0 : index
    %c0_70 = arith.constant 0 : index
    %c0_71 = arith.constant 0 : index
    %115 = vector.load %arg5[%c0_69, %c0_70, %c0_71] : memref<2x128x128xbf16, #tpu.memory_space<vmem>>, vector<1x128x128xbf16>
    %116 = vector.shape_cast %115 : vector<1x128x128xbf16> to vector<128x128xbf16>
    %cst_72 = arith.constant 0.000000e+00 : bf16
    %117 = vector.broadcast %cst_72 : bf16 to vector<128x128xbf16>
    %118 = arith.maximumf %51, %117 : vector<128x128xbf16>
    %cst_73 = arith.constant dense<0.000000e+00> : vector<128x128xf32>
    %119 = tpu.matmul %116, %118, %cst_73 {dimension_numbers = #tpu.dot_dimension_numbers<[1], [0], [0], [1], [0, 0, 1, 1], [], []>} : vector<128x128xbf16>, vector<128x128xbf16>, vector<128x128xf32> -> vector<128x128xf32>
    %120 = vector.broadcast %114 : vector<1x128xf32> to vector<128x128xf32>
    %121 = arith.mulf %120, %119 : vector<128x128xf32>
    %122 = arith.addf %113, %121 : vector<128x128xf32>
    %123 = vector.extract_strided_slice %99 {offsets = [3, 0], sizes = [1, 128], strides = [1, 1]} : vector<5x128xf32> to vector<1x128xf32>
    %c1_74 = arith.constant 1 : index
    %c0_75 = arith.constant 0 : index
    %c0_76 = arith.constant 0 : index
    %124 = vector.load %arg5[%c1_74, %c0_75, %c0_76] : memref<2x128x128xbf16, #tpu.memory_space<vmem>>, vector<1x128x128xbf16>
    %125 = vector.shape_cast %124 : vector<1x128x128xbf16> to vector<128x128xbf16>
    %cst_77 = arith.constant 0.000000e+00 : bf16
    %126 = vector.broadcast %cst_77 : bf16 to vector<128x128xbf16>
    %127 = arith.maximumf %14, %126 : vector<128x128xbf16>
    %cst_78 = arith.constant dense<0.000000e+00> : vector<128x128xf32>
    %128 = tpu.matmul %125, %127, %cst_78 {dimension_numbers = #tpu.dot_dimension_numbers<[1], [0], [0], [1], [0, 0, 1, 1], [], []>} : vector<128x128xbf16>, vector<128x128xbf16>, vector<128x128xf32> -> vector<128x128xf32>
    %129 = vector.broadcast %123 : vector<1x128xf32> to vector<128x128xf32>
    %130 = arith.mulf %129, %128 : vector<128x128xf32>
    %131 = arith.addf %122, %130 : vector<128x128xf32>
    %132 = arith.truncf %131 : vector<128x128xf32> to vector<128x128xbf16>
    %c2_79 = arith.constant 2 : index
    %c0_80 = arith.constant 0 : index
    %c0_81 = arith.constant 0 : index
    %133 = vector.load %arg12[%c2_79, %c0_80, %c0_81] : memref<3x128x128xbf16, #tpu.memory_space<vmem>>, vector<1x128x128xbf16>
    %134 = vector.shape_cast %133 : vector<1x128x128xbf16> to vector<128x128xbf16>
    %cst_82 = arith.constant dense<0.000000e+00> : vector<128x128xf32>
    %135 = tpu.matmul %132, %134, %cst_82 {dimension_numbers = #tpu.dot_dimension_numbers<[1], [0], [0], [1], [0, 0, 1, 1], [], []>} : vector<128x128xbf16>, vector<128x128xbf16>, vector<128x128xf32> -> vector<128x128xf32>
    %c2_83 = arith.constant 2 : index
    %c0_84 = arith.constant 0 : index
    %c0_85 = arith.constant 0 : index
    %136 = vector.load %arg13[%c2_83, %c0_84, %c0_85] : memref<3x1x128xf32, #tpu.memory_space<vmem>>, vector<1x1x128xf32>
    %137 = vector.shape_cast %136 : vector<1x1x128xf32> to vector<1x128xf32>
    %138 = vector.broadcast %137 : vector<1x128xf32> to vector<128x128xf32>
    %139 = arith.addf %135, %138 : vector<128x128xf32>
    %cst_86 = arith.constant 0.000000e+00 : f32
    %140 = vector.broadcast %cst_86 : f32 to vector<128x128xf32>
    %141 = arith.maximumf %139, %140 : vector<128x128xf32>
    %142 = arith.truncf %141 : vector<128x128xf32> to vector<128x128xbf16>
    %c2_87 = arith.constant 2 : index
    %c0_88 = arith.constant 0 : index
    %c0_89 = arith.constant 0 : index
    %143 = vector.load %arg14[%c2_87, %c0_88, %c0_89] : memref<3x128x128xbf16, #tpu.memory_space<vmem>>, vector<1x128x128xbf16>
    %144 = vector.shape_cast %143 : vector<1x128x128xbf16> to vector<128x128xbf16>
    %cst_90 = arith.constant dense<0.000000e+00> : vector<128x128xf32>
    %145 = tpu.matmul %142, %144, %cst_90 {dimension_numbers = #tpu.dot_dimension_numbers<[1], [0], [0], [1], [0, 0, 1, 1], [], []>} : vector<128x128xbf16>, vector<128x128xbf16>, vector<128x128xf32> -> vector<128x128xf32>
    %c2_91 = arith.constant 2 : index
    %c0_92 = arith.constant 0 : index
    %c0_93 = arith.constant 0 : index
    %146 = vector.load %arg15[%c2_91, %c0_92, %c0_93] : memref<3x1x128xf32, #tpu.memory_space<vmem>>, vector<1x1x128xf32>
    %147 = vector.shape_cast %146 : vector<1x1x128xf32> to vector<1x128xf32>
    %148 = vector.broadcast %147 : vector<1x128xf32> to vector<128x128xf32>
    %149 = arith.addf %145, %148 : vector<128x128xf32>
    %cst_94 = arith.constant 0.000000e+00 : f32
    %150 = vector.broadcast %cst_94 : f32 to vector<128x128xf32>
    %151 = arith.maximumf %149, %150 : vector<128x128xf32>
    %152 = arith.truncf %151 : vector<128x128xf32> to vector<128x128xbf16>
    %c0_95 = arith.constant 0 : index
    %c0_96 = arith.constant 0 : index
    %153 = vector.load %arg6[%c0_95, %c0_96] : memref<8x128xbf16, #tpu.memory_space<vmem>>, vector<8x128xbf16>
    %cst_97 = arith.constant dense<0.000000e+00> : vector<8x128xf32>
    %154 = tpu.matmul %153, %152, %cst_97 {dimension_numbers = #tpu.dot_dimension_numbers<[1], [0], [0], [1], [0, 0, 1, 1], [], []>} : vector<8x128xbf16>, vector<128x128xbf16>, vector<8x128xf32> -> vector<8x128xf32>
    %c0_98 = arith.constant 0 : index
    %c0_99 = arith.constant 0 : index
    %155 = vector.load %arg16[%c0_98, %c0_99] : memref<8x128xf32, #tpu.memory_space<vmem>>, vector<8x128xf32>
    tpu.vector_store %arg16[%c0_98, %c0_99], %154 {strides = array<i32>} : memref<8x128xf32, #tpu.memory_space<vmem>>, vector<8x128xf32>,
    return
  }
  func.func @transform_0(%arg0: i32) -> (i32, i32) {
    %c0_i32 = arith.constant 0 : i32
    %c0_i32_0 = arith.constant 0 : i32
    %c0_i32_1 = arith.constant 0 : i32
    return %c0_i32, %c0_i32_0 : i32, i32
  }
  func.func @transform_1(%arg0: i32) -> (i32, i32) {
    %c0_i32 = arith.constant 0 : i32
    %c0_i32_0 = arith.constant 0 : i32
    %c0_i32_1 = arith.constant 0 : i32
    return %c0_i32, %c0_i32_0 : i32, i32
  }
  func.func @transform_2(%arg0: i32) -> (i32, i32) {
    %c0_i32 = arith.constant 0 : i32
    %c0_i32_0 = arith.constant 0 : i32
    %c0_i32_1 = arith.constant 0 : i32
    return %c0_i32, %c0_i32_0 : i32, i32
  }
  func.func @transform_3(%arg0: i32) -> (i32, i32) {
    %c0_i32 = arith.constant 0 : i32
    %c0_i32_0 = arith.constant 0 : i32
    %c0_i32_1 = arith.constant 0 : i32
    return %c0_i32, %c0_i32_0 : i32, i32
  }
  func.func @transform_4(%arg0: i32) -> (i32, i32, i32) {
    %c0_i32 = arith.constant 0 : i32
    %c0_i32_0 = arith.constant 0 : i32
    %c0_i32_1 = arith.constant 0 : i32
    %c0_i32_2 = arith.constant 0 : i32
    return %c0_i32, %c0_i32_0, %c0_i32_1 : i32, i32, i32
  }
  func.func @transform_5(%arg0: i32) -> (i32, i32) {
    %c0_i32 = arith.constant 0 : i32
    %c0_i32_0 = arith.constant 0 : i32
    %c0_i32_1 = arith.constant 0 : i32
    return %c0_i32, %c0_i32_0 : i32, i32
  }
  func.func @transform_6(%arg0: i32) -> (i32, i32) {
    %c0_i32 = arith.constant 0 : i32
    %c0_i32_0 = arith.constant 0 : i32
    %c0_i32_1 = arith.constant 0 : i32
    return %c0_i32, %c0_i32_0 : i32, i32
  }
  func.func @transform_7(%arg0: i32) -> (i32, i32) {
    %c0_i32 = arith.constant 0 : i32
    %c0_i32_0 = arith.constant 0 : i32
    %c0_i32_1 = arith.constant 0 : i32
    return %c0_i32, %c0_i32_0 : i32, i32
  }
  func.func @transform_8(%arg0: i32) -> (i32, i32) {
    %c0_i32 = arith.constant 0 : i32
    %c0_i32_0 = arith.constant 0 : i32
    %c0_i32_1 = arith.constant 0 : i32
    return %c0_i32, %c0_i32_0 : i32, i32
  }
  func.func @transform_9(%arg0: i32) -> (i32, i32) {
    %c0_i32 = arith.constant 0 : i32
    %c0_i32_0 = arith.constant 0 : i32
    %c0_i32_1 = arith.constant 0 : i32
    return %c0_i32, %c0_i32_0 : i32, i32
  }
  func.func @transform_10(%arg0: i32) -> (i32, i32, i32) {
    %c0_i32 = arith.constant 0 : i32
    %c0_i32_0 = arith.constant 0 : i32
    %c0_i32_1 = arith.constant 0 : i32
    %c0_i32_2 = arith.constant 0 : i32
    return %c0_i32, %c0_i32_0, %c0_i32_1 : i32, i32, i32
  }
  func.func @transform_11(%arg0: i32) -> (i32, i32, i32) {
    %c0_i32 = arith.constant 0 : i32
    %c0_i32_0 = arith.constant 0 : i32
    %c0_i32_1 = arith.constant 0 : i32
    %c0_i32_2 = arith.constant 0 : i32
    return %c0_i32, %c0_i32_0, %c0_i32_1 : i32, i32, i32
  }
  func.func @transform_12(%arg0: i32) -> (i32, i32, i32) {
    %c0_i32 = arith.constant 0 : i32
    %c0_i32_0 = arith.constant 0 : i32
    %c0_i32_1 = arith.constant 0 : i32
    %c0_i32_2 = arith.constant 0 : i32
    return %c0_i32, %c0_i32_0, %c0_i32_1 : i32, i32, i32
  }
  func.func @transform_13(%arg0: i32) -> (i32, i32, i32) {
    %c0_i32 = arith.constant 0 : i32
    %c0_i32_0 = arith.constant 0 : i32
    %c0_i32_1 = arith.constant 0 : i32
    %c0_i32_2 = arith.constant 0 : i32
    return %c0_i32, %c0_i32_0, %c0_i32_1 : i32, i32, i32
  }
  func.func @transform_14(%arg0: i32) -> (i32, i32, i32) {
    %c0_i32 = arith.constant 0 : i32
    %c0_i32_0 = arith.constant 0 : i32
    %c0_i32_1 = arith.constant 0 : i32
    %c0_i32_2 = arith.constant 0 : i32
    return %c0_i32, %c0_i32_0, %c0_i32_1 : i32, i32, i32
  }
  func.func @transform_15(%arg0: i32) -> (i32, i32) {
    %c0_i32 = arith.constant 0 : i32
    %c0_i32_0 = arith.constant 0 : i32
    %c0_i32_1 = arith.constant 0 : i32
    return %c0_i32, %c0_i32_0 : i32, i32
  }
}

</mosaic_0001>

<bundles_post_ra>
// kernel: tpu_custom_call.1
= control target key start
LH: loop header
LB: loop body
LE: loop exit
PB: predicated region body
PF: predicated region fallthrough
CT: control target
= control target key end

     0   :  { %20 = vsyncpa [#allocation3], 0  ;;  %s6102_s0 = inlined_call_operand.vmem [shape: bf16[128,11], index: 0, kind: input, shape index: {}]   ;;  %s6103_s1 = inlined_call_operand.vmem [shape: bf16[192,4], index: 1, kind: input, shape index: {}]   ;;  %s6104_s2 = inlined_call_operand.hbm [shape: bf16[192,128], index: 2, kind: input, shape index: {}]   ;;  %s6105_s3 = inlined_call_operand.vmem [shape: bf16[128,192], index: 3, kind: input, shape index: {}]   ;;  %s6106_s4 = inlined_call_operand.hbm [shape: bf16[2,128,128], index: 4, kind: input, shape index: {}]   ;;  %s6107_s5 = inlined_call_operand.vmem [shape: bf16[8,128], index: 5, kind: input, shape index: {}]   ;;  %s6108_s6 = inlined_call_operand.vmem [shape: bf16[4,128], index: 6, kind: input, shape index: {}]   ;;  %s6109_s7 = inlined_call_operand.vmem [shape: f32[1,128], index: 7, kind: input, shape index: {}]   ;;  %s6110_s8 = inlined_call_operand.vmem [shape: bf16[11,128], index: 8, kind: input, shape index: {}]   ;;  %s6111_s9 = inlined_call_operand.vmem [shape: f32[1,128], index: 9, kind: input, shape index: {}]   ;;  %s6112_s10 = inlined_call_operand.vmem [shape: f32[3,5,128], index: 10, kind: input, shape index: {}]   ;;  %s6113_s11 = inlined_call_operand.vmem [shape: bf16[3,128,128], index: 11, kind: input, shape index: {}]   ;;  %s6114_s12 = inlined_call_operand.vmem [shape: f32[3,1,128], index: 12, kind: input, shape index: {}]   ;;  %s6115_s13 = inlined_call_operand.vmem [shape: bf16[3,128,128], index: 13, kind: input, shape index: {}]   ;;  %s6116_s14 = inlined_call_operand.vmem [shape: f32[3,1,128], index: 14, kind: input, shape index: {}]   ;;  %s6117_s15 = inlined_call_operand.hbm [shape: f32[8,128], index: 15, kind: output, shape index: {}]  }
   0x1   :  { %21 = vsyncpa [#allocation6], 0 }
   0x2   :  { %22 = vsyncpa [#allocation4], 0  ;;  %s4743_s18 = smov [#allocation2]   ;;  %s4671_s22 = scalar_lea.hbm %s6104_s2, 1536 }
   0x3   :  { %s32_s19 = sshll.u32 %s4743_s18, 4  ;;  %p4672_p0 = scmp.ne.s32.totalorder %s6104_s2, %s4671_s22  ;;  %s33_s19 = int_to_ptr.vmem [resolvable:$true] %s32_s19 }
   0x4   :  { %p4675_p1 = scmp.lt.u32.totalorder %s4671_s22, %s6104_s2 }
   0x6   :  { %p4677_p2 = pnand %p4675_p1, %p4672_p0 }
   0x8   :  { %4680 = shalt.err (!%p4677_p2)
}
   0x9   :  { %s4681_s27 = scalar_lea.vmem %s33_s19, 1536  ;;  %p4686_p4 = scmp.lt.s32.totalorder %s33_s19, %s33_s19 }
   0xa   :  { %p4682_p3 = scmp.ne.s32.totalorder %s33_s19, %s4681_s27  ;;  %p4687_p5 = scmp.lt.s32.totalorder %s4681_s27, %s4681_s27 }
   0xc   :  { %p4688_p6 = por %p4687_p5, %p4686_p4 }
   0xe   :  { %p4689_p7 = pnand %p4688_p6, %p4682_p3 }
  0x10   :  { %4692 = shalt.err (!%p4689_p7)
}
  0x11   :  { %s4744_s28 = smov 64   ;;  %s4745_s29 = smov 4  }
  0x12   :  { %38 = dma.hbm_to_vmem [thread:$0]  %s6104_s2, 1536, %s33_s19, [#allocation3], %s4744_s28, %s4744_s28, %s4745_s29  }
  0x13   :  { %s4746_s17 = smov [#allocation5]   ;;  %s4693_s22 = scalar_lea.hbm %s6106_s4, 2048 }
  0x14   :  { %s46_s18 = sshll.u32 %s4746_s17, 4  ;;  %p4694_p8 = scmp.ne.s32.totalorder %s6106_s4, %s4693_s22  ;;  %s47_s18 = int_to_ptr.vmem [resolvable:$true] %s46_s18 }
  0x15   :  { %p4697_p9 = scmp.lt.u32.totalorder %s4693_s22, %s6106_s4 }
  0x17   :  { %p4699_p10 = pnand %p4697_p9, %p4694_p8 }
  0x19   :  { %4702 = shalt.err (!%p4699_p10)
}
  0x1a   :  { %s4703_s27 = scalar_lea.vmem %s47_s18, 2048  ;;  %p4708_p12 = scmp.lt.s32.totalorder %s47_s18, %s47_s18 }
  0x1b   :  { %p4704_p11 = scmp.ne.s32.totalorder %s47_s18, %s4703_s27  ;;  %p4709_p13 = scmp.lt.s32.totalorder %s4703_s27, %s4703_s27 }
  0x1d   :  { %p4710_p0 = por %p4709_p13, %p4708_p12 }
  0x1f   :  { %p4711_p1 = pnand %p4710_p0, %p4704_p11 }
  0x21   :  { %4714 = shalt.err (!%p4711_p1)
}
  0x22   :  { %52 = dma.hbm_to_vmem [thread:$0]  %s6106_s4, 2048, %s47_s18, [#allocation6], %s4744_s28, %s4744_s28, %s4745_s29  }
  0x23   :  { %4737 = dma.done.wait [#allocation3], 1536  }
  0x24   :  { %4738 = vsyncadd [#allocation3], 4294965760 }
  0x25   :  { %4739 = dma.done.wait [#allocation6], 2048  }
  0x26   :  { %4740 = vsyncadd [#allocation6], 4294965248  ;;  %vm437_vm0 = vcmask 1044480   ;;  %vm438_vm1 = vcmask 1045504   ;;  %v4747_v0 = vmov 65535   ;;  %vm412_vm2 = vcmask 89088  }
  0x27   :  { %v439_v1 = vsel %vm437_vm0, 4294967295, %v4747_v0  ;;  %v4503_v3 = vld [vmem:[%s6110_s8] sm:$0x3f]   ;;  %v4505_v6 = vld [vmem:[%s6102_s0 + $0x8] sm:$0xff]   ;;  %v4506_v7 = vld [vmem:[%s6102_s0 + $0x10] sm:$0xff]   ;;  %vm209_vm3 = vcmask 1041408  }
  0x28   :  { %v440_v2 = vsel %vm438_vm1, %v439_v1, 0  ;;  %v4504_v4 = vld [vmem:[%s6102_s0] sm:$0xff]   ;;  %v4507_v8 = vld [vmem:[%s6102_s0 + $0x18] sm:$0xff]   ;;  %v4509_v10 = vld [vmem:[%s6102_s0 + $0x28] sm:$0xff]   ;;  %vm172_vm4 = vcmask 31744   ;;  %v6118_v17 = vmov 0  }
  0x29   :  { %v442_v5 = vand.u32 %v4503_v3, %v440_v2  ;;  %4049 = vmatprep.mubr.msk.bf16.mxu1 %vm412_vm2, %v4504_v4  ;;  %v4508_v9 = vld [vmem:[%s6102_s0 + $0x20] sm:$0xff]   ;;  %v4510_v11 = vld [vmem:[%s6102_s0 + $0x30] sm:$0xff]   ;;  %v4511_v12 = vld [vmem:[%s6102_s0 + $0x38] sm:$0xff]   ;;  %vm935_vm5 = vcmask 523264   ;;  %vm4750_vm6 = vmmov 0   ;;  %s4751_s19 = smov [#allocation7]  }
  0x2a   :  { %v104_v13 = vld [vmem:[%s6108_s6] sm:$0x3]  ;;  %v4513_v16 = vld [vmem:[%s6103_s1 + $0x8] sm:$0xff]   ;;  %v4516_v19 = vld [vmem:[%s6103_s1 + $0x10] sm:$0xff]   ;;  %s3541_s30 = sshll.u32 %s4751_s19, 4  ;;  %s3542_s30 = int_to_ptr.vmem [resolvable:$true] %s3541_s30 }
  0x2b   :  { %4047 = vmatprep.subr.bf16.mxu1 %v442_v5  ;;  %4493 = vmatprep.subr.msk.bf16.mxu0 %vm209_vm3, %v104_v13  ;;  %v211_v14 = vsel %vm209_vm3, %v104_v13, 0  ;;  %v4512_v15 = vld [vmem:[%s6103_s1] sm:$0xff]   ;;  %v4517_v20 = vld [vmem:[%s6103_s1 + $0x18] sm:$0xff]   ;;  %v4521_v22 = vld [vmem:[%s6103_s1 + $0x28] sm:$0xff]   ;;  %s4715_s16 = scalar_lea.vmem %s3542_s30, 128  ;;  %p4720_p3 = scmp.lt.s32.totalorder %s3542_s30, %s3542_s30 }
  0x2c   :  { %4048 = vmatpush3.bf16.msra.mxu1 %v442_v5  ;;  %4022 = vmatpush3.bf16.msra.mxu0 %v211_v14  ;;  %v4903_v18 = vld [vmem:[#allocation2] sm:$0xff]   ;;  %v4524_v23 = vld [vmem:[%s6103_s1 + $0x30] sm:$0xff]   ;;  %v4525_v24 = vld [vmem:[%s6103_s1 + $0x38] sm:$0xff]   ;;  %p4716_p2 = scmp.ne.s32.totalorder %s3542_s30, %s4715_s16  ;;  %p4721_p4 = scmp.lt.s32.totalorder %s4715_s16, %s4715_s16 }
  0x2d   :  { %960 = vmatprep.subr.bf16.mxu0 %v6118_v17  ;;  %4023 = vmatprep.mubr.msk.bf16.mxu0 %vm172_vm4, %v4512_v15  ;;  %v4520_v21 = vld [vmem:[%s6103_s1 + $0x20] sm:$0xff]   ;;  %v4529_v26 = vld [vmem:[%s6103_s1 + $0x48] sm:$0xff]   ;;  %v4532_v27 = vld [vmem:[%s6103_s1 + $0x50] sm:$0xff]  }
  0x2e   :  { %v4528_v25 = vld [vmem:[%s6103_s1 + $0x40] sm:$0xff]   ;;  %v4533_v28 = vld [vmem:[%s6103_s1 + $0x58] sm:$0xff]   ;;  %v4531_v14 = vld [vmem:[#allocation2 + $0x48] sm:$0xff]   ;;  %p4722_p5 = por %p4721_p4, %p4720_p3 }
  0x2f   :  { %4050 = vmatmul.mubr.msk.bf16.vlgmr.msra.gmra.mrb[0].mxu1 %vm412_vm2, %v4505_v6  ;;  %4024 = vmatmul.mubr.msk.bf16.vlgmr.msra.gmra.mrb[0].mxu0 %vm172_vm4, %v4513_v16  ;;  %v3576_v30 = vld [vmem:[%s6111_s9] ss:$0 sm:$0xff]  ;;  %v4515_v6 = vld [vmem:[#allocation2 + $0x8] sm:$0xff]   ;;  %v4534_v15 = vld [vmem:[#allocation2 + $0x50] sm:$0xff]  }
  0x30   :  { %4053 = vmatprep.mubr.msk.bf16.mxu1 %vm412_vm2, %v4506_v7  ;;  %4027 = vmatprep.mubr.msk.bf16.mxu0 %vm172_vm4, %v4516_v19  ;;  %v4518_v7 = vld [vmem:[#allocation2 + $0x10] sm:$0xff]   ;;  %v4530_v13 = vld [vmem:[#allocation2 + $0x40] sm:$0xff]   ;;  %v4535_v16 = vld [vmem:[#allocation2 + $0x58] sm:$0xff]   ;;  %p4723_p6 = pnand %p4722_p5, %p4716_p2 }
  0x37   :  { %4054 = vmatmul.mubr.msk.bf16.gmra.mrb[4].mxu1 %vm412_vm2, %v4507_v8  ;;  %4028 = vmatmul.mubr.msk.bf16.gmra.mrb[4].mxu0 %vm172_vm4, %v4517_v20  ;;  %v4519_v8 = vld [vmem:[#allocation2 + $0x18] sm:$0xff]  }
  0x38   :  { %4057 = vmatprep.mubr.msk.bf16.mxu1 %vm412_vm2, %v4508_v9  ;;  %4031 = vmatprep.mubr.msk.bf16.mxu0 %vm172_vm4, %v4520_v21  ;;  %v4522_v9 = vld [vmem:[#allocation2 + $0x20] sm:$0xff]  }
  0x3f   :  { %4058 = vmatmul.mubr.msk.bf16.gmra.mrb[8].mxu1 %vm412_vm2, %v4509_v10  ;;  %4032 = vmatmul.mubr.msk.bf16.gmra.mrb[8].mxu0 %vm172_vm4, %v4521_v22  ;;  %v4523_v10 = vld [vmem:[#allocation2 + $0x28] sm:$0xff]  }
  0x40   :  { %4061 = vmatprep.mubr.msk.bf16.mxu1 %vm412_vm2, %v4510_v11  ;;  %4035 = vmatprep.mubr.msk.bf16.mxu0 %vm172_vm4, %v4524_v23  ;;  %v4526_v11 = vld [vmem:[#allocation2 + $0x30] sm:$0xff]  }
  0x47   :  { %4062 = vmatmul.mubr.msk.bf16.gmra.mrb[12].mxu1 %vm412_vm2, %v4511_v12  ;;  %4036 = vmatmul.mubr.msk.bf16.gmra.mrb[12].mxu0 %vm172_vm4, %v4525_v24  ;;  %v4527_v12 = vld [vmem:[#allocation2 + $0x38] sm:$0xff]  }
  0x48   :  { %4081 = vmatprep.mubr.bf16.mxu1 %v4903_v18  ;;  %4039 = vmatprep.mubr.msk.bf16.mxu0 %vm172_vm4, %v4528_v25 }
  0x4f   :  { %4040 = vmatmul.mubr.msk.bf16.gmra.mrb[16].mxu0 %vm172_vm4, %v4529_v26 }
  0x50   :  { %4043 = vmatprep.mubr.msk.bf16.mxu0 %vm172_vm4, %v4532_v27 }
  0x57   :  { %4044 = vmatmul.mubr.msk.bf16.gmra.mrb[20].mxu0 %vm172_vm4, %v4533_v28 }
 0x102   :  { %v4051_v29 = vpop.f32.mrb[0].mxu1  ;;  %v4025_v19 = vpop.f32.mrb[0].mxu0 }
 0x103   :  { %v478_v31 = vpop.f32.mrb[1].mxu1  ;;  %v487_v33 = vadd.f32 %v4051_v29, %v3576_v30  ;;  %v247_v20 = vpop.f32.mrb[1].mxu0 }
 0x104   :  { %v4052_v32 = vpop.f32.mrb[2].mxu1  ;;  %v479_v36 = vadd.f32 %v3576_v30, %v478_v31  ;;  %v4026_v21 = vpop.f32.mrb[2].mxu0 }
 0x105   :  { %v490_v34 = vadd.f32 %v4052_v32, %v3576_v30  ;;  %v481_v35 = vpop.f32.mrb[3].mxu1  ;;  %v250_v22 = vpop.f32.mrb[3].mxu0 }
 0x106   :  { %v482_v37 = vadd.f32 %v3576_v30, %v481_v35 }
 0x107   :  { %v4949_v38 = vpack.c.bf16 %v490_v34, %v487_v33 }
 0x108   :  { %v4951_v39 = vpack.c.bf16 %v482_v37, %v479_v36 }
 0x10a   :  { %v4055_v40 = vpop.f32.mrb[4].mxu1  ;;  %4065 = vmatprep.subr.bf16.mxu1 %v4951_v39  ;;  %v4029_v23 = vpop.f32.mrb[4].mxu0 }
 0x10b   :  { %v494_v41 = vpop.f32.mrb[5].mxu1  ;;  %4066 = vmatpush3.bf16.msra.mxu1 %v4951_v39  ;;  %v503_v43 = vadd.f32 %v4055_v40, %v3576_v30  ;;  %v263_v24 = vpop.f32.mrb[5].mxu0 }
 0x10c   :  { %v4056_v42 = vpop.f32.mrb[6].mxu1  ;;  %4067 = vmatprep.subr.bf16.mxu1 %v4949_v38  ;;  %v495_v46 = vadd.f32 %v3576_v30, %v494_v41  ;;  %v4030_v25 = vpop.f32.mrb[6].mxu0 }
 0x10d   :  { %v506_v44 = vadd.f32 %v4056_v42, %v3576_v30  ;;  %v497_v45 = vpop.f32.mrb[7].mxu1  ;;  %v266_v26 = vpop.f32.mrb[7].mxu0 }
 0x10e   :  { %v498_v47 = vadd.f32 %v3576_v30, %v497_v45  ;;  %v5016_v45 = vld [vmem:[%s6105_s3 + $0x4] ss:$8 sps:$4 sm:$0xff]  }
 0x10f   :  { %v4956_v48 = vpack.c.bf16 %v506_v44, %v503_v43  ;;  %4068 = vmatpush3.bf16.msra.mxu1 %v4949_v38  ;;  %3622 = vmatprep.mubr.msk.bf16.mxu0 %vm935_vm5, %v5016_v45 }
 0x110   :  { %v4959_v49 = vpack.c.bf16 %v498_v47, %v495_v46  ;;  %v4560_v46 = vld [vmem:[%s6113_s11] sm:$0xff]   ;;  %v4561_v47 = vld [vmem:[%s6113_s11 + $0x8] sm:$0xff]  }
 0x112   :  { %v4059_v50 = vpop.f32.mrb[8].mxu1  ;;  %4069 = vmatprep.subr.bf16.mxu1 %v4959_v49  ;;  %v4981_v27 = vpop.f32.mrb[8].mxu0 }
 0x113   :  { %v510_v51 = vpop.f32.mrb[9].mxu1  ;;  %4070 = vmatpush3.bf16.msra.mxu1 %v4959_v49  ;;  %v519_v53 = vadd.f32 %v4059_v50, %v3576_v30  ;;  %v4983_v28 = vpop.f32.mrb[9].mxu0  ;;  %v4562_v50 = vld [vmem:[%s6113_s11 + $0x10] sm:$0xff]  }
 0x114   :  { %v4060_v52 = vpop.f32.mrb[10].mxu1  ;;  %4071 = vmatprep.subr.bf16.mxu1 %v4956_v48  ;;  %v511_v56 = vadd.f32 %v3576_v30, %v510_v51  ;;  %v4985_v29 = vpop.f32.mrb[10].mxu0  ;;  %v4563_v51 = vld [vmem:[%s6113_s11 + $0x18] sm:$0xff]  }
 0x115   :  { %v522_v54 = vadd.f32 %v4060_v52, %v3576_v30  ;;  %v513_v55 = vpop.f32.mrb[11].mxu1  ;;  %v5035_v52 = vld [vmem:[%s6109_s7] ss:$0 sm:$0xff] }
 0x116   :  { %v514_v57 = vadd.f32 %v3576_v30, %v513_v55 }
 0x117   :  { %v4964_v58 = vpack.c.bf16 %v522_v54, %v519_v53  ;;  %4072 = vmatpush3.bf16.msra.mxu1 %v4956_v48  ;;  %v5038_v53 = vadd.f32 %v4025_v19, %v5035_v52  ;;  %v5041_v54 = vadd.f32 %v5035_v52, %v247_v20  ;;  %v5064_v19 = vadd.f32 %v5035_v52, %v266_v26 }
 0x118   :  { %v4967_v59 = vpack.c.bf16 %v514_v57, %v511_v56  ;;  %v5044_v56 = vadd.f32 %v4026_v21, %v5035_v52 }
 0x119   :  { %6150 = vst [vmem:[#allocation11_spill] sm:$0xff] %v5038_v53 }
 0x11a   :  { %v4063_v60 = vpop.f32.mrb[12].mxu1  ;;  %4073 = vmatprep.subr.bf16.mxu1 %v4967_v59 }
 0x11b   :  { %v526_v61 = vpop.f32.mrb[13].mxu1  ;;  %4074 = vmatpush3.bf16.msra.mxu1 %v4967_v59  ;;  %v535_v63 = vadd.f32 %v4063_v60, %v3576_v30 }
 0x11c   :  { %v4064_v62 = vpop.f32.mrb[14].mxu1  ;;  %4075 = vmatprep.subr.bf16.mxu1 %v4964_v58  ;;  %v527_v2 = vadd.f32 %v3576_v30, %v526_v61  ;;  %v5048_v61 = vadd.f32 %v5035_v52, %v250_v22 }
 0x11d   :  { %v538_v0 = vadd.f32 %v4064_v62, %v3576_v30  ;;  %v529_v1 = vpop.f32.mrb[15].mxu1 }
 0x11e   :  { %v530_v3 = vadd.f32 %v3576_v30, %v529_v1  ;;  %v4987_v30 = vpop.f32.mrb[11].mxu0 }
 0x11f   :  { %v4972_v4 = vpack.c.bf16 %v538_v0, %v535_v63  ;;  %4076 = vmatpush3.bf16.msra.mxu1 %v4964_v58  ;;  %v4989_v31 = vpop.f32.mrb[12].mxu0 }
 0x120   :  { %v4975_v5 = vpack.c.bf16 %v530_v3, %v527_v2  ;;  %v4991_v32 = vpop.f32.mrb[13].mxu0 }
 0x121   :  { %v4993_v33 = vpop.f32.mrb[14].mxu0 }
 0x122   :  { %4077 = vmatprep.subr.bf16.mxu1 %v4975_v5  ;;  %v4995_v34 = vpop.f32.mrb[15].mxu0 }
 0x123   :  { %4078 = vmatpush3.bf16.msra.mxu1 %v4975_v5  ;;  %v4997_v35 = vpop.f32.mrb[16].mxu0 }
 0x124   :  { %4079 = vmatprep.subr.bf16.mxu1 %v4972_v4  ;;  %v4999_v36 = vpop.f32.mrb[17].mxu0 }
 0x125   :  { %v5001_v37 = vpop.f32.mrb[18].mxu0 }
 0x126   :  { %v5003_v40 = vpop.f32.mrb[19].mxu0 }
 0x127   :  { %4080 = vmatpush3.bf16.msra.mxu1 %v4972_v4 }
 0x128   :  { %4105 = vmatprep.subr.bf16.mxu1 %v4560_v46 }
 0x12a   :  { %4082 = vmatmul.mubr.bf16.vlgmr.msra.gmra.mrb[16].mxu1 %v4515_v6  ;;  %v5005_v41 = vpop.f32.mrb[20].mxu0 }
 0x12b   :  { %4085 = vmatprep.mubr.bf16.mxu1 %v4518_v7  ;;  %v5007_v42 = vpop.f32.mrb[21].mxu0  ;;  %4106 = vmatpush3.bf16.msra.mxu1 %v4560_v46  ;;  %v5054_v7 = vadd.f32 %v4029_v23, %v5035_v52 }
 0x12c   :  { %v5009_v43 = vpop.f32.mrb[22].mxu0  ;;  %4107 = vmatprep.subr.bf16.mxu1 %v4561_v47 }
 0x12d   :  { %v5011_v44 = vpop.f32.mrb[23].mxu0 }
 0x12f   :  { %4108 = vmatpush3.bf16.msra.mxu1 %v4561_v47  ;;  %v5072_v47 = vadd.f32 %v4981_v27, %v5035_v52 }
 0x130   :  { %4109 = vmatprep.subr.bf16.mxu1 %v4562_v50 }
 0x132   :  { %4086 = vmatmul.mubr.bf16.gmra.mrb[20].mxu1 %v4519_v8 }
 0x133   :  { %4089 = vmatprep.mubr.bf16.mxu1 %v4522_v9  ;;  %4110 = vmatpush3.bf16.msra.mxu1 %v4562_v50 }
 0x134   :  { %4111 = vmatprep.subr.bf16.mxu1 %v4563_v51 }
 0x137   :  { %4112 = vmatpush3.bf16.msra.mxu1 %v4563_v51  ;;  %v5076_v51 = vadd.f32 %v5035_v52, %v4983_v28 }
 0x13a   :  { %4090 = vmatmul.mubr.bf16.gmra.mrb[24].mxu1 %v4523_v10  ;;  %v5057_v10 = vadd.f32 %v5035_v52, %v263_v24 }
 0x13b   :  { %4093 = vmatprep.mubr.bf16.mxu1 %v4526_v11 }
 0x142   :  { %4094 = vmatmul.mubr.bf16.gmra.mrb[28].mxu1 %v4527_v12 }
 0x143   :  { %4097 = vmatprep.mubr.bf16.mxu1 %v4530_v13 }
 0x14a   :  { %4098 = vmatmul.mubr.bf16.gmra.mrb[32].mxu1 %v4531_v14  ;;  %v5060_v14 = vadd.f32 %v4030_v25, %v5035_v52 }
 0x14b   :  { %4101 = vmatprep.mubr.bf16.mxu1 %v4534_v15 }
 0x152   :  { %4102 = vmatmul.mubr.bf16.gmra.mrb[36].mxu1 %v4535_v16 }
 0x1fd   :  { %v4083_v55 = vpop.f32.mrb[16].mxu1 }
 0x1fe   :  { %v741_v57 = vadd.f32 %v4083_v55, %v5038_v53  ;;  %v732_v60 = vpop.f32.mrb[17].mxu1 }
 0x1ff   :  { %v733_v62 = vadd.f32 %v732_v60, %v5041_v54  ;;  %v4084_v63 = vpop.f32.mrb[18].mxu1 }
 0x200   :  { %v744_v0 = vadd.f32 %v4084_v63, %v5044_v56  ;;  %v735_v1 = vpop.f32.mrb[19].mxu1  ;;  %v829_v3 = vmax.f32 %v741_v57, 0.0 }
 0x201   :  { %v736_v2 = vadd.f32 %v735_v1, %v5048_v61  ;;  %v827_v8 = vmax.f32 %v733_v62, 0.0  ;;  %v5081_v62 = vadd.f32 %v4985_v29, %v5035_v52 }
 0x202   :  { %v830_v6 = vmax.f32 %v744_v0, 0.0  ;;  %v5086_v0 = vadd.f32 %v5035_v52, %v4987_v30 }
 0x203   :  { %v828_v9 = vmax.f32 %v736_v2, 0.0 }
 0x204   :  { %v852_v11 = vpack.c.bf16 %v830_v6, %v829_v3 }
 0x205   :  { %v851_v12 = vpack.c.bf16 %v828_v9, %v827_v8  ;;  %v4087_v13 = vpop.f32.mrb[20].mxu1  ;;  %v5094_v9 = vadd.f32 %v4989_v31, %v5035_v52 }
 0x206   :  { %v757_v15 = vadd.f32 %v4087_v13, %v5054_v7  ;;  %v748_v16 = vpop.f32.mrb[21].mxu1 }
 0x207   :  { %v749_v20 = vadd.f32 %v748_v16, %v5057_v10  ;;  %v4088_v21 = vpop.f32.mrb[22].mxu1  ;;  %961 = vmatpush1.bf16.msra.mxu0 %v851_v12  ;;  %v5098_v12 = vadd.f32 %v5035_v52, %v4991_v32 }
 0x208   :  { %v760_v22 = vadd.f32 %v4088_v21, %v5060_v14  ;;  %v751_v23 = vpop.f32.mrb[23].mxu1  ;;  %962 = vmatprep.subr.bf16.mxu0 %v6118_v17  ;;  %v833_v46 = vmax.f32 %v757_v15, 0.0 }
 0x209   :  { %v752_v24 = vadd.f32 %v751_v23, %v5064_v19  ;;  %v831_v50 = vmax.f32 %v749_v20, 0.0  ;;  %6151 = vst [vmem:[#allocation12_spill] sm:$0xff] %v5098_v12  ;;  %v5103_v20 = vadd.f32 %v4993_v33, %v5035_v52 }
 0x20a   :  { %v834_v25 = vmax.f32 %v760_v22, 0.0  ;;  %v5108_v22 = vadd.f32 %v5035_v52, %v4995_v34 }
 0x20b   :  { %v832_v26 = vmax.f32 %v752_v24, 0.0  ;;  %963 = vmatpush1.bf16.msra.mxu0 %v852_v11  ;;  %6152 = vst [vmem:[#allocation13_spill] sm:$0xff] %v5103_v20 }
 0x20c   :  { %v854_v55 = vpack.c.bf16 %v834_v25, %v833_v46  ;;  %964 = vmatprep.subr.bf16.mxu0 %v6118_v17  ;;  %6153 = vst [vmem:[#allocation14_spill] sm:$0xff] %v5108_v22 }
 0x20d   :  { %v853_v57 = vpack.c.bf16 %v832_v26, %v831_v50  ;;  %v4091_v60 = vpop.f32.mrb[24].mxu1  ;;  %v5116_v26 = vadd.f32 %v4997_v35, %v5035_v52 }
 0x20e   :  { %v773_v63 = vadd.f32 %v4091_v60, %v5072_v47  ;;  %v764_v27 = vpop.f32.mrb[25].mxu1 }
 0x20f   :  { %v765_v28 = vadd.f32 %v764_v27, %v5076_v51  ;;  %v4092_v1 = vpop.f32.mrb[26].mxu1  ;;  %965 = vmatpush1.bf16.msra.mxu0 %v853_v57  ;;  %6154 = vst [vmem:[#allocation15_spill] sm:$0xff] %v5116_v26  ;;  %v5120_v57 = vadd.f32 %v5035_v52, %v4999_v36 }
 0x210   :  { %v776_v2 = vadd.f32 %v4092_v1, %v5081_v62  ;;  %v767_v3 = vpop.f32.mrb[27].mxu1  ;;  %966 = vmatprep.subr.bf16.mxu0 %v6118_v17  ;;  %v837_v29 = vmax.f32 %v773_v63, 0.0 }
 0x211   :  { %v768_v6 = vadd.f32 %v767_v3, %v5086_v0  ;;  %v835_v11 = vmax.f32 %v765_v28, 0.0  ;;  %6155 = vst [vmem:[#allocation16_spill] sm:$0xff] %v5120_v57  ;;  %v5125_v28 = vadd.f32 %v5001_v37, %v5035_v52 }
 0x212   :  { %v838_v8 = vmax.f32 %v776_v2, 0.0  ;;  %v5130_v2 = vadd.f32 %v5035_v52, %v5003_v40 }
 0x213   :  { %v836_v30 = vmax.f32 %v768_v6, 0.0  ;;  %967 = vmatpush1.bf16.msra.mxu0 %v854_v55  ;;  %6156 = vst [vmem:[#allocation17_spill] sm:$0xff] %v5125_v28 }
 0x214   :  { %v856_v13 = vpack.c.bf16 %v838_v8, %v837_v29  ;;  %968 = vmatprep.subr.bf16.mxu0 %v6118_v17  ;;  %6157 = vst [vmem:[#allocation18_spill] sm:$0xff] %v5130_v2 }
 0x215   :  { %v855_v15 = vpack.c.bf16 %v836_v30, %v835_v11  ;;  %v4095_v16 = vpop.f32.mrb[28].mxu1  ;;  %v5138_v30 = vadd.f32 %v5005_v41, %v5035_v52 }
 0x216   :  { %v789_v21 = vadd.f32 %v4095_v16, %v5094_v9  ;;  %v780_v31 = vpop.f32.mrb[29].mxu1 }
 0x217   :  { %v781_v32 = vadd.f32 %v780_v31, %v5098_v12  ;;  %v4096_v23 = vpop.f32.mrb[30].mxu1  ;;  %969 = vmatpush1.bf16.msra.mxu0 %v855_v15  ;;  %6158 = vst [vmem:[#allocation19_spill] sm:$0xff] %v5138_v30  ;;  %v5142_v15 = vadd.f32 %v5035_v52, %v5007_v42 }
 0x218   :  { %v792_v24 = vadd.f32 %v4096_v23, %v5103_v20  ;;  %v783_v46 = vpop.f32.mrb[31].mxu1  ;;  %970 = vmatprep.subr.bf16.mxu0 %v6118_v17  ;;  %v841_v33 = vmax.f32 %v789_v21, 0.0 }
 0x219   :  { %v784_v25 = vadd.f32 %v783_v46, %v5108_v22  ;;  %v839_v55 = vmax.f32 %v781_v32, 0.0  ;;  %6159 = vst [vmem:[#allocation20_spill] sm:$0xff] %v5142_v15  ;;  %v5147_v32 = vadd.f32 %v5009_v43, %v5035_v52 }
 0x21a   :  { %v842_v50 = vmax.f32 %v792_v24, 0.0  ;;  %v5152_v24 = vadd.f32 %v5035_v52, %v5011_v44  ;;  %v5163_v52 = vld [vmem:[%s6105_s3] ss:$8 sps:$4 sm:$0xff]  }
 0x21b   :  { %v840_v34 = vmax.f32 %v784_v25, 0.0  ;;  %971 = vmatpush1.bf16.msra.mxu0 %v856_v13  ;;  %6160 = vst [vmem:[#allocation21_spill] sm:$0xff] %v5147_v32 }
 0x21c   :  { %v858_v60 = vpack.c.bf16 %v842_v50, %v841_v33  ;;  %972 = vmatprep.subr.bf16.mxu0 %v6118_v17  ;;  %6161 = vst [vmem:[#allocation22_spill] sm:$0xff] %v5152_v24 }
 0x21d   :  { %v857_v63 = vpack.c.bf16 %v840_v34, %v839_v55  ;;  %v4099_v27 = vpop.f32.mrb[32].mxu1 }
 0x21e   :  { %v805_v1 = vadd.f32 %v4099_v27, %v5116_v26  ;;  %v796_v35 = vpop.f32.mrb[33].mxu1  ;;  %v5168_v27 = vld [vmem:[%s6105_s3 + $0x14] ss:$8 sps:$4 sm:$0xff]  }
 0x21f   :  { %v797_v36 = vadd.f32 %v796_v35, %v5120_v57  ;;  %v4100_v3 = vpop.f32.mrb[34].mxu1  ;;  %973 = vmatpush1.bf16.msra.mxu0 %v857_v63  ;;  %v5181_v35 = vld [vmem:[%s6105_s3 + $0x24] ss:$8 sps:$4 sm:$0xff]  }
 0x220   :  { %v808_v6 = vadd.f32 %v4100_v3, %v5125_v28  ;;  %v799_v29 = vpop.f32.mrb[35].mxu1  ;;  %974 = vmatprep.subr.bf16.mxu0 %v6118_v17  ;;  %v845_v37 = vmax.f32 %v805_v1, 0.0  ;;  %v5176_v1 = vld [vmem:[%s6105_s3 + $0x10] ss:$8 sps:$4 sm:$0xff]   ;;  %v5194_v3 = vld [vmem:[%s6105_s3 + $0x34] ss:$8 sps:$4 sm:$0xff]  }
 0x221   :  { %v800_v8 = vadd.f32 %v799_v29, %v5130_v2  ;;  %v843_v13 = vmax.f32 %v797_v36, 0.0  ;;  %v5189_v36 = vld [vmem:[%s6105_s3 + $0x20] ss:$8 sps:$4 sm:$0xff]   ;;  %v5207_v29 = vld [vmem:[%s6105_s3 + $0x44] ss:$8 sps:$4 sm:$0xff]  }
 0x222   :  { %v846_v11 = vmax.f32 %v808_v6, 0.0  ;;  %v5202_v6 = vld [vmem:[%s6105_s3 + $0x30] ss:$8 sps:$4 sm:$0xff]   ;;  %6162 = vst [vmem:[#allocation23_spill] sm:$0xff] %v5207_v29 }
 0x223   :  { %v844_v40 = vmax.f32 %v800_v8, 0.0  ;;  %975 = vmatpush1.bf16.msra.mxu0 %v858_v60  ;;  %v5215_v8 = vld [vmem:[%s6105_s3 + $0x40] ss:$8 sps:$4 sm:$0xff]  }
 0x224   :  { %v860_v16 = vpack.c.bf16 %v846_v11, %v845_v37  ;;  %976 = vmatprep.subr.bf16.mxu0 %v6118_v17  ;;  %6163 = vst [vmem:[#allocation24_spill] sm:$0xff] %v5215_v8  ;;  %v5220_v37 = vld [vmem:[%s6105_s3 + $0x54] ss:$8 sps:$4 sm:$0xff]   ;;  %v5228_v11 = vld [vmem:[%s6105_s3 + $0x50] ss:$8 sps:$4 sm:$0xff]  }
 0x225   :  { %v859_v21 = vpack.c.bf16 %v844_v40, %v843_v13  ;;  %v4103_v31 = vpop.f32.mrb[36].mxu1  ;;  %6164 = vst [vmem:[#allocation25_spill] sm:$0xff] %v5220_v37  ;;  %6165 = vst [vmem:[#allocation26_spill] sm:$0xff] %v5228_v11  ;;  %v5233_v13 = vld [vmem:[%s6105_s3 + $0x64] ss:$8 sps:$4 sm:$0xff]  }
 0x226   :  { %v821_v23 = vadd.f32 %v4103_v31, %v5138_v30  ;;  %v812_v41 = vpop.f32.mrb[37].mxu1  ;;  %6166 = vst [vmem:[#allocation27_spill] sm:$0xff] %v5233_v13  ;;  %v5241_v40 = vld [vmem:[%s6105_s3 + $0x60] ss:$8 sps:$4 sm:$0xff]  }
 0x227   :  { %v813_v42 = vadd.f32 %v812_v41, %v5142_v15  ;;  %v4104_v46 = vpop.f32.mrb[38].mxu1  ;;  %977 = vmatpush1.bf16.msra.mxu0 %v859_v21  ;;  %6167 = vst [vmem:[#allocation28_spill] sm:$0xff] %v5241_v40  ;;  %v5254_v21 = vld [vmem:[%s6105_s3 + $0x70] ss:$8 sps:$4 sm:$0xff]   ;;  %v4564_v31 = vld [vmem:[%s6113_s11 + $0x20] sm:$0xff]  }
 0x228   :  { %v824_v25 = vadd.f32 %v4104_v46, %v5147_v32  ;;  %v815_v33 = vpop.f32.mrb[39].mxu1  ;;  %978 = vmatprep.subr.bf16.mxu0 %v6118_v17  ;;  %v849_v43 = vmax.f32 %v821_v23, 0.0  ;;  %6169 = vst [vmem:[#allocation30_spill] sm:$0xff] %v5254_v21  ;;  %4113 = vmatprep.subr.bf16.mxu1 %v4564_v31  ;;  %v4565_v23 = vld [vmem:[%s6113_s11 + $0x28] sm:$0xff]   ;;  %v4566_v41 = vld [vmem:[%s6113_s11 + $0x30] sm:$0xff]   ;;  %v4568_v46 = vld [vmem:[%s6115_s13] sm:$0xff]  }
 0x229   :  { %v816_v50 = vadd.f32 %v815_v33, %v5152_v24  ;;  %v847_v34 = vmax.f32 %v813_v42, 0.0  ;;  %4114 = vmatpush3.bf16.msra.mxu1 %v4564_v31  ;;  %v4567_v42 = vld [vmem:[%s6113_s11 + $0x38] sm:$0xff]   ;;  %v4570_v33 = vld [vmem:[%s6115_s13 + $0x10] sm:$0xff]   ;;  %v589_v31 = vld [vmem:[%s6112_s10] sm:$0x1f] }
 0x22a   :  { %v850_v55 = vmax.f32 %v824_v25, 0.0  ;;  %4115 = vmatprep.subr.bf16.mxu1 %v4565_v23  ;;  %v4569_v25 = vld [vmem:[%s6115_s13 + $0x8] sm:$0xff]  }
 0x22b   :  { %v848_v60 = vmax.f32 %v816_v50, 0.0  ;;  %979 = vmatpush1.bf16.msra.mxu0 %v860_v16  ;;  %v5246_v16 = vld [vmem:[%s6105_s3 + $0x74] ss:$8 sps:$4 sm:$0xff]  }
 0x22c   :  { %v862_v63 = vpack.c.bf16 %v850_v55, %v849_v43  ;;  %980 = vmatprep.subr.bf16.mxu0 %v6118_v17  ;;  %6168 = vst [vmem:[#allocation29_spill] sm:$0xff] %v5246_v16  ;;  %v4571_v50 = vld [vmem:[%s6115_s13 + $0x18] sm:$0xff]   ;;  %v4572_v43 = vld [vmem:[%s6115_s13 + $0x20] sm:$0xff]   ;;  %v4573_v55 = vld [vmem:[%s6115_s13 + $0x28] sm:$0xff]  }
 0x22d   :  { %v861_v44 = vpack.c.bf16 %v848_v60, %v847_v34  ;;  %4116 = vmatpush3.bf16.msra.mxu1 %v4565_v23  ;;  %v606_v34 = vlaneseq  ;;  %v590_v23 = vunpack.c.l.bf16 %v4951_v39 }
 0x22e   :  { %4117 = vmatprep.subr.bf16.mxu1 %v4566_v41 }
 0x22f   :  { %981 = vmatpush1.bf16.msra.mxu0 %v861_v44  ;;  %v5287_v60 = vshrl.u32 %v606_v34, 7 }
 0x230   :  { %982 = vmatprep.subr.bf16.mxu0 %v6118_v17 }
 0x231   :  { %4118 = vmatpush3.bf16.msra.mxu1 %v4566_v41  ;;  %6170 = vst [vmem:[#allocation31_spill] sm:$0xff] %v5287_v60  ;;  %v5293_v44 = vsub.s32 1, %v5287_v60 }
 0x232   :  { %4119 = vmatprep.subr.bf16.mxu1 %v4567_v42 }
 0x233   :  { %983 = vmatpush1.bf16.msra.mxu0 %v862_v63  ;;  %v5290_v63 = vsub.s32 0, %v5287_v60  ;;  %6172 = vst [vmem:[#allocation33_spill] sm:$0xff] %v5293_v44 }
 0x234   :  { %4137 = vmatprep.subr.bf16.mxu0 %v4568_v46 }
 0x235   :  { %4120 = vmatpush3.bf16.msra.mxu1 %v4567_v42  ;;  %6171 = vst [vmem:[#allocation32_spill] sm:$0xff] %v5290_v63  ;;  %v5300_v41 = vrot.slane %v589_v31, %v5290_v63  ;;  %v5303_v42 = vrot.slane %v589_v31, %v5293_v44  ;;  %v593_v44 = vunpack.c.h.bf16 %v4949_v38 }
 0x236   :  { %993 = vmatmul.mubr.bf16.vlgmr.msra.gmra.mrb[24].mxu0 %v5163_v52 }
 0x237   :  { %3623 = vmatprep.mubr.msk.bf16.mxu0 %vm935_vm5, %v5168_v27  ;;  %4138 = vmatpush3.bf16.msra.mxu0 %v4568_v46  ;;  %v591_v46 = vunpack.c.h.bf16 %v4951_v39 }
 0x238   :  { %4139 = vmatprep.subr.bf16.mxu0 %v4569_v25 }
 0x239   :  { %v611_v17 = vmul.f32 %v5300_v41, %v591_v46  ;;  %v613_v46 = vmul.f32 %v5300_v41, %v593_v44 }
 0x23b   :  { %4140 = vmatpush3.bf16.msra.mxu0 %v4569_v25 }
 0x23c   :  { %4141 = vmatprep.subr.bf16.mxu0 %v4570_v33 }
 0x23e   :  { %1001 = vmatmul.mubr.bf16.gmra.mrb[28].mxu0 %v5176_v1 }
 0x23f   :  { %3624 = vmatprep.mubr.msk.bf16.mxu0 %vm935_vm5, %v5181_v35  ;;  %4142 = vmatpush3.bf16.msra.mxu0 %v4570_v33  ;;  %v610_v33 = vmul.f32 %v5300_v41, %v590_v23 }
 0x240   :  { %4143 = vmatprep.subr.bf16.mxu0 %v4571_v50 }
 0x243   :  { %4144 = vmatpush3.bf16.msra.mxu0 %v4571_v50 }
 0x244   :  { %4145 = vmatprep.subr.bf16.mxu0 %v4572_v43 }
 0x246   :  { %1009 = vmatmul.mubr.bf16.gmra.mrb[32].mxu0 %v5189_v36 }
 0x247   :  { %3625 = vmatprep.mubr.msk.bf16.mxu0 %vm935_vm5, %v5194_v3  ;;  %4146 = vmatpush3.bf16.msra.mxu0 %v4572_v43 }
 0x248   :  { %4147 = vmatprep.subr.bf16.mxu0 %v4573_v55 }
 0x24b   :  { %4148 = vmatpush3.bf16.msra.mxu0 %v4573_v55 }
 0x24e   :  { %1017 = vmatmul.mubr.bf16.gmra.mrb[36].mxu0 %v5202_v6 }
 0x24f   :  { %3626 = vmatprep.mubr.msk.bf16.mxu0 %vm935_vm5, %v5207_v29 }
 0x256   :  { %1025 = vmatmul.mubr.bf16.gmra.mrb[40].mxu0 %v5215_v8 }
 0x257   :  { %3627 = vmatprep.mubr.msk.bf16.mxu0 %vm935_vm5, %v5220_v37 }
 0x25e   :  { %1033 = vmatmul.mubr.bf16.gmra.mrb[44].mxu0 %v5228_v11 }
 0x25f   :  { %3628 = vmatprep.mubr.msk.bf16.mxu0 %vm935_vm5, %v5233_v13 }
 0x266   :  { %1041 = vmatmul.mubr.bf16.gmra.mrb[48].mxu0 %v5241_v40 }
 0x267   :  { %3629 = vmatprep.mubr.msk.bf16.mxu0 %vm935_vm5, %v5246_v16  ;;  %v592_v16 = vunpack.c.l.bf16 %v4949_v38 }
 0x269   :  { %v612_v13 = vmul.f32 %v5300_v41, %v592_v16 }
 0x26e   :  { %1049 = vmatmul.mubr.bf16.gmra.mrb[52].mxu0 %v5254_v21 }
 0x309   :  { %v994_v25 = vpop.f32.mrb[24].mxu0 }
 0x30a   :  { %v1061_v50 = vmul.f32 %v5303_v42, %v994_v25  ;;  %v996_v43 = vpop.f32.mrb[25].mxu0 }
 0x30b   :  { %v997_v55 = vpop.f32.mrb[26].mxu0 }
 0x30c   :  { %v1077_v34 = vadd.f32 %v1061_v50, %v610_v33  ;;  %v1062_v60 = vmul.f32 %v5303_v42, %v997_v55  ;;  %v999_v21 = vpop.f32.mrb[27].mxu0  ;;  %v595_v55 = vunpack.c.h.bf16 %v4959_v49 }
 0x30e   :  { %v1078_v63 = vadd.f32 %v1062_v60, %v611_v17  ;;  %v594_v60 = vunpack.c.l.bf16 %v4959_v49  ;;  %v615_v44 = vmul.f32 %v5300_v41, %v595_v55 }
 0x310   :  { %v1093_v31 = vpack.c.bf16 %v1078_v63, %v1077_v34  ;;  %v614_v16 = vmul.f32 %v5300_v41, %v594_v60 }
 0x311   :  { %v1002_v40 = vpop.f32.mrb[28].mxu0 }
 0x312   :  { %v1063_v23 = vmul.f32 %v5303_v42, %v1002_v40  ;;  %v1004_v25 = vpop.f32.mrb[29].mxu0  ;;  %4121 = vmatprep.mubr.bf16.mxu1 %v1093_v31 }
 0x313   :  { %v1005_v43 = vpop.f32.mrb[30].mxu0 }
 0x314   :  { %v1079_v33 = vadd.f32 %v1063_v23, %v612_v13  ;;  %v1064_v50 = vmul.f32 %v5303_v42, %v1005_v43  ;;  %v1007_v21 = vpop.f32.mrb[31].mxu0 }
 0x315   :  { %v597_v21 = vunpack.c.h.bf16 %v4956_v48 }
 0x316   :  { %v1080_v17 = vadd.f32 %v1064_v50, %v613_v46  ;;  %v596_v50 = vunpack.c.l.bf16 %v4956_v48 }
 0x317   :  { %v617_v55 = vmul.f32 %v5300_v41, %v597_v21 }
 0x318   :  { %v1094_v63 = vpack.c.bf16 %v1080_v17, %v1079_v33  ;;  %v616_v60 = vmul.f32 %v5300_v41, %v596_v50 }
 0x319   :  { %v1010_v34 = vpop.f32.mrb[32].mxu0 }
 0x31a   :  { %v1065_v40 = vmul.f32 %v5303_v42, %v1010_v34  ;;  %v1012_v25 = vpop.f32.mrb[33].mxu0  ;;  %4122 = vmatmul.mubr.bf16.vlgmr.msra.gmra.mrb[40].mxu1 %v1094_v63 }
 0x31b   :  { %v1013_v31 = vpop.f32.mrb[34].mxu0 }
 0x31c   :  { %v1081_v13 = vadd.f32 %v1065_v40, %v614_v16  ;;  %v1066_v23 = vmul.f32 %v5303_v42, %v1013_v31  ;;  %v1015_v43 = vpop.f32.mrb[35].mxu0 }
 0x31d   :  { %v599_v43 = vunpack.c.h.bf16 %v4967_v59 }
 0x31e   :  { %v1082_v46 = vadd.f32 %v1066_v23, %v615_v44  ;;  %v598_v23 = vunpack.c.l.bf16 %v4967_v59 }
 0x31f   :  { %v619_v21 = vmul.f32 %v5300_v41, %v599_v43 }
 0x320   :  { %v1095_v33 = vpack.c.bf16 %v1082_v46, %v1081_v13  ;;  %v618_v50 = vmul.f32 %v5300_v41, %v598_v23 }
 0x321   :  { %v1018_v17 = vpop.f32.mrb[36].mxu0 }
 0x322   :  { %v1067_v34 = vmul.f32 %v5303_v42, %v1018_v17  ;;  %v1020_v25 = vpop.f32.mrb[37].mxu0  ;;  %4125 = vmatprep.mubr.bf16.mxu1 %v1095_v33 }
 0x323   :  { %v1021_v63 = vpop.f32.mrb[38].mxu0 }
 0x324   :  { %v1083_v16 = vadd.f32 %v1067_v34, %v616_v60  ;;  %v1068_v40 = vmul.f32 %v5303_v42, %v1021_v63  ;;  %v1023_v31 = vpop.f32.mrb[39].mxu0 }
 0x325   :  { %v601_v31 = vunpack.c.h.bf16 %v4964_v58 }
 0x326   :  { %v1084_v44 = vadd.f32 %v1068_v40, %v617_v55  ;;  %v600_v40 = vunpack.c.l.bf16 %v4964_v58 }
 0x327   :  { %v621_v43 = vmul.f32 %v5300_v41, %v601_v31 }
 0x328   :  { %v1096_v13 = vpack.c.bf16 %v1084_v44, %v1083_v16  ;;  %v620_v23 = vmul.f32 %v5300_v41, %v600_v40 }
 0x329   :  { %v1026_v46 = vpop.f32.mrb[40].mxu0 }
 0x32a   :  { %v1069_v17 = vmul.f32 %v5303_v42, %v1026_v46  ;;  %v1028_v25 = vpop.f32.mrb[41].mxu0  ;;  %4126 = vmatmul.mubr.bf16.gmra.mrb[44].mxu1 %v1096_v13 }
 0x32b   :  { %v1029_v33 = vpop.f32.mrb[42].mxu0 }
 0x32c   :  { %v1085_v60 = vadd.f32 %v1069_v17, %v618_v50  ;;  %v1070_v34 = vmul.f32 %v5303_v42, %v1029_v33  ;;  %v1031_v63 = vpop.f32.mrb[43].mxu0 }
 0x32d   :  { %v603_v63 = vunpack.c.h.bf16 %v4975_v5 }
 0x32e   :  { %v1086_v55 = vadd.f32 %v1070_v34, %v619_v21  ;;  %v602_v34 = vunpack.c.l.bf16 %v4975_v5 }
 0x32f   :  { %v623_v31 = vmul.f32 %v5300_v41, %v603_v63 }
 0x330   :  { %v1097_v16 = vpack.c.bf16 %v1086_v55, %v1085_v60  ;;  %v622_v40 = vmul.f32 %v5300_v41, %v602_v34 }
 0x331   :  { %v1034_v44 = vpop.f32.mrb[44].mxu0 }
 0x332   :  { %v1071_v46 = vmul.f32 %v5303_v42, %v1034_v44  ;;  %v1036_v25 = vpop.f32.mrb[45].mxu0  ;;  %4129 = vmatprep.mubr.bf16.mxu1 %v1097_v16 }
 0x333   :  { %v1037_v13 = vpop.f32.mrb[46].mxu0 }
 0x334   :  { %v1087_v50 = vadd.f32 %v1071_v46, %v620_v23  ;;  %v1072_v17 = vmul.f32 %v5303_v42, %v1037_v13  ;;  %v1039_v33 = vpop.f32.mrb[47].mxu0 }
 0x335   :  { %v605_v33 = vunpack.c.h.bf16 %v4972_v4 }
 0x336   :  { %v1088_v21 = vadd.f32 %v1072_v17, %v621_v43  ;;  %v604_v17 = vunpack.c.l.bf16 %v4972_v4 }
 0x337   :  { %v625_v63 = vmul.f32 %v5300_v41, %v605_v33 }
 0x338   :  { %v1098_v60 = vpack.c.bf16 %v1088_v21, %v1087_v50  ;;  %v624_v34 = vmul.f32 %v5300_v41, %v604_v17  ;;  %v6173_v41 = vmov 0  }
 0x339   :  { %v1042_v55 = vpop.f32.mrb[48].mxu0 }
 0x33a   :  { %v1073_v44 = vmul.f32 %v5303_v42, %v1042_v55  ;;  %v1044_v25 = vpop.f32.mrb[49].mxu0  ;;  %4130 = vmatmul.mubr.bf16.gmra.mrb[48].mxu1 %v1098_v60 }
 0x33b   :  { %v1045_v16 = vpop.f32.mrb[50].mxu0 }
 0x33c   :  { %v1089_v23 = vadd.f32 %v1073_v44, %v622_v40  ;;  %v1074_v46 = vmul.f32 %v5303_v42, %v1045_v16  ;;  %v1047_v13 = vpop.f32.mrb[51].mxu0 }
 0x33d   :  { %v4575_v13 = vld [vmem:[%s6115_s13 + $0x38] sm:$0xff]  }
 0x33e   :  { %v1090_v43 = vadd.f32 %v1074_v46, %v623_v31 }
 0x340   :  { %v1099_v50 = vpack.c.bf16 %v1090_v43, %v1089_v23  ;;  %v4574_v23 = vld [vmem:[%s6115_s13 + $0x30] sm:$0xff]  }
 0x341   :  { %v1050_v21 = vpop.f32.mrb[52].mxu0  ;;  %4149 = vmatprep.subr.bf16.mxu0 %v4574_v23 }
 0x342   :  { %v1075_v55 = vmul.f32 %v5303_v42, %v1050_v21  ;;  %v1052_v25 = vpop.f32.mrb[53].mxu0  ;;  %4133 = vmatprep.mubr.bf16.mxu1 %v1099_v50  ;;  %4150 = vmatpush3.bf16.msra.mxu0 %v4574_v23 }
 0x343   :  { %v1053_v60 = vpop.f32.mrb[54].mxu0  ;;  %4151 = vmatprep.subr.bf16.mxu0 %v4575_v13 }
 0x344   :  { %v1091_v40 = vadd.f32 %v1075_v55, %v624_v34  ;;  %v1076_v44 = vmul.f32 %v5303_v42, %v1053_v60  ;;  %v1055_v16 = vpop.f32.mrb[55].mxu0  ;;  %v3630_v42 = vld [vmem:[%s6114_s12] ss:$0 sm:$0xff] }
 0x346   :  { %v1092_v31 = vadd.f32 %v1076_v44, %v625_v63  ;;  %4152 = vmatpush3.bf16.msra.mxu0 %v4575_v13 }
 0x347   :  { %1688 = vmatprep.subr.bf16.mxu0 %v6173_v41 }
 0x348   :  { %v1100_v46 = vpack.c.bf16 %v1092_v31, %v1091_v40 }
 0x34a   :  { %4134 = vmatmul.mubr.bf16.gmra.mrb[52].mxu1 %v1100_v46 }
 0x34b   :  { %4185 = vmatprep.mubr.bf16.mxu1 %v4903_v18 }
 0x3ed   :  { %v4123_v43 = vpop.f32.mrb[40].mxu1 }
 0x3ee   :  { %v1215_v18 = vadd.f32 %v4123_v43, %v3630_v42  ;;  %v1206_v17 = vpop.f32.mrb[41].mxu1 }
 0x3ef   :  { %v1207_v50 = vadd.f32 %v3630_v42, %v1206_v17  ;;  %v4124_v33 = vpop.f32.mrb[42].mxu1 }
 0x3f0   :  { %v1218_v21 = vadd.f32 %v4124_v33, %v3630_v42  ;;  %v1209_v34 = vpop.f32.mrb[43].mxu1  ;;  %v1271_v25 = vmax.f32 %v1215_v18, 0.0 }
 0x3f1   :  { %v1210_v55 = vadd.f32 %v3630_v42, %v1209_v34  ;;  %v1269_v40 = vmax.f32 %v1207_v50, 0.0 }
 0x3f2   :  { %v1272_v60 = vmax.f32 %v1218_v21, 0.0 }
 0x3f3   :  { %v1270_v63 = vmax.f32 %v1210_v55, 0.0 }
 0x3f4   :  { %v1286_v44 = vpack.c.bf16 %v1272_v60, %v1271_v25 }
 0x3f5   :  { %v1285_v16 = vpack.c.bf16 %v1270_v63, %v1269_v40 }
 0x3f7   :  { %4153 = vmatprep.mubr.bf16.mxu0 %v1285_v16 }
 0x3f8   :  { %4154 = vmatmul.mubr.bf16.vlgmr.msra.gmra.mrb[56].mxu0 %v1286_v44 }
 0x3fd   :  { %v4127_v31 = vpop.f32.mrb[44].mxu1 }
 0x3fe   :  { %v1231_v46 = vadd.f32 %v4127_v31, %v3630_v42  ;;  %v1222_v23 = vpop.f32.mrb[45].mxu1 }
 0x3ff   :  { %v1223_v13 = vadd.f32 %v3630_v42, %v1222_v23  ;;  %v4128_v11 = vpop.f32.mrb[46].mxu1 }
 0x400   :  { %v1234_v43 = vadd.f32 %v4128_v11, %v3630_v42  ;;  %v1225_v37 = vpop.f32.mrb[47].mxu1  ;;  %v1275_v8 = vmax.f32 %v1231_v46, 0.0 }
 0x401   :  { %v1226_v17 = vadd.f32 %v3630_v42, %v1225_v37  ;;  %v1273_v29 = vmax.f32 %v1223_v13, 0.0 }
 0x402   :  { %v1276_v33 = vmax.f32 %v1234_v43, 0.0 }
 0x403   :  { %v1274_v34 = vmax.f32 %v1226_v17, 0.0 }
 0x404   :  { %v1288_v18 = vpack.c.bf16 %v1276_v33, %v1275_v8 }
 0x405   :  { %v1287_v21 = vpack.c.bf16 %v1274_v34, %v1273_v29 }
 0x407   :  { %4157 = vmatprep.mubr.bf16.mxu0 %v1287_v21 }
 0x408   :  { %4158 = vmatmul.mubr.bf16.gmra.mrb[60].mxu0 %v1288_v18 }
 0x40d   :  { %v4131_v50 = vpop.f32.mrb[48].mxu1 }
 0x40e   :  { %v1247_v55 = vadd.f32 %v4131_v50, %v3630_v42  ;;  %v1238_v25 = vpop.f32.mrb[49].mxu1 }
 0x40f   :  { %v1239_v60 = vadd.f32 %v3630_v42, %v1238_v25  ;;  %v4132_v40 = vpop.f32.mrb[50].mxu1 }
 0x410   :  { %v1250_v63 = vadd.f32 %v4132_v40, %v3630_v42  ;;  %v1241_v44 = vpop.f32.mrb[51].mxu1  ;;  %v1279_v31 = vmax.f32 %v1247_v55, 0.0 }
 0x411   :  { %v1242_v16 = vadd.f32 %v3630_v42, %v1241_v44  ;;  %v1277_v23 = vmax.f32 %v1239_v60, 0.0  ;;  %v3639_v60 = vld [vmem:[%s6116_s14] ss:$0 sm:$0xff] }
 0x412   :  { %v1280_v11 = vmax.f32 %v1250_v63, 0.0 }
 0x413   :  { %v1278_v37 = vmax.f32 %v1242_v16, 0.0 }
 0x414   :  { %v1290_v46 = vpack.c.bf16 %v1280_v11, %v1279_v31 }
 0x415   :  { %v1289_v43 = vpack.c.bf16 %v1278_v37, %v1277_v23 }
 0x417   :  { %4161 = vmatprep.mubr.bf16.mxu0 %v1289_v43 }
 0x418   :  { %4162 = vmatmul.mubr.bf16.gmra.mrb[64].mxu0 %v1290_v46 }
 0x41d   :  { %v4135_v8 = vpop.f32.mrb[52].mxu1 }
 0x41e   :  { %v1263_v29 = vadd.f32 %v4135_v8, %v3630_v42  ;;  %v1254_v13 = vpop.f32.mrb[53].mxu1 }
 0x41f   :  { %v1255_v17 = vadd.f32 %v3630_v42, %v1254_v13  ;;  %v4136_v33 = vpop.f32.mrb[54].mxu1 }
 0x420   :  { %v1266_v34 = vadd.f32 %v4136_v33, %v3630_v42  ;;  %v1257_v18 = vpop.f32.mrb[55].mxu1  ;;  %v1283_v50 = vmax.f32 %v1263_v29, 0.0 }
 0x421   :  { %v1258_v21 = vadd.f32 %v3630_v42, %v1257_v18  ;;  %v1281_v40 = vmax.f32 %v1255_v17, 0.0 }
 0x422   :  { %v1284_v25 = vmax.f32 %v1266_v34, 0.0 }
 0x423   :  { %v1282_v44 = vmax.f32 %v1258_v21, 0.0 }
 0x424   :  { %v1292_v55 = vpack.c.bf16 %v1284_v25, %v1283_v50 }
 0x425   :  { %v1291_v63 = vpack.c.bf16 %v1282_v44, %v1281_v40 }
 0x427   :  { %4165 = vmatprep.mubr.bf16.mxu0 %v1291_v63 }
 0x428   :  { %4166 = vmatmul.mubr.bf16.gmra.mrb[68].mxu0 %v1292_v55 }
 0x429   :  { %3649 = vmatprep.mubr.msk.bf16.mxu0 %vm935_vm5, %v5016_v45 }
 0x4cb   :  { %v4155_v16 = vpop.f32.mrb[56].mxu0 }
 0x4cc   :  { %v1407_v31 = vadd.f32 %v4155_v16, %v3639_v60  ;;  %v1398_v11 = vpop.f32.mrb[57].mxu0 }
 0x4cd   :  { %v1399_v23 = vadd.f32 %v3639_v60, %v1398_v11  ;;  %v4156_v42 = vpop.f32.mrb[58].mxu0 }
 0x4ce   :  { %v1410_v37 = vadd.f32 %v4156_v42, %v3639_v60  ;;  %v1401_v46 = vpop.f32.mrb[59].mxu0  ;;  %v1463_v8 = vmax.f32 %v1407_v31, 0.0 }
 0x4cf   :  { %v1402_v43 = vadd.f32 %v3639_v60, %v1401_v46  ;;  %v1461_v13 = vmax.f32 %v1399_v23, 0.0 }
 0x4d0   :  { %v1464_v29 = vmax.f32 %v1410_v37, 0.0 }
 0x4d1   :  { %v1462_v17 = vmax.f32 %v1402_v43, 0.0 }
 0x4d2   :  { %v5368_v33 = vpack.c.bf16 %v1464_v29, %v1463_v8 }
 0x4d3   :  { %v5370_v34 = vpack.c.bf16 %v1462_v17, %v1461_v13 }
 0x4d5   :  { %4169 = vmatprep.subr.bf16.mxu1 %v5370_v34 }
 0x4d6   :  { %4170 = vmatpush3.bf16.msra.mxu1 %v5370_v34 }
 0x4d7   :  { %4171 = vmatprep.subr.bf16.mxu1 %v5368_v33 }
 0x4da   :  { %4172 = vmatpush3.bf16.msra.mxu1 %v5368_v33 }
 0x4db   :  { %v4159_v45 = vpop.f32.mrb[60].mxu0 }
 0x4dc   :  { %v1423_v18 = vadd.f32 %v4159_v45, %v3639_v60  ;;  %v1414_v21 = vpop.f32.mrb[61].mxu0 }
 0x4dd   :  { %v1415_v50 = vadd.f32 %v3639_v60, %v1414_v21  ;;  %v4160_v25 = vpop.f32.mrb[62].mxu0 }
 0x4de   :  { %v1426_v40 = vadd.f32 %v4160_v25, %v3639_v60  ;;  %v1417_v44 = vpop.f32.mrb[63].mxu0  ;;  %v1467_v63 = vmax.f32 %v1423_v18, 0.0 }
 0x4df   :  { %v1418_v55 = vadd.f32 %v3639_v60, %v1417_v44  ;;  %v1465_v31 = vmax.f32 %v1415_v50, 0.0 }
 0x4e0   :  { %v1468_v16 = vmax.f32 %v1426_v40, 0.0 }
 0x4e1   :  { %v1466_v11 = vmax.f32 %v1418_v55, 0.0 }
 0x4e2   :  { %v5376_v23 = vpack.c.bf16 %v1468_v16, %v1467_v63 }
 0x4e3   :  { %v5378_v42 = vpack.c.bf16 %v1466_v11, %v1465_v31 }
 0x4e5   :  { %4173 = vmatprep.subr.bf16.mxu1 %v5378_v42 }
 0x4e6   :  { %4174 = vmatpush3.bf16.msra.mxu1 %v5378_v42 }
 0x4e7   :  { %4175 = vmatprep.subr.bf16.mxu1 %v5376_v23 }
 0x4ea   :  { %4176 = vmatpush3.bf16.msra.mxu1 %v5376_v23 }
 0x4eb   :  { %v4163_v37 = vpop.f32.mrb[64].mxu0 }
 0x4ec   :  { %v1439_v46 = vadd.f32 %v4163_v37, %v3639_v60  ;;  %v1430_v43 = vpop.f32.mrb[65].mxu0 }
 0x4ed   :  { %v1431_v8 = vadd.f32 %v3639_v60, %v1430_v43  ;;  %v4164_v29 = vpop.f32.mrb[66].mxu0 }
 0x4ee   :  { %v1442_v13 = vadd.f32 %v4164_v29, %v3639_v60  ;;  %v1433_v17 = vpop.f32.mrb[67].mxu0  ;;  %v1471_v18 = vmax.f32 %v1439_v46, 0.0 }
 0x4ef   :  { %v1434_v45 = vadd.f32 %v3639_v60, %v1433_v17  ;;  %v1469_v50 = vmax.f32 %v1431_v8, 0.0 }
 0x4f0   :  { %v1472_v21 = vmax.f32 %v1442_v13, 0.0 }
 0x4f1   :  { %v1470_v25 = vmax.f32 %v1434_v45, 0.0 }
 0x4f2   :  { %v5384_v40 = vpack.c.bf16 %v1472_v21, %v1471_v18  ;;  %v5401_v21 = vmax.bf16 %v6173_v41, %v4951_v39  ;;  %v5413_v39 = vmax.bf16 %v6173_v41, %v4959_v49  ;;  %v5425_v49 = vmax.bf16 %v6173_v41, %v4967_v59 }
 0x4f3   :  { %v5386_v44 = vpack.c.bf16 %v1470_v25, %v1469_v50  ;;  %v5407_v50 = vmax.bf16 %v6173_v41, %v4949_v38  ;;  %v4625_v25 = vld [vmem:[#allocation2 + $0x10] sm:$0xff]   ;;  %v5419_v38 = vmax.bf16 %v6173_v41, %v4956_v48  ;;  %v5431_v48 = vmax.bf16 %v6173_v41, %v4964_v58 }
 0x4f4   :  { %v5437_v59 = vmax.bf16 %v6173_v41, %v4975_v5  ;;  %v5443_v58 = vmax.bf16 %v6173_v41, %v4972_v4  ;;  %v4632_v5 = vld [vmem:[#allocation2 + $0x48] sm:$0xff]   ;;  %v4578_v4 = vld [vmem:[#allocation5 + $0x10] sm:$0xff]  }
 0x4f5   :  { %4177 = vmatprep.subr.bf16.mxu1 %v5386_v44 }
 0x4f6   :  { %4178 = vmatpush3.bf16.msra.mxu1 %v5386_v44  ;;  %6174 = vst [vmem:[#allocation34_spill] sm:$0xff] %v5443_v58 }
 0x4f7   :  { %4179 = vmatprep.subr.bf16.mxu1 %v5384_v40 }
 0x4fa   :  { %4180 = vmatpush3.bf16.msra.mxu1 %v5384_v40 }
 0x4fb   :  { %v4167_v55 = vpop.f32.mrb[68].mxu0 }
 0x4fc   :  { %v1455_v63 = vadd.f32 %v4167_v55, %v3639_v60  ;;  %v1446_v16 = vpop.f32.mrb[69].mxu0  ;;  %v4626_v55 = vld [vmem:[#allocation2 + $0x18] sm:$0xff]  }
 0x4fd   :  { %v1447_v31 = vadd.f32 %v3639_v60, %v1446_v16  ;;  %v4168_v11 = vpop.f32.mrb[70].mxu0  ;;  %v4628_v16 = vld [vmem:[#allocation2 + $0x28] sm:$0xff]  }
 0x4fe   :  { %v1458_v37 = vadd.f32 %v4168_v11, %v3639_v60  ;;  %v1449_v46 = vpop.f32.mrb[71].mxu0  ;;  %v1475_v8 = vmax.f32 %v1455_v63, 0.0  ;;  %v4627_v63 = vld [vmem:[#allocation2 + $0x20] sm:$0xff]   ;;  %v4630_v11 = vld [vmem:[#allocation2 + $0x38] sm:$0xff]  }
 0x4ff   :  { %v1450_v43 = vadd.f32 %v3639_v60, %v1449_v46  ;;  %v1473_v13 = vmax.f32 %v1447_v31, 0.0  ;;  %v4624_v60 = vld [vmem:[#allocation2 + $0x8] sm:$0xff]   ;;  %v4629_v31 = vld [vmem:[#allocation2 + $0x30] sm:$0xff]  }
 0x500   :  { %v1476_v29 = vmax.f32 %v1458_v37, 0.0  ;;  %v4631_v37 = vld [vmem:[#allocation2 + $0x40] sm:$0xff]   ;;  %v4633_v46 = vld [vmem:[#allocation2 + $0x50] sm:$0xff]  }
 0x501   :  { %v1474_v17 = vmax.f32 %v1450_v43, 0.0  ;;  %v4634_v43 = vld [vmem:[#allocation2 + $0x58] sm:$0xff]  }
 0x502   :  { %v5392_v45 = vpack.c.bf16 %v1476_v29, %v1475_v8  ;;  %v4576_v8 = vld [vmem:[#allocation5] sm:$0xff]   ;;  %v4577_v29 = vld [vmem:[#allocation5 + $0x8] sm:$0xff]  }
 0x503   :  { %v5394_v18 = vpack.c.bf16 %v1474_v17, %v1473_v13  ;;  %v4579_v13 = vld [vmem:[#allocation5 + $0x18] sm:$0xff]   ;;  %v4580_v17 = vld [vmem:[#allocation5 + $0x20] sm:$0xff]  }
 0x505   :  { %4181 = vmatprep.subr.bf16.mxu1 %v5394_v18 }
 0x506   :  { %4182 = vmatpush3.bf16.msra.mxu1 %v5394_v18 }
 0x507   :  { %4183 = vmatprep.subr.bf16.mxu1 %v5392_v45 }
 0x50a   :  { %4184 = vmatpush3.bf16.msra.mxu1 %v5392_v45 }
 0x50b   :  { %4209 = vmatprep.subr.bf16.mxu1 %v5401_v21 }
 0x50d   :  { %4186 = vmatmul.mubr.bf16.vlgmr.msra.gmra.mrb[56].mxu1 %v4624_v60  ;;  %v4581_v60 = vld [vmem:[#allocation5 + $0x28] sm:$0xff]  }
 0x50e   :  { %4210 = vmatpush3.bf16.msra.mxu1 %v5401_v21  ;;  %4189 = vmatprep.mubr.bf16.mxu1 %v4625_v25  ;;  %v4582_v25 = vld [vmem:[#allocation5 + $0x30] sm:$0xff]  }
 0x50f   :  { %4211 = vmatprep.subr.bf16.mxu1 %v5407_v50 }
 0x512   :  { %4212 = vmatpush3.bf16.msra.mxu1 %v5407_v50 }
 0x513   :  { %4213 = vmatprep.subr.bf16.mxu1 %v5413_v39 }
 0x515   :  { %4190 = vmatmul.mubr.bf16.gmra.mrb[60].mxu1 %v4626_v55  ;;  %v4583_v55 = vld [vmem:[#allocation5 + $0x38] sm:$0xff]  }
 0x516   :  { %4214 = vmatpush3.bf16.msra.mxu1 %v5413_v39  ;;  %4193 = vmatprep.mubr.bf16.mxu1 %v4627_v63  ;;  %v4584_v63 = vld [vmem:[%s6113_s11 + $0x40] sm:$0xff]  }
 0x517   :  { %4215 = vmatprep.subr.bf16.mxu1 %v5419_v38 }
 0x51a   :  { %4216 = vmatpush3.bf16.msra.mxu1 %v5419_v38 }
 0x51b   :  { %4217 = vmatprep.subr.bf16.mxu1 %v5425_v49 }
 0x51d   :  { %4194 = vmatmul.mubr.bf16.gmra.mrb[64].mxu1 %v4628_v16  ;;  %v4585_v16 = vld [vmem:[%s6113_s11 + $0x48] sm:$0xff]  }
 0x51e   :  { %4218 = vmatpush3.bf16.msra.mxu1 %v5425_v49  ;;  %4197 = vmatprep.mubr.bf16.mxu1 %v4629_v31  ;;  %v4586_v31 = vld [vmem:[%s6113_s11 + $0x50] sm:$0xff]  }
 0x51f   :  { %4219 = vmatprep.subr.bf16.mxu1 %v5431_v48 }
 0x522   :  { %4220 = vmatpush3.bf16.msra.mxu1 %v5431_v48 }
 0x523   :  { %4221 = vmatprep.subr.bf16.mxu1 %v5437_v59 }
 0x525   :  { %4198 = vmatmul.mubr.bf16.gmra.mrb[68].mxu1 %v4630_v11  ;;  %v4587_v11 = vld [vmem:[%s6113_s11 + $0x58] sm:$0xff]  }
 0x526   :  { %4222 = vmatpush3.bf16.msra.mxu1 %v5437_v59  ;;  %4201 = vmatprep.mubr.bf16.mxu1 %v4631_v37 }
 0x527   :  { %4223 = vmatprep.subr.bf16.mxu1 %v5443_v58 }
 0x52a   :  { %4224 = vmatpush3.bf16.msra.mxu1 %v5443_v58 }
 0x52b   :  { %4241 = vmatprep.subr.bf16.mxu1 %v4584_v63 }
 0x52d   :  { %4202 = vmatmul.mubr.bf16.gmra.mrb[72].mxu1 %v4632_v5 }
 0x52e   :  { %4205 = vmatprep.mubr.bf16.mxu1 %v4633_v46 }
 0x535   :  { %4206 = vmatmul.mubr.bf16.gmra.mrb[76].mxu1 %v4634_v43 }
 0x536   :  { %4225 = vmatprep.mubr.bf16.mxu1 %v4576_v8 }
 0x53d   :  { %4226 = vmatmul.mubr.bf16.vlgmr.msra.gmra.mrb[80].mxu1 %v4577_v29 }
 0x53e   :  { %4229 = vmatprep.mubr.bf16.mxu1 %v4578_v4  ;;  %4242 = vmatpush3.bf16.msra.mxu1 %v4584_v63 }
 0x53f   :  { %4243 = vmatprep.subr.bf16.mxu1 %v4585_v16 }
 0x542   :  { %4244 = vmatpush3.bf16.msra.mxu1 %v4585_v16 }
 0x543   :  { %4245 = vmatprep.subr.bf16.mxu1 %v4586_v31 }
 0x545   :  { %4230 = vmatmul.mubr.bf16.gmra.mrb[84].mxu1 %v4579_v13 }
 0x546   :  { %4233 = vmatprep.mubr.bf16.mxu1 %v4580_v17  ;;  %4246 = vmatpush3.bf16.msra.mxu1 %v4586_v31 }
 0x547   :  { %4247 = vmatprep.subr.bf16.mxu1 %v4587_v11 }
 0x54a   :  { %4248 = vmatpush3.bf16.msra.mxu1 %v4587_v11 }
 0x54d   :  { %4234 = vmatmul.mubr.bf16.gmra.mrb[88].mxu1 %v4581_v60 }
 0x54e   :  { %4237 = vmatprep.mubr.bf16.mxu1 %v4582_v25 }
 0x555   :  { %4238 = vmatmul.mubr.bf16.gmra.mrb[92].mxu1 %v4583_v55 }
 0x5e0   :  { %v4187_v37 = vpop.f32.mrb[56].mxu1 }
 0x5e1   :  { %v1566_v5 = vadd.f32 %v4187_v37, %v5038_v53  ;;  %v1557_v46 = vpop.f32.mrb[57].mxu1 }
 0x5e2   :  { %v1558_v43 = vadd.f32 %v1557_v46, %v5041_v54  ;;  %v4188_v8 = vpop.f32.mrb[58].mxu1 }
 0x5e3   :  { %v1569_v29 = vadd.f32 %v4188_v8, %v5044_v56  ;;  %v1560_v4 = vpop.f32.mrb[59].mxu1  ;;  %v1654_v17 = vmax.f32 %v1566_v5, 0.0 }
 0x5e4   :  { %v1561_v13 = vadd.f32 %v1560_v4, %v5048_v61  ;;  %v1652_v25 = vmax.f32 %v1558_v43, 0.0 }
 0x5e5   :  { %v1655_v60 = vmax.f32 %v1569_v29, 0.0 }
 0x5e6   :  { %v1653_v55 = vmax.f32 %v1561_v13, 0.0 }
 0x5e7   :  { %v1677_v63 = vpack.c.bf16 %v1655_v60, %v1654_v17 }
 0x5e8   :  { %v1676_v16 = vpack.c.bf16 %v1653_v55, %v1652_v25  ;;  %v4191_v31 = vpop.f32.mrb[60].mxu1 }
 0x5e9   :  { %v1582_v11 = vadd.f32 %v4191_v31, %v5054_v7  ;;  %v1573_v58 = vpop.f32.mrb[61].mxu1 }
 0x5ea   :  { %v1574_v37 = vadd.f32 %v1573_v58, %v5057_v10  ;;  %v4192_v53 = vpop.f32.mrb[62].mxu1  ;;  %1689 = vmatpush1.bf16.msra.mxu0 %v1676_v16 }
 0x5eb   :  { %v1585_v46 = vadd.f32 %v4192_v53, %v5060_v14  ;;  %v1576_v8 = vpop.f32.mrb[63].mxu1  ;;  %1690 = vmatprep.subr.bf16.mxu0 %v6173_v41  ;;  %v1658_v29 = vmax.f32 %v1582_v11, 0.0 }
 0x5ec   :  { %v1577_v5 = vadd.f32 %v1576_v8, %v5064_v19  ;;  %v1656_v4 = vmax.f32 %v1574_v37, 0.0 }
 0x5ed   :  { %v1659_v43 = vmax.f32 %v1585_v46, 0.0 }
 0x5ee   :  { %v1657_v13 = vmax.f32 %v1577_v5, 0.0  ;;  %1691 = vmatpush1.bf16.msra.mxu0 %v1677_v63 }
 0x5ef   :  { %v1679_v17 = vpack.c.bf16 %v1659_v43, %v1658_v29  ;;  %1692 = vmatprep.subr.bf16.mxu0 %v6173_v41 }
 0x5f0   :  { %v1678_v60 = vpack.c.bf16 %v1657_v13, %v1656_v4  ;;  %v4195_v25 = vpop.f32.mrb[64].mxu1 }
 0x5f1   :  { %v1598_v58 = vadd.f32 %v4195_v25, %v5072_v47  ;;  %v1589_v55 = vpop.f32.mrb[65].mxu1 }
 0x5f2   :  { %v1590_v53 = vadd.f32 %v1589_v55, %v5076_v51  ;;  %v4196_v16 = vpop.f32.mrb[66].mxu1  ;;  %1693 = vmatpush1.bf16.msra.mxu0 %v1678_v60 }
 0x5f3   :  { %v1601_v31 = vadd.f32 %v4196_v16, %v5081_v62  ;;  %v1592_v8 = vpop.f32.mrb[67].mxu1  ;;  %1694 = vmatprep.subr.bf16.mxu0 %v6173_v41  ;;  %v1662_v63 = vmax.f32 %v1598_v58, 0.0 }
 0x5f4   :  { %v1593_v11 = vadd.f32 %v1592_v8, %v5086_v0  ;;  %v1660_v46 = vmax.f32 %v1590_v53, 0.0 }
 0x5f5   :  { %v1663_v37 = vmax.f32 %v1601_v31, 0.0 }
 0x5f6   :  { %v1661_v5 = vmax.f32 %v1593_v11, 0.0  ;;  %1695 = vmatpush1.bf16.msra.mxu0 %v1679_v17 }
 0x5f7   :  { %v1681_v29 = vpack.c.bf16 %v1663_v37, %v1662_v63  ;;  %1696 = vmatprep.subr.bf16.mxu0 %v6173_v41 }
 0x5f8   :  { %v1680_v43 = vpack.c.bf16 %v1661_v5, %v1660_v46  ;;  %v4199_v4 = vpop.f32.mrb[68].mxu1 }
 0x5f9   :  { %v1614_v13 = vadd.f32 %v4199_v4, %v5094_v9  ;;  %v1605_v60 = vpop.f32.mrb[69].mxu1 }
 0x5fa   :  { %v1606_v25 = vadd.f32 %v1605_v60, %v5098_v12  ;;  %v4200_v55 = vpop.f32.mrb[70].mxu1  ;;  %1697 = vmatpush1.bf16.msra.mxu0 %v1680_v43 }
 0x5fb   :  { %v1617_v16 = vadd.f32 %v4200_v55, %v5103_v20  ;;  %v1608_v8 = vpop.f32.mrb[71].mxu1  ;;  %1698 = vmatprep.subr.bf16.mxu0 %v6173_v41  ;;  %v1666_v17 = vmax.f32 %v1614_v13, 0.0  ;;  %v1489_v20 = vunpack.c.l.bf16 %v5368_v33 }
 0x5fc   :  { %v1609_v58 = vadd.f32 %v1608_v8, %v5108_v22  ;;  %v1664_v31 = vmax.f32 %v1606_v25, 0.0 }
 0x5fd   :  { %v1667_v53 = vmax.f32 %v1617_v16, 0.0 }
 0x5fe   :  { %v1665_v11 = vmax.f32 %v1609_v58, 0.0  ;;  %1699 = vmatpush1.bf16.msra.mxu0 %v1681_v29 }
 0x5ff   :  { %v1683_v63 = vpack.c.bf16 %v1667_v53, %v1666_v17  ;;  %1700 = vmatprep.subr.bf16.mxu0 %v6173_v41 }
 0x600   :  { %v1682_v37 = vpack.c.bf16 %v1665_v11, %v1664_v31  ;;  %v4203_v46 = vpop.f32.mrb[72].mxu1 }
 0x601   :  { %v1630_v5 = vadd.f32 %v4203_v46, %v5116_v26  ;;  %v1621_v43 = vpop.f32.mrb[73].mxu1 }
 0x602   :  { %v1622_v4 = vadd.f32 %v1621_v43, %v5120_v57  ;;  %v4204_v60 = vpop.f32.mrb[74].mxu1  ;;  %1701 = vmatpush1.bf16.msra.mxu0 %v1682_v37 }
 0x603   :  { %v1633_v55 = vadd.f32 %v4204_v60, %v5125_v28  ;;  %v1624_v8 = vpop.f32.mrb[75].mxu1  ;;  %1702 = vmatprep.subr.bf16.mxu0 %v6173_v41  ;;  %v1670_v29 = vmax.f32 %v1630_v5, 0.0 }
 0x604   :  { %v1625_v13 = vadd.f32 %v1624_v8, %v5130_v2  ;;  %v1668_v16 = vmax.f32 %v1622_v4, 0.0 }
 0x605   :  { %v1671_v25 = vmax.f32 %v1633_v55, 0.0 }
 0x606   :  { %v1669_v58 = vmax.f32 %v1625_v13, 0.0  ;;  %1703 = vmatpush1.bf16.msra.mxu0 %v1683_v63 }
 0x607   :  { %v1685_v17 = vpack.c.bf16 %v1671_v25, %v1670_v29  ;;  %1704 = vmatprep.subr.bf16.mxu0 %v6173_v41 }
 0x608   :  { %v1684_v53 = vpack.c.bf16 %v1669_v58, %v1668_v16  ;;  %v4207_v31 = vpop.f32.mrb[76].mxu1  ;;  %v6175_v16 = vld [vmem:[#allocation23_spill] sm:$0xff]  ;;  %v6176_v58 = vld [vmem:[#allocation24_spill] sm:$0xff] }
 0x609   :  { %v1646_v11 = vadd.f32 %v4207_v31, %v5138_v30  ;;  %v1637_v37 = vpop.f32.mrb[77].mxu1 }
 0x60a   :  { %v1638_v46 = vadd.f32 %v1637_v37, %v5142_v15  ;;  %v4208_v43 = vpop.f32.mrb[78].mxu1  ;;  %1705 = vmatpush1.bf16.msra.mxu0 %v1684_v53  ;;  %v4589_v37 = vld [vmem:[%s6113_s11 + $0x68] sm:$0xff]  }
 0x60b   :  { %v1649_v60 = vadd.f32 %v4208_v43, %v5147_v32  ;;  %v1640_v8 = vpop.f32.mrb[79].mxu1  ;;  %1706 = vmatprep.subr.bf16.mxu0 %v6173_v41  ;;  %v1674_v63 = vmax.f32 %v1646_v11, 0.0  ;;  %v4591_v43 = vld [vmem:[%s6113_s11 + $0x78] sm:$0xff]  }
 0x60c   :  { %v1641_v5 = vadd.f32 %v1640_v8, %v5152_v24  ;;  %v1672_v55 = vmax.f32 %v1638_v46, 0.0  ;;  %v4590_v46 = vld [vmem:[%s6113_s11 + $0x70] sm:$0xff]  }
 0x60d   :  { %v1675_v4 = vmax.f32 %v1649_v60, 0.0 }
 0x60e   :  { %v1673_v13 = vmax.f32 %v1641_v5, 0.0  ;;  %1707 = vmatpush1.bf16.msra.mxu0 %v1685_v17  ;;  %v4588_v17 = vld [vmem:[%s6113_s11 + $0x60] sm:$0xff]  }
 0x60f   :  { %v1687_v29 = vpack.c.bf16 %v1675_v4, %v1674_v63  ;;  %1708 = vmatprep.subr.bf16.mxu0 %v6173_v41  ;;  %4249 = vmatprep.subr.bf16.mxu1 %v4588_v17 }
 0x610   :  { %v1686_v25 = vpack.c.bf16 %v1673_v13, %v1672_v55  ;;  %4250 = vmatpush3.bf16.msra.mxu1 %v4588_v17  ;;  %v4597_v17 = vld [vmem:[%s6115_s13 + $0x68] sm:$0xff]  }
 0x611   :  { %4251 = vmatprep.subr.bf16.mxu1 %v4589_v37 }
 0x612   :  { %1709 = vmatpush1.bf16.msra.mxu0 %v1686_v25 }
 0x613   :  { %1710 = vmatprep.subr.bf16.mxu0 %v6173_v41 }
 0x614   :  { %4252 = vmatpush3.bf16.msra.mxu1 %v4589_v37  ;;  %v6183_v37 = vld [vmem:[#allocation31_spill] sm:$0xff] }
 0x615   :  { %4253 = vmatprep.subr.bf16.mxu1 %v4590_v46 }
 0x616   :  { %1711 = vmatpush1.bf16.msra.mxu0 %v1687_v29 }
 0x618   :  { %4254 = vmatpush3.bf16.msra.mxu1 %v4590_v46  ;;  %v6146_v46 = vsub.s32 2, %v6183_v37 }
 0x619   :  { %1721 = vmatmul.mubr.bf16.vlgmr.msra.gmra.mrb[72].mxu0 %v5163_v52  ;;  %v6177_v52 = vld [vmem:[#allocation25_spill] sm:$0xff]  ;;  %4255 = vmatprep.subr.bf16.mxu1 %v4591_v43 }
 0x61a   :  { %3650 = vmatprep.mubr.msk.bf16.mxu0 %vm935_vm5, %v5168_v27  ;;  %v6178_v27 = vld [vmem:[#allocation26_spill] sm:$0xff] }
 0x61c   :  { %4256 = vmatpush3.bf16.msra.mxu1 %v4591_v43  ;;  %v3648_v43 = vld [vmem:[%s6112_s10 + $0x8] sm:$0x1f] }
 0x61d   :  { %v5588_v32 = vrot.slane %v3648_v43, %v6146_v46 }
 0x621   :  { %1729 = vmatmul.mubr.bf16.gmra.mrb[76].mxu0 %v5176_v1  ;;  %v6179_v1 = vld [vmem:[#allocation27_spill] sm:$0xff] }
 0x622   :  { %3651 = vmatprep.mubr.msk.bf16.mxu0 %vm935_vm5, %v5181_v35  ;;  %v6180_v35 = vld [vmem:[#allocation28_spill] sm:$0xff] }
 0x629   :  { %1737 = vmatmul.mubr.bf16.gmra.mrb[80].mxu0 %v5189_v36  ;;  %v6181_v36 = vld [vmem:[#allocation29_spill] sm:$0xff] }
 0x62a   :  { %3652 = vmatprep.mubr.msk.bf16.mxu0 %vm935_vm5, %v5194_v3  ;;  %v6182_v3 = vld [vmem:[#allocation30_spill] sm:$0xff] }
 0x631   :  { %1745 = vmatmul.mubr.bf16.gmra.mrb[84].mxu0 %v5202_v6  ;;  %v5517_v6 = vpop.f32.mrb[80].mxu1 }
 0x632   :  { %3653 = vmatprep.mubr.msk.bf16.mxu0 %vm935_vm5, %v6175_v16  ;;  %v1927_v53 = vpop.f32.mrb[81].mxu1 }
 0x633   :  { %v5522_v31 = vpop.f32.mrb[82].mxu1  ;;  %v1994_v28 = vmul.f32 %v5588_v32, %v1927_v53 }
 0x634   :  { %v1930_v11 = vpop.f32.mrb[83].mxu1 }
 0x635   :  { %v5533_v60 = vpop.f32.mrb[84].mxu1 }
 0x636   :  { %v5535_v8 = vpop.f32.mrb[85].mxu1 }
 0x637   :  { %v5537_v5 = vpop.f32.mrb[86].mxu1 }
 0x638   :  { %v5539_v63 = vpop.f32.mrb[87].mxu1 }
 0x639   :  { %1753 = vmatmul.mubr.bf16.gmra.mrb[88].mxu0 %v6176_v58  ;;  %v5541_v4 = vpop.f32.mrb[88].mxu1 }
 0x63a   :  { %3654 = vmatprep.mubr.msk.bf16.mxu0 %vm935_vm5, %v6177_v52  ;;  %v5543_v55 = vpop.f32.mrb[89].mxu1 }
 0x63b   :  { %v5545_v13 = vpop.f32.mrb[90].mxu1 }
 0x63c   :  { %v5547_v29 = vpop.f32.mrb[91].mxu1 }
 0x63d   :  { %v5549_v25 = vpop.f32.mrb[92].mxu1 }
 0x63e   :  { %v5551_v16 = vpop.f32.mrb[93].mxu1 }
 0x63f   :  { %v5553_v58 = vpop.f32.mrb[94].mxu1 }
 0x640   :  { %v5555_v52 = vpop.f32.mrb[95].mxu1 }
 0x641   :  { %1761 = vmatmul.mubr.bf16.gmra.mrb[92].mxu0 %v6178_v27  ;;  %v4592_v27 = vld [vmem:[%s6115_s13 + $0x40] sm:$0xff]  }
 0x642   :  { %3655 = vmatprep.mubr.msk.bf16.mxu0 %vm935_vm5, %v6179_v1  ;;  %v4593_v1 = vld [vmem:[%s6115_s13 + $0x48] sm:$0xff]   ;;  %4273 = vmatprep.subr.bf16.mxu0 %v4592_v27 }
 0x643   :  { %4274 = vmatpush3.bf16.msra.mxu0 %v4592_v27  ;;  %v1487_v27 = vunpack.c.l.bf16 %v5370_v34 }
 0x644   :  { %4275 = vmatprep.subr.bf16.mxu0 %v4593_v1 }
 0x647   :  { %4276 = vmatpush3.bf16.msra.mxu0 %v4593_v1  ;;  %v6184_v1 = vld [vmem:[#allocation32_spill] sm:$0xff] }
 0x649   :  { %1769 = vmatmul.mubr.bf16.gmra.mrb[96].mxu0 %v6180_v35  ;;  %v4594_v35 = vld [vmem:[%s6115_s13 + $0x50] sm:$0xff]  }
 0x64a   :  { %3656 = vmatprep.mubr.msk.bf16.mxu0 %vm935_vm5, %v6181_v36  ;;  %4277 = vmatprep.subr.bf16.mxu0 %v4594_v35  ;;  %v4595_v36 = vld [vmem:[%s6115_s13 + $0x58] sm:$0xff]  }
 0x64b   :  { %4278 = vmatpush3.bf16.msra.mxu0 %v4594_v35  ;;  %v5581_v35 = vrot.slane %v3648_v43, %v6184_v1 }
 0x64c   :  { %4279 = vmatprep.subr.bf16.mxu0 %v4595_v36 }
 0x64d   :  { %v1507_v15 = vmul.f32 %v5581_v35, %v1487_v27  ;;  %v1490_v27 = vunpack.c.h.bf16 %v5368_v33 }
 0x64f   :  { %4280 = vmatpush3.bf16.msra.mxu0 %v4595_v36  ;;  %v6185_v36 = vld [vmem:[#allocation33_spill] sm:$0xff] }
 0x650   :  { %v5584_v24 = vrot.slane %v3648_v43, %v6185_v36  ;;  %v1995_v43 = vmul.f32 %v5588_v32, %v1930_v11  ;;  %v1510_v11 = vmul.f32 %v5581_v35, %v1490_v27  ;;  %v1998_v27 = vmul.f32 %v5588_v32, %v5535_v8 }
 0x651   :  { %1777 = vmatmul.mubr.bf16.gmra.mrb[100].mxu0 %v6182_v3  ;;  %v4596_v3 = vld [vmem:[%s6115_s13 + $0x60] sm:$0xff]   ;;  %v2000_v8 = vmul.f32 %v5533_v60, %v5588_v32  ;;  %v1495_v60 = vunpack.c.l.bf16 %v5386_v44 }
 0x652   :  { %4281 = vmatprep.subr.bf16.mxu0 %v4596_v3 }
 0x653   :  { %4282 = vmatpush3.bf16.msra.mxu0 %v4596_v3  ;;  %v1488_v3 = vunpack.c.h.bf16 %v5370_v34 }
 0x654   :  { %4283 = vmatprep.subr.bf16.mxu0 %v4597_v17 }
 0x655   :  { %v1508_v26 = vmul.f32 %v5581_v35, %v1488_v3 }
 0x657   :  { %4284 = vmatpush3.bf16.msra.mxu0 %v4597_v17 }
 0x6ec   :  { %v1722_v17 = vpop.f32.mrb[72].mxu0 }
 0x6ed   :  { %v1789_v30 = vmul.f32 %v5584_v24, %v1722_v17  ;;  %v1724_v2 = vpop.f32.mrb[73].mxu0 }
 0x6ee   :  { %v1725_v57 = vpop.f32.mrb[74].mxu0  ;;  %v1996_v2 = vmul.f32 %v5517_v6, %v5588_v32  ;;  %v1491_v6 = vunpack.c.l.bf16 %v5378_v42 }
 0x6ef   :  { %v1805_v1 = vadd.f32 %v1789_v30, %v1507_v15  ;;  %v1790_v36 = vmul.f32 %v5584_v24, %v1725_v57  ;;  %v1727_v22 = vpop.f32.mrb[75].mxu0  ;;  %v1509_v30 = vmul.f32 %v5581_v35, %v1489_v20 }
 0x6f1   :  { %v1806_v46 = vadd.f32 %v1790_v36, %v1508_v26  ;;  %v2010_v37 = vadd.f32 %v1994_v28, %v1805_v1  ;;  %v1997_v26 = vmul.f32 %v5522_v31, %v5588_v32 }
 0x6f3   :  { %v2011_v12 = vadd.f32 %v1995_v43, %v1806_v46  ;;  %v1492_v43 = vunpack.c.h.bf16 %v5378_v42 }
 0x6f4   :  { %v1730_v17 = vpop.f32.mrb[76].mxu0 }
 0x6f5   :  { %v1791_v15 = vmul.f32 %v5584_v24, %v1730_v17  ;;  %v1732_v53 = vpop.f32.mrb[77].mxu0  ;;  %v2026_v57 = vpack.c.bf16 %v2011_v12, %v2010_v37  ;;  %v1511_v37 = vmul.f32 %v5581_v35, %v1491_v6 }
 0x6f6   :  { %v1733_v22 = vpop.f32.mrb[78].mxu0 }
 0x6f7   :  { %v1807_v28 = vadd.f32 %v1791_v15, %v1509_v30  ;;  %v1792_v46 = vmul.f32 %v5584_v24, %v1733_v22  ;;  %v1735_v1 = vpop.f32.mrb[79].mxu0  ;;  %4257 = vmatprep.mubr.bf16.mxu1 %v2026_v57 }
 0x6f9   :  { %v2012_v36 = vadd.f32 %v1996_v2, %v1807_v28  ;;  %v1808_v3 = vadd.f32 %v1792_v46, %v1510_v11  ;;  %v1512_v2 = vmul.f32 %v5581_v35, %v1492_v43  ;;  %v1493_v46 = vunpack.c.l.bf16 %v5376_v23 }
 0x6fb   :  { %v2013_v20 = vadd.f32 %v1997_v26, %v1808_v3  ;;  %v1999_v26 = vmul.f32 %v5588_v32, %v5539_v63  ;;  %v1513_v6 = vmul.f32 %v5581_v35, %v1493_v46  ;;  %v2001_v63 = vmul.f32 %v5537_v5, %v5588_v32 }
 0x6fc   :  { %v1738_v17 = vpop.f32.mrb[80].mxu0 }
 0x6fd   :  { %v2027_v12 = vpack.c.bf16 %v2013_v20, %v2012_v36  ;;  %v1793_v31 = vmul.f32 %v5584_v24, %v1738_v17  ;;  %v1740_v30 = vpop.f32.mrb[81].mxu0  ;;  %v1494_v36 = vunpack.c.h.bf16 %v5376_v23 }
 0x6fe   :  { %v1741_v15 = vpop.f32.mrb[82].mxu0 }
 0x6ff   :  { %v1809_v53 = vadd.f32 %v1793_v31, %v1511_v37  ;;  %v1794_v57 = vmul.f32 %v5584_v24, %v1741_v15  ;;  %v1743_v22 = vpop.f32.mrb[83].mxu0  ;;  %4258 = vmatmul.mubr.bf16.vlgmr.msra.gmra.mrb[96].mxu1 %v2027_v12  ;;  %v1514_v31 = vmul.f32 %v5581_v35, %v1494_v36 }
 0x701   :  { %v1810_v28 = vadd.f32 %v1794_v57, %v1512_v2  ;;  %v2014_v11 = vadd.f32 %v1998_v27, %v1809_v53  ;;  %v1496_v57 = vunpack.c.h.bf16 %v5386_v44 }
 0x703   :  { %v2015_v1 = vadd.f32 %v1999_v26, %v1810_v28  ;;  %v1515_v26 = vmul.f32 %v5581_v35, %v1495_v60 }
 0x704   :  { %v1746_v3 = vpop.f32.mrb[84].mxu0 }
 0x705   :  { %v1795_v20 = vmul.f32 %v5584_v24, %v1746_v3  ;;  %v1748_v43 = vpop.f32.mrb[85].mxu0  ;;  %v2028_v17 = vpack.c.bf16 %v2015_v1, %v2014_v11  ;;  %v2002_v11 = vmul.f32 %v5588_v32, %v5543_v55  ;;  %v1516_v3 = vmul.f32 %v5581_v35, %v1496_v57 }
 0x706   :  { %v1749_v12 = vpop.f32.mrb[86].mxu0 }
 0x707   :  { %v1811_v37 = vadd.f32 %v1795_v20, %v1513_v6  ;;  %v1796_v30 = vmul.f32 %v5584_v24, %v1749_v12  ;;  %v1751_v27 = vpop.f32.mrb[87].mxu0  ;;  %4261 = vmatprep.mubr.bf16.mxu1 %v2028_v17  ;;  %v2003_v20 = vmul.f32 %v5588_v32, %v5547_v29  ;;  %v1497_v12 = vunpack.c.l.bf16 %v5384_v40 }
 0x708   :  { %v2005_v29 = vmul.f32 %v5545_v13, %v5588_v32 }
 0x709   :  { %v2016_v15 = vadd.f32 %v2000_v8, %v1811_v37  ;;  %v1812_v53 = vadd.f32 %v1796_v30, %v1514_v31  ;;  %v1498_v37 = vunpack.c.h.bf16 %v5384_v40  ;;  %v2004_v31 = vmul.f32 %v5541_v4, %v5588_v32 }
 0x70a   :  { %v1517_v30 = vmul.f32 %v5581_v35, %v1497_v12  ;;  %v1499_v4 = vunpack.c.l.bf16 %v5394_v18 }
 0x70b   :  { %v2017_v2 = vadd.f32 %v2001_v63, %v1812_v53  ;;  %v1518_v57 = vmul.f32 %v5581_v35, %v1498_v37  ;;  %v2007_v37 = vmul.f32 %v5588_v32, %v5555_v52 }
 0x70c   :  { %v1754_v22 = vpop.f32.mrb[88].mxu0 }
 0x70d   :  { %v1797_v28 = vmul.f32 %v5584_v24, %v1754_v22  ;;  %v1756_v5 = vpop.f32.mrb[89].mxu0  ;;  %v2029_v46 = vpack.c.bf16 %v2017_v2, %v2016_v15 }
 0x70e   :  { %v1757_v1 = vpop.f32.mrb[90].mxu0 }
 0x70f   :  { %v1813_v36 = vadd.f32 %v1797_v28, %v1515_v26  ;;  %v1798_v8 = vmul.f32 %v5584_v24, %v1757_v1  ;;  %v1759_v6 = vpop.f32.mrb[91].mxu0  ;;  %4262 = vmatmul.mubr.bf16.gmra.mrb[100].mxu1 %v2029_v46  ;;  %v1500_v46 = vunpack.c.h.bf16 %v5394_v18 }
 0x711   :  { %v1814_v43 = vadd.f32 %v1798_v8, %v1516_v3  ;;  %v2018_v17 = vadd.f32 %v2002_v11, %v1813_v36  ;;  %v1519_v36 = vmul.f32 %v5581_v35, %v1499_v4  ;;  %v2006_v8 = vmul.f32 %v5588_v32, %v5551_v16 }
 0x712   :  { %v2009_v4 = vmul.f32 %v5553_v58, %v5588_v32 }
 0x713   :  { %v2019_v63 = vadd.f32 %v2003_v20, %v1814_v43 }
 0x714   :  { %v1762_v55 = vpop.f32.mrb[92].mxu0 }
 0x715   :  { %v1799_v27 = vmul.f32 %v5584_v24, %v1762_v55  ;;  %v1764_v15 = vpop.f32.mrb[93].mxu0  ;;  %v2030_v53 = vpack.c.bf16 %v2019_v63, %v2018_v17  ;;  %v1520_v17 = vmul.f32 %v5581_v35, %v1500_v46 }
 0x716   :  { %v1765_v60 = vpop.f32.mrb[94].mxu0  ;;  %v1502_v15 = vunpack.c.h.bf16 %v5392_v45 }
 0x717   :  { %v1815_v2 = vadd.f32 %v1799_v27, %v1517_v30  ;;  %v1800_v22 = vmul.f32 %v5584_v24, %v1765_v60  ;;  %v1767_v26 = vpop.f32.mrb[95].mxu0  ;;  %4265 = vmatprep.mubr.bf16.mxu1 %v2030_v53  ;;  %v1501_v30 = vunpack.c.l.bf16 %v5392_v45 }
 0x718   :  { %v1522_v52 = vmul.f32 %v5581_v35, %v1502_v15 }
 0x719   :  { %v2020_v28 = vadd.f32 %v2004_v31, %v1815_v2  ;;  %v1816_v5 = vadd.f32 %v1800_v22, %v1518_v57  ;;  %v1521_v53 = vmul.f32 %v5581_v35, %v1501_v30  ;;  %v2008_v22 = vmul.f32 %v5549_v25, %v5588_v32  ;;  %v4598_v25 = vld [vmem:[%s6115_s13 + $0x70] sm:$0xff]   ;;  %v3682_v32 = vld [vmem:[%s6114_s12 + $0x1] ss:$0 sm:$0xff] }
 0x71a   :  { %4285 = vmatprep.subr.bf16.mxu0 %v4598_v25 }
 0x71b   :  { %v2021_v11 = vadd.f32 %v2005_v29, %v1816_v5  ;;  %4286 = vmatpush3.bf16.msra.mxu0 %v4598_v25 }
 0x71c   :  { %v1770_v1 = vpop.f32.mrb[96].mxu0 }
 0x71d   :  { %v1801_v3 = vmul.f32 %v5584_v24, %v1770_v1  ;;  %v1772_v13 = vpop.f32.mrb[97].mxu0  ;;  %v2031_v6 = vpack.c.bf16 %v2021_v11, %v2020_v28 }
 0x71e   :  { %v1773_v20 = vpop.f32.mrb[98].mxu0 }
 0x71f   :  { %v1817_v43 = vadd.f32 %v1801_v3, %v1519_v36  ;;  %v1802_v12 = vmul.f32 %v5584_v24, %v1773_v20  ;;  %v1775_v63 = vpop.f32.mrb[99].mxu0  ;;  %4266 = vmatmul.mubr.bf16.gmra.mrb[104].mxu1 %v2031_v6  ;;  %v4635_v3 = vld [vmem:[#allocation2] sm:$0xff]  }
 0x721   :  { %v1818_v55 = vadd.f32 %v1802_v12, %v1520_v17  ;;  %v2022_v31 = vadd.f32 %v2006_v8, %v1817_v43 }
 0x723   :  { %v2023_v27 = vadd.f32 %v2007_v37, %v1818_v55 }
 0x724   :  { %v1778_v16 = vpop.f32.mrb[100].mxu0 }
 0x725   :  { %v1803_v60 = vmul.f32 %v5584_v24, %v1778_v16  ;;  %v1780_v29 = vpop.f32.mrb[101].mxu0  ;;  %v2032_v2 = vpack.c.bf16 %v2023_v27, %v2022_v31 }
 0x726   :  { %v1781_v57 = vpop.f32.mrb[102].mxu0 }
 0x727   :  { %v1819_v26 = vadd.f32 %v1803_v60, %v1521_v53  ;;  %v1804_v28 = vmul.f32 %v5584_v24, %v1781_v57  ;;  %v1783_v5 = vpop.f32.mrb[103].mxu0  ;;  %4269 = vmatprep.mubr.bf16.mxu1 %v2032_v2  ;;  %v4599_v24 = vld [vmem:[%s6115_s13 + $0x78] sm:$0xff]  }
 0x728   :  { %4287 = vmatprep.subr.bf16.mxu0 %v4599_v24 }
 0x729   :  { %v2024_v11 = vadd.f32 %v2008_v22, %v1819_v26  ;;  %v1820_v46 = vadd.f32 %v1804_v28, %v1522_v52  ;;  %4288 = vmatpush3.bf16.msra.mxu0 %v4599_v24 }
 0x72a   :  { %2625 = vmatprep.subr.bf16.mxu0 %v6173_v41 }
 0x72b   :  { %v2025_v1 = vadd.f32 %v2009_v4, %v1820_v46 }
 0x72d   :  { %v2033_v36 = vpack.c.bf16 %v2025_v1, %v2024_v11 }
 0x72f   :  { %4270 = vmatmul.mubr.bf16.gmra.mrb[108].mxu1 %v2033_v36 }
 0x730   :  { %4321 = vmatprep.mubr.bf16.mxu1 %v4635_v3 }
 0x7d2   :  { %v4259_v58 = vpop.f32.mrb[96].mxu1 }
 0x7d3   :  { %v2150_v35 = vadd.f32 %v4259_v58, %v3682_v32  ;;  %v2141_v13 = vpop.f32.mrb[97].mxu1 }
 0x7d4   :  { %v2142_v8 = vadd.f32 %v3682_v32, %v2141_v13  ;;  %v4260_v6 = vpop.f32.mrb[98].mxu1 }
 0x7d5   :  { %v2153_v20 = vadd.f32 %v4260_v6, %v3682_v32  ;;  %v2144_v43 = vpop.f32.mrb[99].mxu1  ;;  %v2206_v12 = vmax.f32 %v2150_v35, 0.0 }
 0x7d6   :  { %v2145_v17 = vadd.f32 %v3682_v32, %v2144_v43  ;;  %v2204_v37 = vmax.f32 %v2142_v8, 0.0 }
 0x7d7   :  { %v2207_v63 = vmax.f32 %v2153_v20, 0.0 }
 0x7d8   :  { %v2205_v55 = vmax.f32 %v2145_v17, 0.0 }
 0x7d9   :  { %v2221_v31 = vpack.c.bf16 %v2207_v63, %v2206_v12 }
 0x7da   :  { %v2220_v30 = vpack.c.bf16 %v2205_v55, %v2204_v37 }
 0x7dc   :  { %4289 = vmatprep.mubr.bf16.mxu0 %v2220_v30 }
 0x7dd   :  { %4290 = vmatmul.mubr.bf16.vlgmr.msra.gmra.mrb[104].mxu0 %v2221_v31 }
 0x7e2   :  { %v4263_v27 = vpop.f32.mrb[100].mxu1 }
 0x7e3   :  { %v2166_v15 = vadd.f32 %v4263_v27, %v3682_v32  ;;  %v2157_v16 = vpop.f32.mrb[101].mxu1 }
 0x7e4   :  { %v2158_v53 = vadd.f32 %v3682_v32, %v2157_v16  ;;  %v4264_v60 = vpop.f32.mrb[102].mxu1 }
 0x7e5   :  { %v2169_v29 = vadd.f32 %v4264_v60, %v3682_v32  ;;  %v2160_v2 = vpop.f32.mrb[103].mxu1  ;;  %v2210_v22 = vmax.f32 %v2166_v15, 0.0 }
 0x7e6   :  { %v2161_v57 = vadd.f32 %v3682_v32, %v2160_v2  ;;  %v2208_v52 = vmax.f32 %v2158_v53, 0.0 }
 0x7e7   :  { %v2211_v26 = vmax.f32 %v2169_v29, 0.0 }
 0x7e8   :  { %v2209_v28 = vmax.f32 %v2161_v57, 0.0  ;;  %v4636_v57 = vld [vmem:[%s6105_s3 + $0x4] ss:$8 sps:$4 sm:$0xff]  }
 0x7e9   :  { %v2223_v5 = vpack.c.bf16 %v2211_v26, %v2210_v22  ;;  %v3708_v22 = vld [vmem:[%s6116_s14 + $0x1] ss:$0 sm:$0xff] }
 0x7ea   :  { %v2222_v4 = vpack.c.bf16 %v2209_v28, %v2208_v52 }
 0x7ec   :  { %4293 = vmatprep.mubr.bf16.mxu0 %v2222_v4 }
 0x7ed   :  { %4294 = vmatmul.mubr.bf16.gmra.mrb[108].mxu0 %v2223_v5 }
 0x7f2   :  { %v4267_v11 = vpop.f32.mrb[104].mxu1 }
 0x7f3   :  { %v2182_v46 = vadd.f32 %v4267_v11, %v3682_v32  ;;  %v2173_v1 = vpop.f32.mrb[105].mxu1 }
 0x7f4   :  { %v2174_v36 = vadd.f32 %v3682_v32, %v2173_v1  ;;  %v4268_v3 = vpop.f32.mrb[106].mxu1 }
 0x7f5   :  { %v2185_v25 = vadd.f32 %v4268_v3, %v3682_v32  ;;  %v2176_v24 = vpop.f32.mrb[107].mxu1  ;;  %v2214_v35 = vmax.f32 %v2182_v46, 0.0 }
 0x7f6   :  { %v2177_v58 = vadd.f32 %v3682_v32, %v2176_v24  ;;  %v2212_v8 = vmax.f32 %v2174_v36, 0.0 }
 0x7f7   :  { %v2215_v13 = vmax.f32 %v2185_v25, 0.0 }
 0x7f8   :  { %v2213_v6 = vmax.f32 %v2177_v58, 0.0 }
 0x7f9   :  { %v2225_v20 = vpack.c.bf16 %v2215_v13, %v2214_v35 }
 0x7fa   :  { %v2224_v43 = vpack.c.bf16 %v2213_v6, %v2212_v8 }
 0x7fc   :  { %4297 = vmatprep.mubr.bf16.mxu0 %v2224_v43 }
 0x7fd   :  { %4298 = vmatmul.mubr.bf16.gmra.mrb[112].mxu0 %v2225_v20 }
 0x802   :  { %v4271_v17 = vpop.f32.mrb[108].mxu1 }
 0x803   :  { %v2198_v12 = vadd.f32 %v4271_v17, %v3682_v32  ;;  %v2189_v63 = vpop.f32.mrb[109].mxu1 }
 0x804   :  { %v2190_v37 = vadd.f32 %v3682_v32, %v2189_v63  ;;  %v4272_v55 = vpop.f32.mrb[110].mxu1 }
 0x805   :  { %v2201_v31 = vadd.f32 %v4272_v55, %v3682_v32  ;;  %v2192_v30 = vpop.f32.mrb[111].mxu1  ;;  %v2218_v15 = vmax.f32 %v2198_v12, 0.0 }
 0x806   :  { %v2193_v27 = vadd.f32 %v3682_v32, %v2192_v30  ;;  %v2216_v53 = vmax.f32 %v2190_v37, 0.0 }
 0x807   :  { %v2219_v16 = vmax.f32 %v2201_v31, 0.0 }
 0x808   :  { %v2217_v60 = vmax.f32 %v2193_v27, 0.0 }
 0x809   :  { %v2227_v29 = vpack.c.bf16 %v2219_v16, %v2218_v15 }
 0x80a   :  { %v2226_v2 = vpack.c.bf16 %v2217_v60, %v2216_v53 }
 0x80c   :  { %4301 = vmatprep.mubr.bf16.mxu0 %v2226_v2 }
 0x80d   :  { %4302 = vmatmul.mubr.bf16.gmra.mrb[116].mxu0 %v2227_v29 }
 0x80e   :  { %3718 = vmatprep.mubr.msk.bf16.mxu0 %vm935_vm5, %v4636_v57 }
 0x8b0   :  { %v4291_v26 = vpop.f32.mrb[104].mxu0 }
 0x8b1   :  { %v2344_v32 = vadd.f32 %v4291_v26, %v3708_v22  ;;  %v2335_v52 = vpop.f32.mrb[105].mxu0 }
 0x8b2   :  { %v2336_v28 = vadd.f32 %v3708_v22, %v2335_v52  ;;  %v4292_v5 = vpop.f32.mrb[106].mxu0 }
 0x8b3   :  { %v2347_v4 = vadd.f32 %v4292_v5, %v3708_v22  ;;  %v2338_v11 = vpop.f32.mrb[107].mxu0  ;;  %v2400_v1 = vmax.f32 %v2344_v32, 0.0 }
 0x8b4   :  { %v2339_v46 = vadd.f32 %v3708_v22, %v2338_v11  ;;  %v2398_v3 = vmax.f32 %v2336_v28, 0.0 }
 0x8b5   :  { %v2401_v36 = vmax.f32 %v2347_v4, 0.0 }
 0x8b6   :  { %v2399_v25 = vmax.f32 %v2339_v46, 0.0 }
 0x8b7   :  { %v5684_v24 = vpack.c.bf16 %v2401_v36, %v2400_v1 }
 0x8b8   :  { %v5686_v58 = vpack.c.bf16 %v2399_v25, %v2398_v3 }
 0x8ba   :  { %4305 = vmatprep.subr.bf16.mxu1 %v5686_v58 }
 0x8bb   :  { %4306 = vmatpush3.bf16.msra.mxu1 %v5686_v58 }
 0x8bc   :  { %4307 = vmatprep.subr.bf16.mxu1 %v5684_v24 }
 0x8bf   :  { %4308 = vmatpush3.bf16.msra.mxu1 %v5684_v24 }
 0x8c0   :  { %v4295_v35 = vpop.f32.mrb[108].mxu0 }
 0x8c1   :  { %v2360_v13 = vadd.f32 %v4295_v35, %v3708_v22  ;;  %v2351_v8 = vpop.f32.mrb[109].mxu0 }
 0x8c2   :  { %v2352_v6 = vadd.f32 %v3708_v22, %v2351_v8  ;;  %v4296_v20 = vpop.f32.mrb[110].mxu0 }
 0x8c3   :  { %v2363_v43 = vadd.f32 %v4296_v20, %v3708_v22  ;;  %v2354_v17 = vpop.f32.mrb[111].mxu0  ;;  %v2404_v63 = vmax.f32 %v2360_v13, 0.0 }
 0x8c4   :  { %v2355_v12 = vadd.f32 %v3708_v22, %v2354_v17  ;;  %v2402_v55 = vmax.f32 %v2352_v6, 0.0 }
 0x8c5   :  { %v2405_v37 = vmax.f32 %v2363_v43, 0.0 }
 0x8c6   :  { %v2403_v31 = vmax.f32 %v2355_v12, 0.0 }
 0x8c7   :  { %v5692_v30 = vpack.c.bf16 %v2405_v37, %v2404_v63  ;;  %v2758_v37 = vmax.bf16 %v6173_v41, %v5370_v34  ;;  %v2761_v34 = vmax.bf16 %v6173_v41, %v5376_v23  ;;  %v2764_v23 = vmax.bf16 %v6173_v41, %v5394_v18  ;;  %v4648_v18 = vld [vmem:[#allocation5] sm:$0xff]  }
 0x8c8   :  { %v5694_v27 = vpack.c.bf16 %v2403_v31, %v2402_v55  ;;  %v2759_v55 = vmax.bf16 %v6173_v41, %v5368_v33  ;;  %v4638_v31 = vld [vmem:[#allocation2 + $0x10] sm:$0xff]   ;;  %v2762_v33 = vmax.bf16 %v6173_v41, %v5386_v44  ;;  %v2765_v44 = vmax.bf16 %v6173_v41, %v5392_v45 }
 0x8c9   :  { %v4650_v45 = vld [vmem:[#allocation5 + $0x10] sm:$0xff]  }
 0x8ca   :  { %4309 = vmatprep.subr.bf16.mxu1 %v5694_v27 }
 0x8cb   :  { %4310 = vmatpush3.bf16.msra.mxu1 %v5694_v27 }
 0x8cc   :  { %4311 = vmatprep.subr.bf16.mxu1 %v5692_v30 }
 0x8cf   :  { %4312 = vmatpush3.bf16.msra.mxu1 %v5692_v30 }
 0x8d0   :  { %v4299_v15 = vpop.f32.mrb[112].mxu0 }
 0x8d1   :  { %v2376_v16 = vadd.f32 %v4299_v15, %v3708_v22  ;;  %v2367_v53 = vpop.f32.mrb[113].mxu0  ;;  %v2760_v15 = vmax.bf16 %v6173_v41, %v5378_v42  ;;  %v2763_v42 = vmax.bf16 %v6173_v41, %v5384_v40  ;;  %v4645_v40 = vld [vmem:[#allocation2 + $0x48] sm:$0xff]  }
 0x8d2   :  { %v2368_v60 = vadd.f32 %v3708_v22, %v2367_v53  ;;  %v4300_v29 = vpop.f32.mrb[114].mxu0  ;;  %v4640_v53 = vld [vmem:[#allocation2 + $0x20] sm:$0xff]  }
 0x8d3   :  { %v2379_v2 = vadd.f32 %v4300_v29, %v3708_v22  ;;  %v2370_v57 = vpop.f32.mrb[115].mxu0  ;;  %v2408_v32 = vmax.f32 %v2376_v16, 0.0  ;;  %v4639_v16 = vld [vmem:[#allocation2 + $0x18] sm:$0xff]   ;;  %v4642_v29 = vld [vmem:[#allocation2 + $0x30] sm:$0xff]  }
 0x8d4   :  { %v2371_v26 = vadd.f32 %v3708_v22, %v2370_v57  ;;  %v2406_v28 = vmax.f32 %v2368_v60, 0.0  ;;  %v4641_v60 = vld [vmem:[#allocation2 + $0x28] sm:$0xff]   ;;  %v4644_v57 = vld [vmem:[#allocation2 + $0x40] sm:$0xff]  }
 0x8d5   :  { %v2409_v52 = vmax.f32 %v2379_v2, 0.0  ;;  %v4643_v2 = vld [vmem:[#allocation2 + $0x38] sm:$0xff]  }
 0x8d6   :  { %v2407_v5 = vmax.f32 %v2371_v26, 0.0  ;;  %v4646_v26 = vld [vmem:[#allocation2 + $0x50] sm:$0xff]  }
 0x8d7   :  { %v5700_v4 = vpack.c.bf16 %v2409_v52, %v2408_v32  ;;  %v4647_v32 = vld [vmem:[#allocation2 + $0x58] sm:$0xff]   ;;  %v4649_v52 = vld [vmem:[#allocation5 + $0x8] sm:$0xff]  }
 0x8d8   :  { %v5702_v11 = vpack.c.bf16 %v2407_v5, %v2406_v28  ;;  %v4651_v28 = vld [vmem:[#allocation5 + $0x18] sm:$0xff]   ;;  %v4652_v5 = vld [vmem:[#allocation5 + $0x20] sm:$0xff]  }
 0x8da   :  { %4313 = vmatprep.subr.bf16.mxu1 %v5702_v11 }
 0x8db   :  { %4314 = vmatpush3.bf16.msra.mxu1 %v5702_v11 }
 0x8dc   :  { %4315 = vmatprep.subr.bf16.mxu1 %v5700_v4 }
 0x8df   :  { %4316 = vmatpush3.bf16.msra.mxu1 %v5700_v4 }
 0x8e0   :  { %v4303_v46 = vpop.f32.mrb[116].mxu0 }
 0x8e1   :  { %v2392_v1 = vadd.f32 %v4303_v46, %v3708_v22  ;;  %v2383_v36 = vpop.f32.mrb[117].mxu0  ;;  %v4654_v46 = vld [vmem:[#allocation5 + $0x30] sm:$0xff]  }
 0x8e2   :  { %v2384_v3 = vadd.f32 %v3708_v22, %v2383_v36  ;;  %v4304_v25 = vpop.f32.mrb[118].mxu0  ;;  %v4603_v36 = vld [vmem:[#allocation5 + $0x58] sm:$0xff]  }
 0x8e3   :  { %v2395_v35 = vadd.f32 %v4304_v25, %v3708_v22  ;;  %v2386_v13 = vpop.f32.mrb[119].mxu0  ;;  %v2412_v6 = vmax.f32 %v2392_v1, 0.0  ;;  %v4601_v1 = vld [vmem:[#allocation5 + $0x48] sm:$0xff]   ;;  %v4606_v25 = vld [vmem:[#allocation5 + $0x70] sm:$0xff]  }
 0x8e4   :  { %v2387_v8 = vadd.f32 %v3708_v22, %v2386_v13  ;;  %v2410_v43 = vmax.f32 %v2384_v3, 0.0  ;;  %v4637_v22 = vld [vmem:[#allocation2 + $0x8] sm:$0xff]   ;;  %v4604_v3 = vld [vmem:[#allocation5 + $0x60] sm:$0xff]  }
 0x8e5   :  { %v2413_v20 = vmax.f32 %v2395_v35, 0.0  ;;  %v4607_v35 = vld [vmem:[#allocation5 + $0x78] sm:$0xff]   ;;  %v6187_v13 = vld [vmem:[#allocation11_spill] sm:$0xff] }
 0x8e6   :  { %v2411_v17 = vmax.f32 %v2387_v8, 0.0 }
 0x8e7   :  { %v5708_v12 = vpack.c.bf16 %v2413_v20, %v2412_v6 }
 0x8e8   :  { %v5710_v63 = vpack.c.bf16 %v2411_v17, %v2410_v43 }
 0x8ea   :  { %4317 = vmatprep.subr.bf16.mxu1 %v5710_v63 }
 0x8eb   :  { %4318 = vmatpush3.bf16.msra.mxu1 %v5710_v63 }
 0x8ec   :  { %4319 = vmatprep.subr.bf16.mxu1 %v5708_v12 }
 0x8ef   :  { %4320 = vmatpush3.bf16.msra.mxu1 %v5708_v12 }
 0x8f0   :  { %4345 = vmatprep.subr.bf16.mxu1 %v2758_v37 }
 0x8f2   :  { %4322 = vmatmul.mubr.bf16.vlgmr.msra.gmra.mrb[112].mxu1 %v4637_v22 }
 0x8f3   :  { %4346 = vmatpush3.bf16.msra.mxu1 %v2758_v37  ;;  %4325 = vmatprep.mubr.bf16.mxu1 %v4638_v31 }
 0x8f4   :  { %4347 = vmatprep.subr.bf16.mxu1 %v2759_v55 }
 0x8f7   :  { %4348 = vmatpush3.bf16.msra.mxu1 %v2759_v55 }
 0x8f8   :  { %4349 = vmatprep.subr.bf16.mxu1 %v2760_v15 }
 0x8fa   :  { %4326 = vmatmul.mubr.bf16.gmra.mrb[116].mxu1 %v4639_v16 }
 0x8fb   :  { %4350 = vmatpush3.bf16.msra.mxu1 %v2760_v15  ;;  %4329 = vmatprep.mubr.bf16.mxu1 %v4640_v53 }
 0x8fc   :  { %4351 = vmatprep.subr.bf16.mxu1 %v2761_v34 }
 0x8ff   :  { %4352 = vmatpush3.bf16.msra.mxu1 %v2761_v34 }
 0x900   :  { %4353 = vmatprep.subr.bf16.mxu1 %v2762_v33 }
 0x902   :  { %4330 = vmatmul.mubr.bf16.gmra.mrb[120].mxu1 %v4641_v60 }
 0x903   :  { %4354 = vmatpush3.bf16.msra.mxu1 %v2762_v33  ;;  %4333 = vmatprep.mubr.bf16.mxu1 %v4642_v29 }
 0x904   :  { %4355 = vmatprep.subr.bf16.mxu1 %v2763_v42 }
 0x907   :  { %4356 = vmatpush3.bf16.msra.mxu1 %v2763_v42 }
 0x908   :  { %4357 = vmatprep.subr.bf16.mxu1 %v2764_v23 }
 0x90a   :  { %4334 = vmatmul.mubr.bf16.gmra.mrb[124].mxu1 %v4643_v2 }
 0x90b   :  { %4358 = vmatpush3.bf16.msra.mxu1 %v2764_v23  ;;  %4337 = vmatprep.mubr.bf16.mxu1 %v4644_v57 }
 0x90c   :  { %4359 = vmatprep.subr.bf16.mxu1 %v2765_v44 }
 0x90f   :  { %4360 = vmatpush3.bf16.msra.mxu1 %v2765_v44 }
 0x910   :  { %4377 = vmatprep.subr.bf16.mxu1 %v5401_v21 }
 0x912   :  { %4338 = vmatmul.mubr.bf16.gmra.mrb[128].mxu1 %v4645_v40 }
 0x913   :  { %4341 = vmatprep.mubr.bf16.mxu1 %v4646_v26 }
 0x91a   :  { %4342 = vmatmul.mubr.bf16.gmra.mrb[132].mxu1 %v4647_v32 }
 0x91b   :  { %4361 = vmatprep.mubr.bf16.mxu1 %v4648_v18 }
 0x922   :  { %4362 = vmatmul.mubr.bf16.vlgmr.msra.gmra.mrb[136].mxu1 %v4649_v52 }
 0x923   :  { %4378 = vmatpush3.bf16.msra.mxu1 %v5401_v21  ;;  %4365 = vmatprep.mubr.bf16.mxu1 %v4650_v45  ;;  %v4653_v21 = vld [vmem:[#allocation5 + $0x28] sm:$0xff]  }
 0x924   :  { %4379 = vmatprep.subr.bf16.mxu1 %v5407_v50 }
 0x927   :  { %4380 = vmatpush3.bf16.msra.mxu1 %v5407_v50  ;;  %v4655_v50 = vld [vmem:[#allocation5 + $0x38] sm:$0xff]  }
 0x928   :  { %4381 = vmatprep.subr.bf16.mxu1 %v5413_v39 }
 0x92a   :  { %4366 = vmatmul.mubr.bf16.gmra.mrb[140].mxu1 %v4651_v28 }
 0x92b   :  { %4382 = vmatpush3.bf16.msra.mxu1 %v5413_v39  ;;  %4369 = vmatprep.mubr.bf16.mxu1 %v4652_v5  ;;  %v6186_v39 = vld [vmem:[#allocation34_spill] sm:$0xff] }
 0x92c   :  { %4383 = vmatprep.subr.bf16.mxu1 %v5419_v38 }
 0x92f   :  { %4384 = vmatpush3.bf16.msra.mxu1 %v5419_v38  ;;  %v4600_v38 = vld [vmem:[#allocation5 + $0x40] sm:$0xff]  }
 0x930   :  { %4385 = vmatprep.subr.bf16.mxu1 %v5425_v49 }
 0x932   :  { %4370 = vmatmul.mubr.bf16.gmra.mrb[144].mxu1 %v4653_v21 }
 0x933   :  { %4386 = vmatpush3.bf16.msra.mxu1 %v5425_v49  ;;  %4373 = vmatprep.mubr.bf16.mxu1 %v4654_v46  ;;  %v4602_v49 = vld [vmem:[#allocation5 + $0x50] sm:$0xff]  }
 0x934   :  { %4387 = vmatprep.subr.bf16.mxu1 %v5431_v48 }
 0x937   :  { %4388 = vmatpush3.bf16.msra.mxu1 %v5431_v48  ;;  %v4605_v48 = vld [vmem:[#allocation5 + $0x68] sm:$0xff]  }
 0x938   :  { %4389 = vmatprep.subr.bf16.mxu1 %v5437_v59 }
 0x93a   :  { %4374 = vmatmul.mubr.bf16.gmra.mrb[148].mxu1 %v4655_v50 }
 0x93b   :  { %4390 = vmatpush3.bf16.msra.mxu1 %v5437_v59  ;;  %4393 = vmatprep.mubr.bf16.mxu1 %v4600_v38 }
 0x93c   :  { %4391 = vmatprep.subr.bf16.mxu1 %v6186_v39 }
 0x93f   :  { %4392 = vmatpush3.bf16.msra.mxu1 %v6186_v39 }
 0x942   :  { %4394 = vmatmul.mubr.bf16.vlgmr.msra.gmra.mrb[152].mxu1 %v4601_v1 }
 0x943   :  { %4397 = vmatprep.mubr.bf16.mxu1 %v4602_v49  ;;  %v6188_v49 = vld [vmem:[#allocation12_spill] sm:$0xff] }
 0x94a   :  { %4398 = vmatmul.mubr.bf16.gmra.mrb[156].mxu1 %v4603_v36 }
 0x94b   :  { %4401 = vmatprep.mubr.bf16.mxu1 %v4604_v3  ;;  %v6189_v3 = vld [vmem:[#allocation13_spill] sm:$0xff] }
 0x952   :  { %4402 = vmatmul.mubr.bf16.gmra.mrb[160].mxu1 %v4605_v48 }
 0x953   :  { %4405 = vmatprep.mubr.bf16.mxu1 %v4606_v25  ;;  %v6190_v25 = vld [vmem:[#allocation14_spill] sm:$0xff] }
 0x95a   :  { %4406 = vmatmul.mubr.bf16.gmra.mrb[164].mxu1 %v4607_v35 }
 0x9c5   :  { %v4323_v59 = vpop.f32.mrb[112].mxu1 }
 0x9c6   :  { %v2503_v8 = vadd.f32 %v4323_v59, %v6187_v13  ;;  %v2494_v6 = vpop.f32.mrb[113].mxu1 }
 0x9c7   :  { %v2495_v20 = vadd.f32 %v2494_v6, %v5041_v54  ;;  %v4324_v43 = vpop.f32.mrb[114].mxu1 }
 0x9c8   :  { %v2506_v17 = vadd.f32 %v4324_v43, %v5044_v56  ;;  %v2497_v37 = vpop.f32.mrb[115].mxu1  ;;  %v2591_v55 = vmax.f32 %v2503_v8, 0.0 }
 0x9c9   :  { %v2498_v22 = vadd.f32 %v2497_v37, %v5048_v61  ;;  %v2589_v15 = vmax.f32 %v2495_v20, 0.0 }
 0x9ca   :  { %v2592_v31 = vmax.f32 %v2506_v17, 0.0  ;;  %v6191_v17 = vld [vmem:[#allocation15_spill] sm:$0xff] }
 0x9cb   :  { %v2590_v16 = vmax.f32 %v2498_v22, 0.0 }
 0x9cc   :  { %v2614_v34 = vpack.c.bf16 %v2592_v31, %v2591_v55  ;;  %v6192_v55 = vld [vmem:[#allocation16_spill] sm:$0xff] }
 0x9cd   :  { %v2613_v53 = vpack.c.bf16 %v2590_v16, %v2589_v15  ;;  %v4327_v33 = vpop.f32.mrb[116].mxu1  ;;  %v6193_v16 = vld [vmem:[#allocation17_spill] sm:$0xff] }
 0x9ce   :  { %v2519_v60 = vadd.f32 %v4327_v33, %v5054_v7  ;;  %v2510_v42 = vpop.f32.mrb[117].mxu1  ;;  %v6194_v33 = vld [vmem:[#allocation18_spill] sm:$0xff] }
 0x9cf   :  { %v2511_v29 = vadd.f32 %v2510_v42, %v5057_v10  ;;  %v4328_v23 = vpop.f32.mrb[118].mxu1  ;;  %2626 = vmatpush1.bf16.msra.mxu0 %v2613_v53 }
 0x9d0   :  { %v2522_v54 = vadd.f32 %v4328_v23, %v5060_v14  ;;  %v2513_v56 = vpop.f32.mrb[119].mxu1  ;;  %2627 = vmatprep.subr.bf16.mxu0 %v6173_v41  ;;  %v2595_v2 = vmax.f32 %v2519_v60, 0.0 }
 0x9d1   :  { %v2514_v61 = vadd.f32 %v2513_v56, %v5064_v19  ;;  %v2593_v57 = vmax.f32 %v2511_v29, 0.0 }
 0x9d2   :  { %v2596_v44 = vmax.f32 %v2522_v54, 0.0 }
 0x9d3   :  { %v2594_v40 = vmax.f32 %v2514_v61, 0.0  ;;  %2628 = vmatpush1.bf16.msra.mxu0 %v2614_v34 }
 0x9d4   :  { %v2616_v26 = vpack.c.bf16 %v2596_v44, %v2595_v2  ;;  %2629 = vmatprep.subr.bf16.mxu0 %v6173_v41  ;;  %v6195_v44 = vld [vmem:[#allocation19_spill] sm:$0xff] }
 0x9d5   :  { %v2615_v7 = vpack.c.bf16 %v2594_v40, %v2593_v57  ;;  %v4331_v32 = vpop.f32.mrb[120].mxu1 }
 0x9d6   :  { %v2535_v10 = vadd.f32 %v4331_v32, %v5072_v47  ;;  %v2526_v18 = vpop.f32.mrb[121].mxu1 }
 0x9d7   :  { %v2527_v14 = vadd.f32 %v2526_v18, %v5076_v51  ;;  %v4332_v52 = vpop.f32.mrb[122].mxu1  ;;  %2630 = vmatpush1.bf16.msra.mxu0 %v2615_v7 }
 0x9d8   :  { %v2538_v45 = vadd.f32 %v4332_v52, %v5081_v62  ;;  %v2529_v19 = vpop.f32.mrb[123].mxu1  ;;  %2631 = vmatprep.subr.bf16.mxu0 %v6173_v41  ;;  %v2599_v5 = vmax.f32 %v2535_v10, 0.0  ;;  %v6197_v10 = vld [vmem:[#allocation21_spill] sm:$0xff]  ;;  %v6198_v52 = vld [vmem:[#allocation22_spill] sm:$0xff] }
 0x9d9   :  { %v2530_v28 = vadd.f32 %v2529_v19, %v5086_v0  ;;  %v2597_v46 = vmax.f32 %v2527_v14, 0.0 }
 0x9da   :  { %v2600_v21 = vmax.f32 %v2538_v45, 0.0 }
 0x9db   :  { %v2598_v50 = vmax.f32 %v2530_v28, 0.0  ;;  %2632 = vmatpush1.bf16.msra.mxu0 %v2616_v26  ;;  %v6196_v26 = vld [vmem:[#allocation20_spill] sm:$0xff] }
 0x9dc   :  { %v2618_v39 = vpack.c.bf16 %v2600_v21, %v2599_v5  ;;  %2633 = vmatprep.subr.bf16.mxu0 %v6173_v41 }
 0x9dd   :  { %v2617_v47 = vpack.c.bf16 %v2598_v50, %v2597_v46  ;;  %v4335_v38 = vpop.f32.mrb[124].mxu1 }
 0x9de   :  { %v2551_v51 = vadd.f32 %v4335_v38, %v5094_v9  ;;  %v2542_v1 = vpop.f32.mrb[125].mxu1 }
 0x9df   :  { %v2543_v62 = vadd.f32 %v2542_v1, %v6188_v49  ;;  %v4336_v36 = vpop.f32.mrb[126].mxu1  ;;  %2634 = vmatpush1.bf16.msra.mxu0 %v2617_v47  ;;  %v4609_v49 = vld [vmem:[%s6113_s11 + $0x88] sm:$0xff]  }
 0x9e0   :  { %v2554_v48 = vadd.f32 %v4336_v36, %v6189_v3  ;;  %v2545_v0 = vpop.f32.mrb[127].mxu1  ;;  %2635 = vmatprep.subr.bf16.mxu0 %v6173_v41  ;;  %v2603_v59 = vmax.f32 %v2551_v51, 0.0  ;;  %v4608_v51 = vld [vmem:[%s6113_s11 + $0x80] sm:$0xff]   ;;  %v4657_v3 = vld [vmem:[%s6105_s3 + $0x14] ss:$8 sps:$4 sm:$0xff]  }
 0x9e1   :  { %v2546_v35 = vadd.f32 %v2545_v0, %v6190_v25  ;;  %v2601_v8 = vmax.f32 %v2543_v62, 0.0  ;;  %v4656_v36 = vld [vmem:[%s6105_s3] ss:$8 sps:$4 sm:$0xff]   ;;  %v4610_v25 = vld [vmem:[%s6113_s11 + $0x90] sm:$0xff]  }
 0x9e2   :  { %v2604_v13 = vmax.f32 %v2554_v48, 0.0 }
 0x9e3   :  { %v2602_v6 = vmax.f32 %v2546_v35, 0.0  ;;  %2636 = vmatpush1.bf16.msra.mxu0 %v2618_v39 }
 0x9e4   :  { %v2620_v20 = vpack.c.bf16 %v2604_v13, %v2603_v59  ;;  %2637 = vmatprep.subr.bf16.mxu0 %v6173_v41  ;;  %v4658_v59 = vld [vmem:[%s6105_s3 + $0x10] ss:$8 sps:$4 sm:$0xff]  }
 0x9e5   :  { %v2619_v9 = vpack.c.bf16 %v2602_v6, %v2601_v8  ;;  %v4339_v43 = vpop.f32.mrb[128].mxu1  ;;  %v4659_v8 = vld [vmem:[%s6105_s3 + $0x24] ss:$8 sps:$4 sm:$0xff]  }
 0x9e6   :  { %v2567_v37 = vadd.f32 %v4339_v43, %v6191_v17  ;;  %v2558_v22 = vpop.f32.mrb[129].mxu1  ;;  %v4660_v43 = vld [vmem:[%s6105_s3 + $0x20] ss:$8 sps:$4 sm:$0xff]   ;;  %v4661_v17 = vld [vmem:[%s6105_s3 + $0x34] ss:$8 sps:$4 sm:$0xff]  }
 0x9e7   :  { %v2559_v31 = vadd.f32 %v2558_v22, %v6192_v55  ;;  %v4340_v15 = vpop.f32.mrb[130].mxu1  ;;  %2638 = vmatpush1.bf16.msra.mxu0 %v2619_v9  ;;  %v4663_v22 = vld [vmem:[%s6105_s3 + $0x44] ss:$8 sps:$4 sm:$0xff]   ;;  %v4664_v55 = vld [vmem:[%s6105_s3 + $0x40] ss:$8 sps:$4 sm:$0xff]  }
 0x9e8   :  { %v2570_v34 = vadd.f32 %v4340_v15, %v6193_v16  ;;  %v2561_v53 = vpop.f32.mrb[131].mxu1  ;;  %2639 = vmatprep.subr.bf16.mxu0 %v6173_v41  ;;  %v2607_v42 = vmax.f32 %v2567_v37, 0.0  ;;  %v4662_v37 = vld [vmem:[%s6105_s3 + $0x30] ss:$8 sps:$4 sm:$0xff]   ;;  %v4667_v16 = vld [vmem:[%s6105_s3 + $0x64] ss:$8 sps:$4 sm:$0xff]  }
 0x9e9   :  { %v2562_v60 = vadd.f32 %v2561_v53, %v6194_v33  ;;  %v2605_v23 = vmax.f32 %v2559_v31, 0.0  ;;  %v4665_v31 = vld [vmem:[%s6105_s3 + $0x54] ss:$8 sps:$4 sm:$0xff]   ;;  %v4666_v15 = vld [vmem:[%s6105_s3 + $0x50] ss:$8 sps:$4 sm:$0xff]  }
 0x9ea   :  { %v2608_v29 = vmax.f32 %v2570_v34, 0.0  ;;  %v4668_v34 = vld [vmem:[%s6105_s3 + $0x60] ss:$8 sps:$4 sm:$0xff]   ;;  %v4669_v53 = vld [vmem:[%s6105_s3 + $0x74] ss:$8 sps:$4 sm:$0xff]  }
 0x9eb   :  { %v2606_v54 = vmax.f32 %v2562_v60, 0.0  ;;  %2640 = vmatpush1.bf16.msra.mxu0 %v2620_v20  ;;  %v4670_v33 = vld [vmem:[%s6105_s3 + $0x70] ss:$8 sps:$4 sm:$0xff]  }
 0x9ec   :  { %v2622_v56 = vpack.c.bf16 %v2608_v29, %v2607_v42  ;;  %2641 = vmatprep.subr.bf16.mxu0 %v6173_v41  ;;  %v4611_v60 = vld [vmem:[%s6113_s11 + $0x98] sm:$0xff]  }
 0x9ed   :  { %v2621_v61 = vpack.c.bf16 %v2606_v54, %v2605_v23  ;;  %v4343_v2 = vpop.f32.mrb[132].mxu1 }
 0x9ee   :  { %v2583_v57 = vadd.f32 %v4343_v2, %v6195_v44  ;;  %v2574_v40 = vpop.f32.mrb[133].mxu1 }
 0x9ef   :  { %v2575_v7 = vadd.f32 %v2574_v40, %v6196_v26  ;;  %v4344_v32 = vpop.f32.mrb[134].mxu1  ;;  %2642 = vmatpush1.bf16.msra.mxu0 %v2621_v61  ;;  %v4614_v40 = vld [vmem:[%s6113_s11 + $0xb0] sm:$0xff]   ;;  %v4615_v26 = vld [vmem:[%s6113_s11 + $0xb8] sm:$0xff]  }
 0x9f0   :  { %v2586_v18 = vadd.f32 %v4344_v32, %v6197_v10  ;;  %v2577_v14 = vpop.f32.mrb[135].mxu1  ;;  %2643 = vmatprep.subr.bf16.mxu0 %v6173_v41  ;;  %v2611_v19 = vmax.f32 %v2583_v57, 0.0  ;;  %v4613_v57 = vld [vmem:[%s6113_s11 + $0xa8] sm:$0xff]  }
 0x9f1   :  { %v2578_v45 = vadd.f32 %v2577_v14, %v6198_v52  ;;  %v2609_v5 = vmax.f32 %v2575_v7, 0.0 }
 0x9f2   :  { %v2612_v28 = vmax.f32 %v2586_v18, 0.0 }
 0x9f3   :  { %v2610_v21 = vmax.f32 %v2578_v45, 0.0  ;;  %2644 = vmatpush1.bf16.msra.mxu0 %v2622_v56  ;;  %v4612_v56 = vld [vmem:[%s6113_s11 + $0xa0] sm:$0xff]  }
 0x9f4   :  { %v2624_v46 = vpack.c.bf16 %v2612_v28, %v2611_v19  ;;  %2645 = vmatprep.subr.bf16.mxu0 %v6173_v41 }
 0x9f5   :  { %v2623_v50 = vpack.c.bf16 %v2610_v21, %v2609_v5  ;;  %v5782_v39 = vpop.f32.mrb[136].mxu1 }
 0x9f6   :  { %v5784_v47 = vpop.f32.mrb[137].mxu1 }
 0x9f7   :  { %2646 = vmatpush1.bf16.msra.mxu0 %v2623_v50  ;;  %v5786_v38 = vpop.f32.mrb[138].mxu1  ;;  %v4616_v50 = vld [vmem:[%s6115_s13 + $0x80] sm:$0xff]  }
 0x9f8   :  { %2647 = vmatprep.subr.bf16.mxu0 %v6173_v41  ;;  %v5792_v1 = vpop.f32.mrb[139].mxu1  ;;  %4441 = vmatprep.subr.bf16.mxu1 %v4616_v50 }
 0x9f9   :  { %4442 = vmatpush3.bf16.msra.mxu1 %v4616_v50 }
 0x9fb   :  { %2648 = vmatpush1.bf16.msra.mxu0 %v2624_v46 }
 0x9fc   :  { %4409 = vmatprep.subr.bf16.mxu0 %v4608_v51 }
 0x9fd   :  { %v5797_v62 = vpop.f32.mrb[140].mxu1 }
 0x9fe   :  { %2658 = vmatmul.mubr.bf16.vlgmr.msra.gmra.mrb[120].mxu0 %v4656_v36  ;;  %v5802_v41 = vpop.f32.mrb[141].mxu1  ;;  %v4619_v36 = vld [vmem:[%s6115_s13 + $0x98] sm:$0xff]  }
 0x9ff   :  { %3719 = vmatprep.mubr.msk.bf16.mxu0 %vm935_vm5, %v4657_v3  ;;  %4410 = vmatpush3.bf16.msra.mxu0 %v4608_v51  ;;  %v5808_v48 = vpop.f32.mrb[142].mxu1  ;;  %v4617_v51 = vld [vmem:[%s6115_s13 + $0x88] sm:$0xff]   ;;  %v4620_v3 = vld [vmem:[%s6115_s13 + $0xa0] sm:$0xff]  }
 0xa00   :  { %4411 = vmatprep.subr.bf16.mxu0 %v4609_v49  ;;  %v5810_v0 = vpop.f32.mrb[143].mxu1  ;;  %4443 = vmatprep.subr.bf16.mxu1 %v4617_v51 }
 0xa01   :  { %4444 = vmatpush3.bf16.msra.mxu1 %v4617_v51 }
 0xa03   :  { %4412 = vmatpush3.bf16.msra.mxu0 %v4609_v49  ;;  %v4618_v49 = vld [vmem:[%s6115_s13 + $0x90] sm:$0xff]  }
 0xa04   :  { %4413 = vmatprep.subr.bf16.mxu0 %v4610_v25  ;;  %4445 = vmatprep.subr.bf16.mxu1 %v4618_v49 }
 0xa05   :  { %v5815_v35 = vpop.f32.mrb[144].mxu1  ;;  %4446 = vmatpush3.bf16.msra.mxu1 %v4618_v49 }
 0xa06   :  { %2666 = vmatmul.mubr.bf16.gmra.mrb[124].mxu0 %v4658_v59  ;;  %v5820_v13 = vpop.f32.mrb[145].mxu1  ;;  %4447 = vmatprep.subr.bf16.mxu1 %v4619_v36  ;;  %v3717_v59 = vld [vmem:[%s6112_s10 + $0x10] sm:$0x1f] }
 0xa07   :  { %3720 = vmatprep.mubr.msk.bf16.mxu0 %vm935_vm5, %v4659_v8  ;;  %v5826_v6 = vpop.f32.mrb[146].mxu1  ;;  %4414 = vmatpush3.bf16.msra.mxu0 %v4610_v25  ;;  %v4621_v25 = vld [vmem:[%s6115_s13 + $0xa8] sm:$0xff]  }
 0xa08   :  { %v5828_v20 = vpop.f32.mrb[147].mxu1  ;;  %4415 = vmatprep.subr.bf16.mxu0 %v4611_v60  ;;  %v6199_v8 = vld [vmem:[#allocation31_spill] sm:$0xff] }
 0xa09   :  { %4448 = vmatpush3.bf16.msra.mxu1 %v4619_v36 }
 0xa0a   :  { %4449 = vmatprep.subr.bf16.mxu1 %v4620_v3 }
 0xa0b   :  { %4416 = vmatpush3.bf16.msra.mxu0 %v4611_v60 }
 0xa0c   :  { %4417 = vmatprep.subr.bf16.mxu0 %v4612_v56 }
 0xa0d   :  { %v5830_v9 = vpop.f32.mrb[148].mxu1  ;;  %4450 = vmatpush3.bf16.msra.mxu1 %v4620_v3  ;;  %v2426_v3 = vunpack.c.l.bf16 %v5684_v24 }
 0xa0e   :  { %2674 = vmatmul.mubr.bf16.gmra.mrb[128].mxu0 %v4660_v43  ;;  %v5873_v42 = vpop.f32.mrb[149].mxu1  ;;  %4451 = vmatprep.subr.bf16.mxu1 %v4621_v25  ;;  %v3063_v43 = vsub.s32 3, %v6199_v8 }
 0xa0f   :  { %3721 = vmatprep.mubr.msk.bf16.mxu0 %vm935_vm5, %v4661_v17  ;;  %v5875_v29 = vpop.f32.mrb[150].mxu1  ;;  %4418 = vmatpush3.bf16.msra.mxu0 %v4612_v56  ;;  %v6200_v17 = vsub.s32 2, %v6199_v8 }
 0xa10   :  { %v5877_v23 = vpop.f32.mrb[151].mxu1  ;;  %4419 = vmatprep.subr.bf16.mxu0 %v4613_v57 }
 0xa11   :  { %4452 = vmatpush3.bf16.msra.mxu1 %v4621_v25 }
 0xa13   :  { %4420 = vmatpush3.bf16.msra.mxu0 %v4613_v57 }
 0xa14   :  { %4421 = vmatprep.subr.bf16.mxu0 %v4614_v40 }
 0xa15   :  { %v5879_v54 = vpop.f32.mrb[152].mxu1 }
 0xa16   :  { %2682 = vmatmul.mubr.bf16.gmra.mrb[132].mxu0 %v4662_v37  ;;  %v2998_v61 = vpop.f32.mrb[153].mxu1  ;;  %v5945_v37 = vrot.slane %v3717_v59, %v6200_v17 }
 0xa17   :  { %3722 = vmatprep.mubr.msk.bf16.mxu0 %vm935_vm5, %v4663_v22  ;;  %v5884_v2 = vpop.f32.mrb[154].mxu1  ;;  %4422 = vmatpush3.bf16.msra.mxu0 %v4614_v40  ;;  %v2424_v22 = vunpack.c.l.bf16 %v5686_v58 }
 0xa18   :  { %v5886_v44 = vpop.f32.mrb[155].mxu1  ;;  %4423 = vmatprep.subr.bf16.mxu0 %v4615_v26  ;;  %v2867_v60 = vmul.f32 %v5945_v37, %v5784_v47  ;;  %v2868_v25 = vmul.f32 %v5945_v37, %v5792_v1 }
 0xa1b   :  { %4424 = vmatpush3.bf16.msra.mxu0 %v4615_v26 }
 0xa1d   :  { %v5897_v7 = vpop.f32.mrb[156].mxu1 }
 0xa1e   :  { %2690 = vmatmul.mubr.bf16.gmra.mrb[136].mxu0 %v4664_v55  ;;  %v5899_v32 = vpop.f32.mrb[157].mxu1  ;;  %v6201_v55 = vld [vmem:[#allocation32_spill] sm:$0xff] }
 0xa1f   :  { %3723 = vmatprep.mubr.msk.bf16.mxu0 %vm935_vm5, %v4665_v31  ;;  %v5901_v10 = vpop.f32.mrb[158].mxu1  ;;  %v5949_v31 = vrot.slane %v3717_v59, %v6201_v55 }
 0xa20   :  { %v5903_v18 = vpop.f32.mrb[159].mxu1 }
 0xa21   :  { %v2444_v56 = vmul.f32 %v5949_v31, %v2424_v22 }
 0xa25   :  { %v5905_v14 = vpop.f32.mrb[160].mxu1 }
 0xa26   :  { %2698 = vmatmul.mubr.bf16.gmra.mrb[140].mxu0 %v4666_v15  ;;  %v5907_v52 = vpop.f32.mrb[161].mxu1  ;;  %v6202_v15 = vld [vmem:[#allocation33_spill] sm:$0xff] }
 0xa27   :  { %3724 = vmatprep.mubr.msk.bf16.mxu0 %vm935_vm5, %v4667_v16  ;;  %v5909_v45 = vpop.f32.mrb[162].mxu1  ;;  %v5952_v16 = vrot.slane %v3717_v59, %v6202_v15 }
 0xa28   :  { %v5911_v19 = vpop.f32.mrb[163].mxu1 }
 0xa2d   :  { %v5913_v28 = vpop.f32.mrb[164].mxu1 }
 0xa2e   :  { %2706 = vmatmul.mubr.bf16.gmra.mrb[144].mxu0 %v4668_v34  ;;  %v5915_v5 = vpop.f32.mrb[165].mxu1  ;;  %v2425_v34 = vunpack.c.h.bf16 %v5686_v58 }
 0xa2f   :  { %3725 = vmatprep.mubr.msk.bf16.mxu0 %vm935_vm5, %v4669_v53  ;;  %v5917_v21 = vpop.f32.mrb[166].mxu1  ;;  %v5955_v53 = vrot.slane %v3717_v59, %v3063_v43  ;;  %v2427_v43 = vunpack.c.h.bf16 %v5684_v24 }
 0xa30   :  { %v5919_v46 = vpop.f32.mrb[167].mxu1  ;;  %v2445_v51 = vmul.f32 %v5949_v31, %v2425_v34  ;;  %v2446_v34 = vmul.f32 %v5949_v31, %v2426_v3 }
 0xa31   :  { %v3065_v58 = vmul.f32 %v5955_v53, %v2998_v61  ;;  %v3066_v8 = vmul.f32 %v5955_v53, %v5886_v44  ;;  %v2447_v1 = vmul.f32 %v5949_v31, %v2427_v43  ;;  %v3067_v44 = vmul.f32 %v5879_v54, %v5955_v53 }
 0xa36   :  { %2714 = vmatmul.mubr.bf16.gmra.mrb[148].mxu0 %v4670_v33 }
 0xad1   :  { %v2659_v33 = vpop.f32.mrb[120].mxu0 }
 0xad2   :  { %v2726_v57 = vmul.f32 %v5952_v16, %v2659_v33  ;;  %v2661_v40 = vpop.f32.mrb[121].mxu0 }
 0xad3   :  { %v2662_v26 = vpop.f32.mrb[122].mxu0 }
 0xad4   :  { %v2742_v50 = vadd.f32 %v2726_v57, %v2444_v56  ;;  %v2727_v49 = vmul.f32 %v5952_v16, %v2662_v26  ;;  %v2664_v36 = vpop.f32.mrb[123].mxu0  ;;  %v2869_v56 = vmul.f32 %v5782_v39, %v5945_v37 }
 0xad6   :  { %v2743_v47 = vadd.f32 %v2727_v49, %v2445_v51  ;;  %v2883_v59 = vadd.f32 %v2867_v60, %v2742_v50  ;;  %v2428_v50 = vunpack.c.l.bf16 %v5694_v27  ;;  %v2870_v51 = vmul.f32 %v5786_v38, %v5945_v37 }
 0xad7   :  { %v3068_v49 = vmul.f32 %v5884_v2, %v5955_v53  ;;  %v2871_v38 = vmul.f32 %v5945_v37, %v5802_v41  ;;  %v3070_v41 = vmul.f32 %v5955_v53, %v5903_v18  ;;  %v3071_v18 = vmul.f32 %v5897_v7, %v5955_v53 }
 0xad8   :  { %v3081_v17 = vadd.f32 %v3065_v58, %v2883_v59  ;;  %v2884_v22 = vadd.f32 %v2868_v25, %v2743_v47  ;;  %v2429_v58 = vunpack.c.h.bf16 %v5694_v27  ;;  %v2448_v59 = vmul.f32 %v5949_v31, %v2428_v50 }
 0xad9   :  { %v2667_v55 = vpop.f32.mrb[124].mxu0 }
 0xada   :  { %v3082_v15 = vadd.f32 %v3066_v8, %v2884_v22  ;;  %v2728_v61 = vmul.f32 %v5952_v16, %v2667_v55  ;;  %v2669_v33 = vpop.f32.mrb[125].mxu0 }
 0xadb   :  { %v2670_v60 = vpop.f32.mrb[126].mxu0  ;;  %v2872_v33 = vmul.f32 %v5945_v37, %v5810_v0  ;;  %v2873_v0 = vmul.f32 %v5797_v62, %v5945_v37 }
 0xadc   :  { %v2744_v57 = vadd.f32 %v2728_v61, %v2446_v34  ;;  %v2729_v24 = vmul.f32 %v5952_v16, %v2670_v60  ;;  %v2672_v40 = vpop.f32.mrb[127].mxu0  ;;  %v3097_v26 = vpack.c.bf16 %v3082_v15, %v3081_v17  ;;  %v2449_v17 = vmul.f32 %v5949_v31, %v2429_v58 }
 0xadd   :  { %v3069_v34 = vmul.f32 %v5955_v53, %v5899_v32  ;;  %v2430_v61 = vunpack.c.l.bf16 %v5692_v30  ;;  %v2431_v60 = vunpack.c.h.bf16 %v5692_v30 }
 0xade   :  { %v2885_v39 = vadd.f32 %v2869_v56, %v2744_v57  ;;  %v2745_v36 = vadd.f32 %v2729_v24, %v2447_v1  ;;  %4425 = vmatprep.mubr.bf16.mxu0 %v3097_v26 }
 0xadf   :  { %v2450_v26 = vmul.f32 %v5949_v31, %v2430_v61 }
 0xae0   :  { %v3083_v3 = vadd.f32 %v3067_v44, %v2885_v39  ;;  %v2886_v54 = vadd.f32 %v2870_v51, %v2745_v36  ;;  %v2451_v51 = vmul.f32 %v5949_v31, %v2431_v60  ;;  %v2435_v60 = vunpack.c.h.bf16 %v5700_v4 }
 0xae1   :  { %v2675_v25 = vpop.f32.mrb[128].mxu0 }
 0xae2   :  { %v3084_v47 = vadd.f32 %v3068_v49, %v2886_v54  ;;  %v2730_v8 = vmul.f32 %v5952_v16, %v2675_v25  ;;  %v2677_v43 = vpop.f32.mrb[129].mxu0  ;;  %v2874_v54 = vmul.f32 %v5808_v48, %v5945_v37  ;;  %v3072_v25 = vmul.f32 %v5901_v10, %v5955_v53 }
 0xae3   :  { %v2678_v2 = vpop.f32.mrb[130].mxu0  ;;  %v2875_v48 = vmul.f32 %v5945_v37, %v5820_v13  ;;  %v3074_v13 = vmul.f32 %v5955_v53, %v5911_v19  ;;  %v3075_v19 = vmul.f32 %v5905_v14, %v5955_v53 }
 0xae4   :  { %v3098_v22 = vpack.c.bf16 %v3084_v47, %v3083_v3  ;;  %v2746_v55 = vadd.f32 %v2730_v8, %v2448_v59  ;;  %v2731_v15 = vmul.f32 %v5952_v16, %v2678_v2  ;;  %v2680_v27 = vpop.f32.mrb[131].mxu0  ;;  %v2432_v3 = vunpack.c.l.bf16 %v5702_v11 }
 0xae5   :  { %v2433_v59 = vunpack.c.h.bf16 %v5702_v11  ;;  %v3073_v11 = vmul.f32 %v5955_v53, %v5907_v52 }
 0xae6   :  { %v2747_v56 = vadd.f32 %v2731_v15, %v2449_v17  ;;  %v2887_v1 = vadd.f32 %v2871_v38, %v2746_v55  ;;  %4426 = vmatmul.mubr.bf16.vlgmr.msra.gmra.mrb[152].mxu0 %v3098_v22  ;;  %v2452_v38 = vmul.f32 %v5949_v31, %v2432_v3  ;;  %v2437_v3 = vunpack.c.h.bf16 %v5710_v63 }
 0xae7   :  { %v2453_v55 = vmul.f32 %v5949_v31, %v2433_v59 }
 0xae8   :  { %v3085_v44 = vadd.f32 %v3069_v34, %v2887_v1  ;;  %v2888_v57 = vadd.f32 %v2872_v33, %v2747_v56  ;;  %v2434_v33 = vunpack.c.l.bf16 %v5700_v4  ;;  %v2876_v56 = vmul.f32 %v5945_v37, %v5828_v20 }
 0xae9   :  { %v2683_v24 = vpop.f32.mrb[132].mxu0  ;;  %v2877_v20 = vmul.f32 %v5815_v35, %v5945_v37 }
 0xaea   :  { %v3086_v40 = vadd.f32 %v3070_v41, %v2888_v57  ;;  %v2732_v32 = vmul.f32 %v5952_v16, %v2683_v24  ;;  %v2685_v50 = vpop.f32.mrb[133].mxu0  ;;  %v2454_v52 = vmul.f32 %v5949_v31, %v2434_v33 }
 0xaeb   :  { %v2686_v49 = vpop.f32.mrb[134].mxu0  ;;  %v2455_v50 = vmul.f32 %v5949_v31, %v2435_v60 }
 0xaec   :  { %v2748_v39 = vadd.f32 %v2732_v32, %v2450_v26  ;;  %v2733_v30 = vmul.f32 %v5952_v16, %v2686_v49  ;;  %v2688_v36 = vpop.f32.mrb[135].mxu0  ;;  %v3099_v58 = vpack.c.bf16 %v3086_v40, %v3085_v44 }
 0xaed   :  { %v3076_v36 = vmul.f32 %v5909_v45, %v5955_v53 }
 0xaee   :  { %v2889_v62 = vadd.f32 %v2873_v0, %v2748_v39  ;;  %v2749_v47 = vadd.f32 %v2733_v30, %v2451_v51  ;;  %4429 = vmatprep.mubr.bf16.mxu0 %v3099_v58  ;;  %v2436_v39 = vunpack.c.l.bf16 %v5710_v63  ;;  %v2878_v30 = vmul.f32 %v5826_v6, %v5945_v37 }
 0xaef   :  { %v2879_v6 = vmul.f32 %v5945_v37, %v5873_v42  ;;  %v3077_v63 = vmul.f32 %v5955_v53, %v5915_v5  ;;  %v3078_v42 = vmul.f32 %v5955_v53, %v5919_v46 }
 0xaf0   :  { %v2890_v8 = vadd.f32 %v2874_v54, %v2749_v47  ;;  %v3087_v7 = vadd.f32 %v3071_v18, %v2889_v62  ;;  %v2456_v62 = vmul.f32 %v5949_v31, %v2436_v39 }
 0xaf1   :  { %v2691_v43 = vpop.f32.mrb[136].mxu0 }
 0xaf2   :  { %v2734_v17 = vmul.f32 %v5952_v16, %v2691_v43  ;;  %v2693_v2 = vpop.f32.mrb[137].mxu0  ;;  %v3088_v22 = vadd.f32 %v3072_v25, %v2890_v8 }
 0xaf3   :  { %v2694_v10 = vpop.f32.mrb[138].mxu0 }
 0xaf4   :  { %v2750_v15 = vadd.f32 %v2734_v17, %v2452_v38  ;;  %v2735_v27 = vmul.f32 %v5952_v16, %v2694_v10  ;;  %v2696_v34 = vpop.f32.mrb[139].mxu0  ;;  %v3100_v61 = vpack.c.bf16 %v3088_v22, %v3087_v7  ;;  %v2457_v7 = vmul.f32 %v5949_v31, %v2437_v3 }
 0xaf5   :  { %v2438_v22 = vunpack.c.l.bf16 %v5708_v12 }
 0xaf6   :  { %v2751_v1 = vadd.f32 %v2735_v27, %v2453_v55  ;;  %v2891_v41 = vadd.f32 %v2875_v48, %v2750_v15  ;;  %4430 = vmatmul.mubr.bf16.gmra.mrb[156].mxu0 %v3100_v61  ;;  %v2880_v48 = vmul.f32 %v5945_v37, %v5877_v23  ;;  %v2439_v15 = vunpack.c.h.bf16 %v5708_v12 }
 0xaf7   :  { %v2458_v5 = vmul.f32 %v5949_v31, %v2438_v22 }
 0xaf8   :  { %v3089_v44 = vadd.f32 %v3073_v11, %v2891_v41  ;;  %v2892_v57 = vadd.f32 %v2876_v56, %v2751_v1  ;;  %v2459_v1 = vmul.f32 %v5949_v31, %v2439_v15  ;;  %v2881_v41 = vmul.f32 %v5830_v9, %v5945_v37 }
 0xaf9   :  { %v2699_v24 = vpop.f32.mrb[140].mxu0  ;;  %v3080_v31 = vmul.f32 %v5917_v21, %v5955_v53 }
 0xafa   :  { %v3090_v40 = vadd.f32 %v3074_v13, %v2892_v57  ;;  %v2736_v26 = vmul.f32 %v5952_v16, %v2699_v24  ;;  %v2701_v32 = vpop.f32.mrb[141].mxu0  ;;  %v3079_v57 = vmul.f32 %v5913_v28, %v5955_v53  ;;  %v3751_v28 = vld [vmem:[%s6114_s12 + $0x2] ss:$0 sm:$0xff] }
 0xafb   :  { %v2702_v0 = vpop.f32.mrb[142].mxu0 }
 0xafc   :  { %v2752_v51 = vadd.f32 %v2736_v26, %v2454_v52  ;;  %v2737_v4 = vmul.f32 %v5952_v16, %v2702_v0  ;;  %v2704_v49 = vpop.f32.mrb[143].mxu0  ;;  %v3101_v18 = vpack.c.bf16 %v3090_v40, %v3089_v44  ;;  %v2882_v44 = vmul.f32 %v5875_v29, %v5945_v37  ;;  %v4623_v29 = vld [vmem:[%s6115_s13 + $0xb8] sm:$0xff]  }
 0xafe   :  { %v2893_v35 = vadd.f32 %v2877_v20, %v2752_v51  ;;  %v2753_v58 = vadd.f32 %v2737_v4, %v2455_v50  ;;  %4433 = vmatprep.mubr.bf16.mxu0 %v3101_v18 }
 0xb00   :  { %v2894_v54 = vadd.f32 %v2878_v30, %v2753_v58  ;;  %v3091_v14 = vadd.f32 %v3075_v19, %v2893_v35 }
 0xb01   :  { %v2707_v25 = vpop.f32.mrb[144].mxu0 }
 0xb02   :  { %v2738_v47 = vmul.f32 %v5952_v16, %v2707_v25  ;;  %v2709_v59 = vpop.f32.mrb[145].mxu0  ;;  %v3092_v8 = vadd.f32 %v3076_v36, %v2894_v54 }
 0xb03   :  { %v2710_v45 = vpop.f32.mrb[146].mxu0 }
 0xb04   :  { %v2754_v43 = vadd.f32 %v2738_v47, %v2456_v62  ;;  %v2739_v38 = vmul.f32 %v5952_v16, %v2710_v45  ;;  %v2712_v17 = vpop.f32.mrb[147].mxu0  ;;  %v3102_v2 = vpack.c.bf16 %v3092_v8, %v3091_v14 }
 0xb06   :  { %v2755_v55 = vadd.f32 %v2739_v38, %v2457_v7  ;;  %v2895_v10 = vadd.f32 %v2879_v6, %v2754_v43  ;;  %4434 = vmatmul.mubr.bf16.gmra.mrb[160].mxu0 %v3102_v2 }
 0xb08   :  { %v3093_v27 = vadd.f32 %v3077_v63, %v2895_v10  ;;  %v2896_v34 = vadd.f32 %v2880_v48, %v2755_v55 }
 0xb09   :  { %v2715_v11 = vpop.f32.mrb[148].mxu0 }
 0xb0a   :  { %v3094_v61 = vadd.f32 %v3078_v42, %v2896_v34  ;;  %v2740_v33 = vmul.f32 %v5952_v16, %v2715_v11  ;;  %v2717_v56 = vpop.f32.mrb[149].mxu0 }
 0xb0b   :  { %v2718_v23 = vpop.f32.mrb[150].mxu0 }
 0xb0c   :  { %v2756_v13 = vadd.f32 %v2740_v33, %v2458_v5  ;;  %v2741_v46 = vmul.f32 %v5952_v16, %v2718_v23  ;;  %v2720_v60 = vpop.f32.mrb[151].mxu0  ;;  %v3103_v12 = vpack.c.bf16 %v3094_v61, %v3093_v27  ;;  %v4622_v16 = vld [vmem:[%s6115_s13 + $0xb0] sm:$0xff]  }
 0xb0d   :  { %4453 = vmatprep.subr.bf16.mxu1 %v4622_v16 }
 0xb0e   :  { %v2897_v24 = vadd.f32 %v2881_v41, %v2756_v13  ;;  %v2757_v40 = vadd.f32 %v2741_v46, %v2459_v1  ;;  %4437 = vmatprep.mubr.bf16.mxu0 %v3103_v12  ;;  %4454 = vmatpush3.bf16.msra.mxu1 %v4622_v16 }
 0xb0f   :  { %4455 = vmatprep.subr.bf16.mxu1 %v4623_v29 }
 0xb10   :  { %v2898_v52 = vadd.f32 %v2882_v44, %v2757_v40  ;;  %v3095_v26 = vadd.f32 %v3079_v57, %v2897_v24 }
 0xb12   :  { %v3096_v9 = vadd.f32 %v3080_v31, %v2898_v52  ;;  %4456 = vmatpush3.bf16.msra.mxu1 %v4623_v29  ;;  %v4749_v31 = vmov 0.0   ;;  %v3777_v52 = vld [vmem:[%s6116_s14 + $0x2] ss:$0 sm:$0xff] }
 0xb13   :  { %4473 = vmatprep.subr.bf16.mxu0 %v4749_v31 }
 0xb14   :  { %v3104_v32 = vpack.c.bf16 %v3096_v9, %v3095_v26 }
 0xb16   :  { %4438 = vmatmul.mubr.bf16.gmra.mrb[164].mxu0 %v3104_v32 }
 0xb17   :  { %4489 = vmatprep.mubr.msk.bf16.mxu0 %vm4750_vm6, %v4749_v31 }
 0xbb9   :  { %v4427_v21 = vpop.f32.mrb[152].mxu0 }
 0xbba   :  { %v3221_v37 = vadd.f32 %v4427_v21, %v3751_v28  ;;  %v3212_v53 = vpop.f32.mrb[153].mxu0 }
 0xbbb   :  { %v3213_v20 = vadd.f32 %v3751_v28, %v3212_v53  ;;  %v4428_v50 = vpop.f32.mrb[154].mxu0 }
 0xbbc   :  { %v3224_v0 = vadd.f32 %v4428_v50, %v3751_v28  ;;  %v3215_v19 = vpop.f32.mrb[155].mxu0  ;;  %v3277_v4 = vmax.f32 %v3221_v37, 0.0 }
 0xbbd   :  { %v3216_v51 = vadd.f32 %v3751_v28, %v3215_v19  ;;  %v3275_v18 = vmax.f32 %v3213_v20, 0.0 }
 0xbbe   :  { %v3278_v49 = vmax.f32 %v3224_v0, 0.0 }
 0xbbf   :  { %v3276_v39 = vmax.f32 %v3216_v51, 0.0 }
 0xbc0   :  { %v3292_v30 = vpack.c.bf16 %v3278_v49, %v3277_v4 }
 0xbc1   :  { %v3291_v36 = vpack.c.bf16 %v3276_v39, %v3275_v18 }
 0xbc3   :  { %4457 = vmatprep.mubr.bf16.mxu1 %v3291_v36 }
 0xbc4   :  { %4458 = vmatmul.mubr.bf16.vlgmr.msra.gmra.mrb[168].mxu1 %v3292_v30 }
 0xbc9   :  { %v4431_v35 = vpop.f32.mrb[156].mxu0 }
 0xbca   :  { %v3237_v58 = vadd.f32 %v4431_v35, %v3751_v28  ;;  %v3228_v3 = vpop.f32.mrb[157].mxu0 }
 0xbcb   :  { %v3229_v54 = vadd.f32 %v3751_v28, %v3228_v3  ;;  %v4432_v14 = vpop.f32.mrb[158].mxu0 }
 0xbcc   :  { %v3240_v25 = vadd.f32 %v4432_v14, %v3751_v28  ;;  %v3231_v62 = vpop.f32.mrb[159].mxu0  ;;  %v3281_v59 = vmax.f32 %v3237_v58, 0.0 }
 0xbcd   :  { %v3232_v47 = vadd.f32 %v3751_v28, %v3231_v62  ;;  %v3279_v6 = vmax.f32 %v3229_v54, 0.0 }
 0xbce   :  { %v3282_v8 = vmax.f32 %v3240_v25, 0.0 }
 0xbcf   :  { %v3280_v7 = vmax.f32 %v3232_v47, 0.0 }
 0xbd0   :  { %v3294_v45 = vpack.c.bf16 %v3282_v8, %v3281_v59 }
 0xbd1   :  { %v3293_v43 = vpack.c.bf16 %v3280_v7, %v3279_v6 }
 0xbd3   :  { %4461 = vmatprep.mubr.bf16.mxu1 %v3293_v43 }
 0xbd4   :  { %4462 = vmatmul.mubr.bf16.gmra.mrb[172].mxu1 %v3294_v45 }
 0xbd9   :  { %v4435_v38 = vpop.f32.mrb[160].mxu0 }
 0xbda   :  { %v3253_v17 = vadd.f32 %v4435_v38, %v3751_v28  ;;  %v3244_v63 = vpop.f32.mrb[161].mxu0 }
 0xbdb   :  { %v3245_v2 = vadd.f32 %v3751_v28, %v3244_v63  ;;  %v4436_v22 = vpop.f32.mrb[162].mxu0 }
 0xbdc   :  { %v3256_v48 = vadd.f32 %v4436_v22, %v3751_v28  ;;  %v3247_v55 = vpop.f32.mrb[163].mxu0  ;;  %v3285_v42 = vmax.f32 %v3253_v17, 0.0 }
 0xbdd   :  { %v3248_v10 = vadd.f32 %v3751_v28, %v3247_v55  ;;  %v3283_v27 = vmax.f32 %v3245_v2, 0.0 }
 0xbde   :  { %v3286_v15 = vmax.f32 %v3256_v48, 0.0 }
 0xbdf   :  { %v3284_v34 = vmax.f32 %v3248_v10, 0.0 }
 0xbe0   :  { %v3296_v11 = vpack.c.bf16 %v3286_v15, %v3285_v42 }
 0xbe1   :  { %v3295_v61 = vpack.c.bf16 %v3284_v34, %v3283_v27 }
 0xbe3   :  { %4465 = vmatprep.mubr.bf16.mxu1 %v3295_v61 }
 0xbe4   :  { %4466 = vmatmul.mubr.bf16.gmra.mrb[176].mxu1 %v3296_v11 }
 0xbe9   :  { %v4439_v5 = vpop.f32.mrb[164].mxu0 }
 0xbea   :  { %v3269_v33 = vadd.f32 %v4439_v5, %v3751_v28  ;;  %v3260_v56 = vpop.f32.mrb[165].mxu0 }
 0xbeb   :  { %v3261_v1 = vadd.f32 %v3751_v28, %v3260_v56  ;;  %v4440_v23 = vpop.f32.mrb[166].mxu0 }
 0xbec   :  { %v3272_v41 = vadd.f32 %v4440_v23, %v3751_v28  ;;  %v3263_v13 = vpop.f32.mrb[167].mxu0  ;;  %v3289_v60 = vmax.f32 %v3269_v33, 0.0 }
 0xbed   :  { %v3264_v46 = vadd.f32 %v3751_v28, %v3263_v13  ;;  %v3287_v44 = vmax.f32 %v3261_v1, 0.0 }
 0xbee   :  { %v3290_v12 = vmax.f32 %v3272_v41, 0.0 }
 0xbef   :  { %v3288_v57 = vmax.f32 %v3264_v46, 0.0 }
 0xbf0   :  { %v3298_v24 = vpack.c.bf16 %v3290_v12, %v3289_v60  ;;  %v3493_v60 = vld [vmem:[%s6107_s5] sm:$0xf] }
 0xbf1   :  { %v3297_v40 = vpack.c.bf16 %v3288_v57, %v3287_v44 }
 0xbf3   :  { %4469 = vmatprep.mubr.bf16.mxu1 %v3297_v40 }
 0xbf4   :  { %4470 = vmatmul.mubr.bf16.gmra.mrb[180].mxu1 %v3298_v24 }
 0xc97   :  { %v4459_v26 = vpop.f32.mrb[168].mxu1 }
 0xc98   :  { %v3415_v9 = vadd.f32 %v4459_v26, %v3777_v52  ;;  %v3406_v32 = vpop.f32.mrb[169].mxu1 }
 0xc99   :  { %v3407_v16 = vadd.f32 %v3777_v52, %v3406_v32  ;;  %v4460_v29 = vpop.f32.mrb[170].mxu1 }
 0xc9a   :  { %v3418_v28 = vadd.f32 %v4460_v29, %v3777_v52  ;;  %v3409_v21 = vpop.f32.mrb[171].mxu1  ;;  %v3471_v53 = vmax.f32 %v3415_v9, 0.0 }
 0xc9b   :  { %v3410_v37 = vadd.f32 %v3777_v52, %v3409_v21  ;;  %v3469_v50 = vmax.f32 %v3407_v16, 0.0 }
 0xc9c   :  { %v3472_v20 = vmax.f32 %v3418_v28, 0.0 }
 0xc9d   :  { %v3470_v0 = vmax.f32 %v3410_v37, 0.0 }
 0xc9e   :  { %v3486_v19 = vpack.c.bf16 %v3472_v20, %v3471_v53 }
 0xc9f   :  { %v3485_v51 = vpack.c.bf16 %v3470_v0, %v3469_v50 }
 0xca1   :  { %4474 = vmatpush3.bf16.msra.mxu0 %v3485_v51 }
 0xca2   :  { %4475 = vmatprep.subr.bf16.mxu0 %v4749_v31 }
 0xca5   :  { %4476 = vmatpush3.bf16.msra.mxu0 %v3486_v19 }
 0xca6   :  { %4477 = vmatprep.subr.bf16.mxu0 %v4749_v31 }
 0xca7   :  { %v4463_v4 = vpop.f32.mrb[172].mxu1 }
 0xca8   :  { %v3431_v49 = vadd.f32 %v4463_v4, %v3777_v52  ;;  %v3422_v18 = vpop.f32.mrb[173].mxu1 }
 0xca9   :  { %v3423_v39 = vadd.f32 %v3777_v52, %v3422_v18  ;;  %v4464_v30 = vpop.f32.mrb[174].mxu1 }
 0xcaa   :  { %v3434_v36 = vadd.f32 %v4464_v30, %v3777_v52  ;;  %v3425_v35 = vpop.f32.mrb[175].mxu1  ;;  %v3475_v3 = vmax.f32 %v3431_v49, 0.0 }
 0xcab   :  { %v3426_v58 = vadd.f32 %v3777_v52, %v3425_v35  ;;  %v3473_v14 = vmax.f32 %v3423_v39, 0.0 }
 0xcac   :  { %v3476_v54 = vmax.f32 %v3434_v36, 0.0 }
 0xcad   :  { %v3474_v25 = vmax.f32 %v3426_v58, 0.0 }
 0xcae   :  { %v3488_v62 = vpack.c.bf16 %v3476_v54, %v3475_v3 }
 0xcaf   :  { %v3487_v47 = vpack.c.bf16 %v3474_v25, %v3473_v14 }
 0xcb1   :  { %4478 = vmatpush3.bf16.msra.mxu0 %v3487_v47 }
 0xcb2   :  { %4479 = vmatprep.subr.bf16.mxu0 %v4749_v31 }
 0xcb5   :  { %4480 = vmatpush3.bf16.msra.mxu0 %v3488_v62 }
 0xcb6   :  { %4481 = vmatprep.subr.bf16.mxu0 %v4749_v31 }
 0xcb7   :  { %v4467_v59 = vpop.f32.mrb[176].mxu1 }
 0xcb8   :  { %v3447_v8 = vadd.f32 %v4467_v59, %v3777_v52  ;;  %v3438_v6 = vpop.f32.mrb[177].mxu1 }
 0xcb9   :  { %v3439_v7 = vadd.f32 %v3777_v52, %v3438_v6  ;;  %v4468_v45 = vpop.f32.mrb[178].mxu1 }
 0xcba   :  { %v3450_v43 = vadd.f32 %v4468_v45, %v3777_v52  ;;  %v3441_v38 = vpop.f32.mrb[179].mxu1  ;;  %v3479_v63 = vmax.f32 %v3447_v8, 0.0 }
 0xcbb   :  { %v3442_v17 = vadd.f32 %v3777_v52, %v3441_v38  ;;  %v3477_v22 = vmax.f32 %v3439_v7, 0.0 }
 0xcbc   :  { %v3480_v2 = vmax.f32 %v3450_v43, 0.0 }
 0xcbd   :  { %v3478_v48 = vmax.f32 %v3442_v17, 0.0 }
 0xcbe   :  { %v3490_v55 = vpack.c.bf16 %v3480_v2, %v3479_v63 }
 0xcbf   :  { %v3489_v10 = vpack.c.bf16 %v3478_v48, %v3477_v22 }
 0xcc1   :  { %4482 = vmatpush3.bf16.msra.mxu0 %v3489_v10 }
 0xcc2   :  { %4483 = vmatprep.subr.bf16.mxu0 %v4749_v31 }
 0xcc5   :  { %4484 = vmatpush3.bf16.msra.mxu0 %v3490_v55 }
 0xcc6   :  { %4485 = vmatprep.subr.bf16.mxu0 %v4749_v31 }
 0xcc7   :  { %v4471_v42 = vpop.f32.mrb[180].mxu1 }
 0xcc8   :  { %v3463_v15 = vadd.f32 %v4471_v42, %v3777_v52  ;;  %v3454_v27 = vpop.f32.mrb[181].mxu1 }
 0xcc9   :  { %v3455_v34 = vadd.f32 %v3777_v52, %v3454_v27  ;;  %v4472_v11 = vpop.f32.mrb[182].mxu1 }
 0xcca   :  { %v3466_v61 = vadd.f32 %v4472_v11, %v3777_v52  ;;  %v3457_v5 = vpop.f32.mrb[183].mxu1  ;;  %v3483_v56 = vmax.f32 %v3463_v15, 0.0 }
 0xccb   :  { %v3458_v33 = vadd.f32 %v3777_v52, %v3457_v5  ;;  %v3481_v23 = vmax.f32 %v3455_v34, 0.0 }
 0xccc   :  { %v3484_v1 = vmax.f32 %v3466_v61, 0.0 }
 0xccd   :  { %v3482_v41 = vmax.f32 %v3458_v33, 0.0 }
 0xcce   :  { %v3492_v13 = vpack.c.bf16 %v3484_v1, %v3483_v56 }
 0xccf   :  { %v3491_v46 = vpack.c.bf16 %v3482_v41, %v3481_v23 }
 0xcd1   :  { %4486 = vmatpush3.bf16.msra.mxu0 %v3491_v46 }
 0xcd2   :  { %4487 = vmatprep.subr.bf16.mxu0 %v4749_v31 }
 0xcd5   :  { %4488 = vmatpush3.bf16.msra.mxu0 %v3492_v13 }
 0xcd8   :  { %4490 = vmatmul.mubr.bf16.vlgmr.msra.gmra.mrb[168].mxu0 %v3493_v60 }
 0xdab   :  { %v3528_v12 = vpop.f32.mrb[168].mxu0 }
 0xdac   :  { %3534 = vst [vmem:[#allocation7] sm:$0xff] %v3528_v12  ;;  %v4491_v44 = vpop.f32.mrb[169].mxu0 }
 0xdad   :  { %v3531_v57 = vpop.f32.mrb[170].mxu0 }
 0xdae   :  { %4726 = shalt.err (!%p4723_p6)
}
 0xdaf   :  { %s4727_s11 = scalar_lea.hbm %s6117_s15, 128 }
 0xdb0   :  { %p4728_p7 = scmp.ne.s32.totalorder %s6117_s15, %s4727_s11  ;;  %p4731_p8 = scmp.lt.u32.totalorder %s4727_s11, %s6117_s15 }
 0xdb2   :  { %p4733_p9 = pnand %p4731_p8, %p4728_p7 }
 0xdb4   :  { %4736 = shalt.err (!%p4733_p9)
}
 0xdb5   :  { %3544 = dma.vmem_to_hbm [thread:$0]  %s3542_s30, 128, %s6117_s15, [#allocation4]   ;;  %v4492_v24 = vpop.f32.mrb[171].mxu0 }
 0xdb6   :  { %4741 = dma.done.wait [#allocation4], 128  }
 0xdb7   :  { %4742 = vsyncadd [#allocation4], 4294967168 }
 0xdb8   :  { %3548 = vsyncpa [#allocation3], 1 }
 0xdb9   :  { %3549 = vsyncpa [#allocation6], 1 }
 0xdba   :  { %3550 = vsyncpa [#allocation4], 1 }

</bundles_post_ra>
